<compile_context>
chip_gen: v7x
topology: tpu7x:2x2x1
jax: 0.10.0
libtpu: 0.0.40
codegen_flags: <defaults>
</compile_context>

<pallas_src>
import functools
import math

import jax
import jax.numpy as jnp
from jax.experimental import pallas as pl
from jax.experimental.pallas import tpu as pltpu

LANE = 128      # vreg lane width / minor MXU dim
SUBLANE = 8     # f32 sublane tile
_LN_EPS = 1e-5  # torch.nn.LayerNorm default eps


def _round_up(x: int, m: int) -> int:
    return ((x + m - 1) // m) * m


def _cdiv(a: int, b: int) -> int:
    return -(-a // b)


def _pad2(a, rows, cols):
    """Zero-pad a 2-D array up to [rows, cols]."""
    out = jnp.zeros((rows, cols), a.dtype)
    return out.at[: a.shape[0], : a.shape[1]].set(a)


def _tpu_config():
    """Return (num_tensorcores_sharing_grid, usable_vmem_budget_bytes, row_cap)."""
    kind = ""
    try:
        kind = jax.devices()[0].device_kind.lower()
    except Exception:
        pass
    if "v7" in kind:                                     # v7x: 2 TCs, 64 MiB VMEM per TC
        return 2, 56 << 20, 1024
    if "v6" in kind:                                     # v6e: 1 TC, 128 MiB VMEM
        return 1, 100 << 20, 512
    if "v5e" in kind or "v5 lite" in kind or "v5lite" in kind:
        return 1, 100 << 20, 512                         # v5e: 1 TC, 128 MiB VMEM
    if "v4" in kind or "v5" in kind:                     # v4 / v5p megacore
        return 2, 100 << 20, 512
    return 1, 56 << 20, 512                              # unknown: conservative


def _choose_tm(batch: int, n_tc: int, row_cap: int) -> int:
    """Row tile: multiple of 8, minimizes batch padding, >= n_tc grid steps."""
    bp = _round_up(max(batch, 1), SUBLANE)
    n_steps = max(n_tc, _cdiv(bp, row_cap))
    return _round_up(_cdiv(max(batch, 1), n_steps), SUBLANE)


# -----------------------------------------------------------------------------------
# Kernel helpers
# -----------------------------------------------------------------------------------
def _layer_norm(h, gamma, beta, inv_w, pad_cols, eps):
    """Two-pass LayerNorm over the real width.

    Padded columns of h are exactly zero, so the mean over the padded width equals the
    mean over the real width.  Centering makes padded columns equal -mean, which adds
    exactly pad_cols * mean^2 to the squared sum; subtract it so the variance matches
    torch's (biased, two-pass) LayerNorm over the real width.  gamma/beta are zero in
    the padded lanes, so the LN output stays zero there.
    """
    mean = jnp.sum(h, axis=-1, keepdims=True) * inv_w
    c = h - mean
    var = (jnp.sum(c * c, axis=-1, keepdims=True) - pad_cols * (mean * mean)) * inv_w
    return c * jax.lax.rsqrt(var + eps) * gamma + beta


def _time_proj_input(x_ref, t_ref, wf_ref, twd_ref, twsc_ref, tb1_ref,
                     tw2_ref, tb2_ref, pw_ref, pb_ref, w_in_ref, b_in_ref):
    """Time embedding + proj(x) + ResidualMLP input linear -> hidden state [tm, W]."""
    f32, bf16 = jnp.float32, jnp.bfloat16
    t = t_ref[...]                                      # [tm, 1] f32
    freqs = t * wf_ref[...] * (2.0 * math.pi)           # [tm, half_p]
    te1 = (t * twd_ref[...]                             # direct-t row of the first linear
           + jnp.dot(jnp.sin(freqs).astype(bf16), twsc_ref[0],
                     preferred_element_type=f32)
           + jnp.dot(jnp.cos(freqs).astype(bf16), twsc_ref[1],
                     preferred_element_type=f32)
           + tb1_ref[...])
    # SiLU: multiply-by-reciprocal keeps the divide on the EUP and never yields inf.
    te1 = te1 * pl.reciprocal(1.0 + jnp.exp(-te1), approx=True)
    te = jnp.dot(te1.astype(bf16), tw2_ref[...], preferred_element_type=f32) + tb2_ref[...]

    h0 = (jnp.dot(x_ref[...].astype(bf16), pw_ref[...], preferred_element_type=f32)
          + pb_ref[...] + te)
    return (jnp.dot(h0.astype(bf16), w_in_ref[...], preferred_element_type=f32)
            + b_in_ref[...])


# -----------------------------------------------------------------------------------
# Kernels
# -----------------------------------------------------------------------------------
def _kernel_resident(depth, inv_w, pad_cols, eps,
                     x_ref, t_ref,
                     wf_ref, twd_ref, twsc_ref, tb1_ref, tw2_ref, tb2_ref,
                     pw_ref, pb_ref, w_in_ref, b_in_ref,
                     w_blk_ref, blk_vec_ref, ln_f_ref,
                     w_out_ref, b_out_ref,
                     o_ref, h_ref):
    """All weights resident; grid = (batch tiles,)."""
    f32, bf16 = jnp.float32, jnp.bfloat16

    h_ref[...] = _time_proj_input(x_ref, t_ref, wf_ref, twd_ref, twsc_ref, tb1_ref,
                                  tw2_ref, tb2_ref, pw_ref, pb_ref, w_in_ref, b_in_ref)

    blk_vecs = blk_vec_ref[...]                         # hoisted once: [depth, 3, W]
    for d in range(depth):                              # depth is static -> unrolled
        h = h_ref[...]
        a = jnp.maximum(
            _layer_norm(h, blk_vecs[d, 0:1], blk_vecs[d, 1:2], inv_w, pad_cols, eps), 0.0)
        h_ref[...] = (h
                      + jnp.dot(a.astype(bf16), w_blk_ref[d], preferred_element_type=f32)
                      + blk_vecs[d, 2:3])

    ln_f = ln_f_ref[...]
    hf = _layer_norm(h_ref[...], ln_f[0:1], ln_f[1:2], inv_w, pad_cols, eps)
    a = jnp.maximum(hf, 0.0).astype(bf16)
    o_ref[...] = (jnp.dot(a, w_out_ref[...], preferred_element_type=f32)
                  + b_out_ref[...]).astype(o_ref.dtype)


def _kernel_stream(inv_w, pad_cols, eps,
                   x_ref, t_ref,
                   wf_ref, twd_ref, twsc_ref, tb1_ref, tw2_ref, tb2_ref,
                   pw_ref, pb_ref, w_in_ref, b_in_ref,
                   w_blk_ref, blk_vec_ref, ln_f_ref,
                   w_out_ref, b_out_ref,
                   o_ref, h_ref):
    """Residual-block weights streamed over a depth grid axis; grid = (batch, depth)."""
    f32, bf16 = jnp.float32, jnp.bfloat16
    d = pl.program_id(1)

    @pl.when(d == 0)
    def _():
        h_ref[...] = _time_proj_input(x_ref, t_ref, wf_ref, twd_ref, twsc_ref, tb1_ref,
                                      tw2_ref, tb2_ref, pw_ref, pb_ref, w_in_ref, b_in_ref)

    # One residual block per depth step; the next block's weight DMA overlaps this matmul.
    vec = blk_vec_ref[0]                                # [3, W]
    h = h_ref[...]
    a = jnp.maximum(_layer_norm(h, vec[0:1], vec[1:2], inv_w, pad_cols, eps), 0.0)
    h_ref[...] = (h
                  + jnp.dot(a.astype(bf16), w_blk_ref[0], preferred_element_type=f32)
                  + vec[2:3])

    @pl.when(d == pl.num_programs(1) - 1)
    def _():
        ln_f = ln_f_ref[...]
        hf = _layer_norm(h_ref[...], ln_f[0:1], ln_f[1:2], inv_w, pad_cols, eps)
        a2 = jnp.maximum(hf, 0.0).astype(bf16)
        o_ref[...] = (jnp.dot(a2, w_out_ref[...], preferred_element_type=f32)
                      + b_out_ref[...]).astype(o_ref.dtype)


# -----------------------------------------------------------------------------------
# Wrapper
# -----------------------------------------------------------------------------------
_PARAM_ORDER = ("wf", "twd", "twsc", "tb1", "tw2", "tb2", "pw", "pb",
                "w_in", "b_in", "w_blk", "blk_vec", "ln_f", "w_out", "b_out")


def residual_mlp_denoiser_forward(x, timesteps, params, *, tm=None, stream_blocks=None):
    """x: [batch, d_in] f32, timesteps: [batch] f32 -> [batch, d_in] f32."""
    batch, d_in = x.shape
    assert d_in == params["d_in"]
    depth = params["depth"]
    width = params["width"]

    weights = tuple(params[k] for k in _PARAM_ORDER)
    (wf, twd, twsc, tb1, tw2, tb2, pw, pb, w_in, b_in,
     w_blk, blk_vec, ln_f, w_out, b_out) = weights
    half_p = wf.shape[1]
    d_in_p, dim_t_p = pw.shape
    width_p = w_in.shape[1]
    d_out_p = w_out.shape[1]

    n_tc, vmem_budget, row_cap = _tpu_config()

    # ---- batch tiling: minimize padding, keep all TensorCores busy ---------------------
    if tm is None:
        tm = _choose_tm(batch, n_tc, row_cap)
    if tm % SUBLANE != 0:
        raise ValueError(f"tm={tm} must be a multiple of {SUBLANE}")
    batch_p = _round_up(batch, tm)

    x_p = jnp.zeros((batch_p, d_in_p), jnp.float32).at[:batch, :d_in].set(
        x.astype(jnp.float32))
    t_col = jnp.zeros((batch_p, 1), jnp.float32).at[:batch, 0].set(
        timesteps.astype(jnp.float32))

    # ---- VMEM accounting (weights single-buffered via Buffered(1)) ---------------------
    def nbytes(a):
        return int(a.size) * a.dtype.itemsize

    weight_bytes = sum(nbytes(w) for w in weights)
    w_blk_bytes, blk_vec_bytes = nbytes(w_blk), nbytes(blk_vec)
    other_w_bytes = weight_bytes - w_blk_bytes - blk_vec_bytes
    io_tiles = 2 * 4 * tm * (d_in_p + 1 + d_out_p)        # x / t / out tiles, double-buffered
    scratch_bytes = 4 * tm * width_p                      # hidden-state accumulator
    temp_bytes = 3 * 4 * tm * width_p                     # headroom for compiler temporaries
    per_blk_stream = (width_p * width_p * w_blk.dtype.itemsize
                      + 3 * width_p * blk_vec.dtype.itemsize)

    resident_est = weight_bytes + io_tiles + scratch_bytes + temp_bytes
    stream_est = other_w_bytes + 2 * per_blk_stream + io_tiles + scratch_bytes + temp_bytes

    if stream_blocks is None:
        stream_blocks = depth >= 1 and resident_est > vmem_budget
    if stream_blocks and depth < 1:
        raise ValueError("stream_blocks requires depth >= 1")

    # ---- scheduler hints ----------------------------------------------------------------
    flops = 2 * batch_p * (2 * half_p * dim_t_p + dim_t_p * dim_t_p
                           + d_in_p * dim_t_p + dim_t_p * width_p
                           + depth * width_p * width_p + width_p * d_out_p)
    transcendentals = batch_p * (2 * half_p + dim_t_p + depth + 1)
    io_bytes = 4 * batch_p * (d_in_p + 1 + d_out_p)
    cost = pl.CostEstimate(flops=int(flops),
                           transcendentals=int(transcendentals),
                           bytes_accessed=int(io_bytes + weight_bytes))

    inv_w = 1.0 / float(width)
    pad_cols = float(width_p - width)

    def run(single_buffer_weights):
        if single_buffer_weights:
            def wspec(shape, idx):
                return pl.BlockSpec(shape, idx, pipeline_mode=pl.Buffered(1))
            extra_w = 0
        else:
            def wspec(shape, idx):
                return pl.BlockSpec(shape, idx)
            extra_w = other_w_bytes if stream_blocks else weight_bytes  # 2nd weight buffer

        vmem_est = (stream_est if stream_blocks else resident_est) + extra_w
        vmem_limit = int(min(vmem_budget, max(vmem_est + (2 << 20), 8 << 20)))

        if stream_blocks:
            c2 = lambda i, d: (0, 0)
            c3 = lambda i, d: (0, 0, 0)
            grid = (batch_p // tm, depth)
            in_specs = [
                pl.BlockSpec((tm, d_in_p), lambda i, d: (i, 0)),      # x tile
                pl.BlockSpec((tm, 1), lambda i, d: (i, 0)),           # timestep column
                wspec((1, half_p), c2),                               # fourier freqs
                wspec((1, dim_t_p), c2),                              # time-linear-1: t row
                wspec((2, half_p, dim_t_p), c3),                      # time-linear-1: sin/cos
                wspec((1, dim_t_p), c2),                              # time-linear-1 bias
                wspec((dim_t_p, dim_t_p), c2),                        # time-linear-2 weight
                wspec((1, dim_t_p), c2),                              # time-linear-2 bias
                wspec((d_in_p, dim_t_p), c2),                         # proj weight
                wspec((1, dim_t_p), c2),                              # proj bias
                wspec((dim_t_p, width_p), c2),                        # mlp input linear W
                wspec((1, width_p), c2),                              # mlp input linear b
                pl.BlockSpec((1, width_p, width_p),                   # streamed block W
                             lambda i, d: (d, 0, 0)),
                pl.BlockSpec((1, 3, width_p),                         # streamed [g, b, bias]
                             lambda i, d: (d, 0, 0)),
                wspec((2, width_p), c2),                              # final LN [gamma; beta]
                wspec((width_p, d_out_p), c2),                        # output linear W
                wspec((1, d_out_p), c2),                              # output linear b
            ]
            out_spec = pl.BlockSpec((tm, d_out_p), lambda i, d: (i, 0))
            kernel = functools.partial(_kernel_stream, inv_w, pad_cols, _LN_EPS)
            dims = ("parallel", "arbitrary")
        else:
            c2 = lambda i: (0, 0)
            c3 = lambda i: (0, 0, 0)
            grid = (batch_p // tm,)
            in_specs = [
                pl.BlockSpec((tm, d_in_p), lambda i: (i, 0)),         # x tile
                pl.BlockSpec((tm, 1), lambda i: (i, 0)),              # timestep column
                wspec((1, half_p), c2),                               # fourier freqs
                wspec((1, dim_t_p), c2),                              # time-linear-1: t row
                wspec((2, half_p, dim_t_p), c3),                      # time-linear-1: sin/cos
                wspec((1, dim_t_p), c2),                              # time-linear-1 bias
                wspec((dim_t_p, dim_t_p), c2),                        # time-linear-2 weight
                wspec((1, dim_t_p), c2),                              # time-linear-2 bias
                wspec((d_in_p, dim_t_p), c2),                         # proj weight
                wspec((1, dim_t_p), c2),                              # proj bias
                wspec((dim_t_p, width_p), c2),                        # mlp input linear W
                wspec((1, width_p), c2),                              # mlp input linear b
                wspec((depth, width_p, width_p), c3),                 # stacked block weights
                wspec((depth, 3, width_p), c3),                       # stacked [g, b, bias]
                wspec((2, width_p), c2),                              # final LN [gamma; beta]
                wspec((width_p, d_out_p), c2),                        # output linear W
                wspec((1, d_out_p), c2),                              # output linear b
            ]
            out_spec = pl.BlockSpec((tm, d_out_p), lambda i: (i, 0))
            kernel = functools.partial(_kernel_resident, depth, inv_w, pad_cols, _LN_EPS)
            dims = ("parallel",)

        return pl.pallas_call(
            kernel,
            out_shape=jax.ShapeDtypeStruct((batch_p, d_out_p), jnp.float32),
            grid_spec=pltpu.PrefetchScalarGridSpec(
                num_scalar_prefetch=0,
                grid=grid,
                in_specs=in_specs,
                out_specs=out_spec,
                scratch_shapes=[pltpu.VMEM((tm, width_p), jnp.float32)]),
            compiler_params=pltpu.CompilerParams(
                dimension_semantics=dims,
                vmem_limit_bytes=vmem_limit),
            cost_estimate=cost,
        )(x_p, t_col, *weights)

    try:
        out_p = run(True)     # single-buffered resident weights (pl.Buffered(1))
    except Exception:
        out_p = run(False)    # fallback: default double-buffered specs

    return out_p[:batch, :d_in]


# -----------------------------------------------------------------------------------
# Parameter init (PyTorch-like defaults), pre-transposed + lane-padded + bf16 weights
# -----------------------------------------------------------------------------------
def init_params(key, d_in, dim_t=128, mlp_width=1024, num_layers=6,
                learned_sinusoidal_dim=16):
    half = learned_sinusoidal_dim // 2
    fourier_dim = learned_sinusoidal_dim + 1

    half_p = _round_up(half, LANE)
    d_in_p = _round_up(d_in, LANE)
    dim_t_p = _round_up(dim_t, LANE)
    width_p = _round_up(mlp_width, LANE)

    n_keys = 11 + 2 * num_layers
    keys = iter(jax.random.split(key, n_keys))

    def linear(fan_in, fan_out, rows_p, cols_p):
        bound = 1.0 / math.sqrt(fan_in)
        w = jax.random.uniform(next(keys), (fan_in, fan_out), jnp.float32, -bound, bound)
        b = jax.random.uniform(next(keys), (1, fan_out), jnp.float32, -bound, bound)
        return _pad2(w, rows_p, cols_p), _pad2(b, 1, cols_p)

    # RandomOrLearnedSinusoidalPosEmb frequencies (randn; fixed for random_fourier_features)
    wf = _pad2(jax.random.normal(next(keys), (1, half), jnp.float32), 1, half_p)

    # time_mlp first linear, decomposed by input segment of pos = [t, sin, cos]
    bound = 1.0 / math.sqrt(fourier_dim)
    w_t1 = jax.random.uniform(next(keys), (fourier_dim, dim_t), jnp.float32, -bound, bound)
    b_t1 = jax.random.uniform(next(keys), (1, dim_t), jnp.float32, -bound, bound)
    twd = _pad2(w_t1[0:1, :], 1, dim_t_p)
    twsc = jnp.stack([_pad2(w_t1[1:1 + half, :], half_p, dim_t_p),
                      _pad2(w_t1[1 + half:, :], half_p, dim_t_p)]).astype(jnp.bfloat16)
    tb1 = _pad2(b_t1, 1, dim_t_p)

    tw2, tb2 = linear(dim_t, dim_t, dim_t_p, dim_t_p)        # time_mlp second linear
    pw, pb = linear(d_in, dim_t, d_in_p, dim_t_p)            # proj (unconditional)
    w_in, b_in = linear(dim_t, mlp_width, dim_t_p, width_p)  # ResidualMLP input linear

    gamma = _pad2(jnp.ones((1, mlp_width), jnp.float32), 1, width_p)
    beta = jnp.zeros((1, width_p), jnp.float32)

    w_blks, blk_vecs = [], []
    for _ in range(num_layers):
        w_d, b_d = linear(mlp_width, mlp_width, width_p, width_p)
        w_blks.append(w_d.astype(jnp.bfloat16))
        blk_vecs.append(jnp.concatenate([gamma, beta, b_d], axis=0))   # [3, width_p]

    ln_f = jnp.concatenate([gamma, beta], axis=0)                      # [2, width_p]
    w_out, b_out = linear(mlp_width, d_in, width_p, d_in_p)            # output_dim = d_in

    # TODO(synk): SinusoidalPosEmb branch (learned_sinusoidal_cond=False AND
    #             random_fourier_features=False) and the cond_dim path are not wired up;
    #             the module's default random-Fourier, unconditional path is implemented.
    return {
        "d_in": d_in, "dim_t": dim_t, "width": mlp_width, "depth": num_layers,
        "half": half,
        "wf": wf, "twd": twd, "twsc": twsc, "tb1": tb1,
        "tw2": tw2.astype(jnp.bfloat16), "tb2": tb2,
        "pw": pw.astype(jnp.bfloat16), "pb": pb,
        "w_in": w_in.astype(jnp.bfloat16), "b_in": b_in,
        "w_blk": jnp.stack(w_blks, axis=0),
        "blk_vec": jnp.stack(blk_vecs, axis=0),
        "ln_f": ln_f,
        "w_out": w_out.astype(jnp.bfloat16), "b_out": b_out,
    }


# -----------------------------------------------------------------------------------
# Matched pure-JAX reference (same padded bf16 params, same accumulation recipe)
# -----------------------------------------------------------------------------------
def residual_mlp_denoiser_reference(x, timesteps, params):
    f32, bf16 = jnp.float32, jnp.bfloat16
    d_in = params["d_in"]
    d_in_p = params["pw"].shape[0]
    width_p = params["w_in"].shape[1]
    batch = x.shape[0]
    inv_w = 1.0 / params["width"]
    pad_cols = float(width_p - params["width"])

    def mm(a, w):
        return jnp.dot(a.astype(bf16), w, preferred_element_type=f32)

    def layer_norm(h, gamma, beta):
        mean = jnp.sum(h, axis=-1, keepdims=True) * inv_w
        c = h - mean
        var = (jnp.sum(c * c, axis=-1, keepdims=True) - pad_cols * (mean * mean)) * inv_w
        return c * jax.lax.rsqrt(var + _LN_EPS) * gamma + beta

    x_p = jnp.zeros((batch, d_in_p), f32).at[:, :d_in].set(x.astype(f32))
    t = timesteps.astype(f32).reshape(batch, 1)

    freqs = t * params["wf"] * (2.0 * math.pi)
    te1 = (t * params["twd"]
           + mm(jnp.sin(freqs), params["twsc"][0])
           + mm(jnp.cos(freqs), params["twsc"][1])
           + params["tb1"])
    te1 = te1 * jax.nn.sigmoid(te1)
    te = mm(te1, params["tw2"]) + params["tb2"]

    h = mm(x_p, params["pw"]) + params["pb"] + te
    h = mm(h, params["w_in"]) + params["b_in"]
    for d in range(params["depth"]):
        vec = params["blk_vec"][d]
        a = jnp.maximum(layer_norm(h, vec[0:1], vec[1:2]), 0.0)
        h = h + mm(a, params["w_blk"][d]) + vec[2:3]
    h = layer_norm(h, params["ln_f"][0:1], params["ln_f"][1:2])
    out = mm(jnp.maximum(h, 0.0), params["w_out"]) + params["b_out"]
    return out[:, :d_in]


if __name__ == "__main__":
    key = jax.random.PRNGKey(0)
    k_param, k_x, k_t = jax.random.split(key, 3)

    # Small shapes consistent with the module (defaults scaled down):
    batch, d_in = 16, 8
    params = init_params(k_param, d_in, dim_t=128, mlp_width=256, num_layers=3,
                         learned_sinusoidal_dim=16)

    x = jax.random.normal(k_x, (batch, d_in), jnp.float32)
    timesteps = jax.random.uniform(k_t, (batch,), jnp.float32, 0.0, 1.0)

    ref = residual_mlp_denoiser_reference(x, timesteps, params)

    # Default path (resident weights at this size, tm chosen per TPU generation).
    out = jax.block_until_ready(residual_mlp_denoiser_forward(x, timesteps, params))
    assert out.shape == (batch, d_in)
    err = float(jnp.max(jnp.abs(out - ref)))
    assert jnp.allclose(out, ref, atol=1e-2, rtol=1e-2), \
        f"resident path mismatch vs reference, max abs err {err}"

    # Depth-streaming path (auto-selected for very large widths / v7x VMEM);
    # exercised explicitly here to validate its correctness on small shapes too.
    out_s = jax.block_until_ready(
        residual_mlp_denoiser_forward(x, timesteps, params, stream_blocks=True))
    err_s = float(jnp.max(jnp.abs(out_s - ref)))
    assert jnp.allclose(out_s, ref, atol=1e-2, rtol=1e-2), \
        f"streaming path mismatch vs reference, max abs err {err_s}"

    print("KERNEL_OK")
</pallas_src>

<mosaic_0001>
module attributes {stable_mosaic.version = 11 : i64} {
  func.func @_kernel_resident(%arg0: i32, %arg1: memref<16x128xf32, #tpu.memory_space<vmem>>, %arg2: memref<16x1xf32, #tpu.memory_space<vmem>>, %arg3: memref<1x128xf32, #tpu.memory_space<vmem>>, %arg4: memref<1x128xf32, #tpu.memory_space<vmem>>, %arg5: memref<2x128x128xbf16, #tpu.memory_space<vmem>>, %arg6: memref<1x128xf32, #tpu.memory_space<vmem>>, %arg7: memref<128x128xbf16, #tpu.memory_space<vmem>>, %arg8: memref<1x128xf32, #tpu.memory_space<vmem>>, %arg9: memref<128x128xbf16, #tpu.memory_space<vmem>>, %arg10: memref<1x128xf32, #tpu.memory_space<vmem>>, %arg11: memref<128x256xbf16, #tpu.memory_space<vmem>>, %arg12: memref<1x256xf32, #tpu.memory_space<vmem>>, %arg13: memref<3x256x256xbf16, #tpu.memory_space<vmem>>, %arg14: memref<3x3x256xf32, #tpu.memory_space<vmem>>, %arg15: memref<2x256xf32, #tpu.memory_space<vmem>>, %arg16: memref<256x128xbf16, #tpu.memory_space<vmem>>, %arg17: memref<1x128xf32, #tpu.memory_space<vmem>>, %arg18: memref<16x128xf32, #tpu.memory_space<vmem>>, %arg19: memref<16x256xf32, #tpu.memory_space<vmem>>) attributes {dimension_semantics = [#tpu.dimension_semantics<parallel>], iteration_bounds = array<i64: 1>, scalar_prefetch = 0 : i64, scratch_operands = 1 : i64, tpu.core_type = #tpu.core_type<tc>, window_params = [{transform_indices = @transform_0, window_bounds = array<i64: 16, 128>}, {transform_indices = @transform_1, window_bounds = array<i64: 16, 1>}, {pipeline_mode = #tpu.pipeline_mode<synchronous>, transform_indices = @transform_2, window_bounds = array<i64: 1, 128>}, {pipeline_mode = #tpu.pipeline_mode<synchronous>, transform_indices = @transform_3, window_bounds = array<i64: 1, 128>}, {pipeline_mode = #tpu.pipeline_mode<synchronous>, transform_indices = @transform_4, window_bounds = array<i64: 2, 128, 128>}, {pipeline_mode = #tpu.pipeline_mode<synchronous>, transform_indices = @transform_5, window_bounds = array<i64: 1, 128>}, {pipeline_mode = #tpu.pipeline_mode<synchronous>, transform_indices = @transform_6, window_bounds = array<i64: 128, 128>}, {pipeline_mode = #tpu.pipeline_mode<synchronous>, transform_indices = @transform_7, window_bounds = array<i64: 1, 128>}, {pipeline_mode = #tpu.pipeline_mode<synchronous>, transform_indices = @transform_8, window_bounds = array<i64: 128, 128>}, {pipeline_mode = #tpu.pipeline_mode<synchronous>, transform_indices = @transform_9, window_bounds = array<i64: 1, 128>}, {pipeline_mode = #tpu.pipeline_mode<synchronous>, transform_indices = @transform_10, window_bounds = array<i64: 128, 256>}, {pipeline_mode = #tpu.pipeline_mode<synchronous>, transform_indices = @transform_11, window_bounds = array<i64: 1, 256>}, {pipeline_mode = #tpu.pipeline_mode<synchronous>, transform_indices = @transform_12, window_bounds = array<i64: 3, 256, 256>}, {pipeline_mode = #tpu.pipeline_mode<synchronous>, transform_indices = @transform_13, window_bounds = array<i64: 3, 3, 256>}, {pipeline_mode = #tpu.pipeline_mode<synchronous>, transform_indices = @transform_14, window_bounds = array<i64: 2, 256>}, {pipeline_mode = #tpu.pipeline_mode<synchronous>, transform_indices = @transform_15, window_bounds = array<i64: 256, 128>}, {pipeline_mode = #tpu.pipeline_mode<synchronous>, transform_indices = @transform_16, window_bounds = array<i64: 1, 128>}, {transform_indices = @transform_17, window_bounds = array<i64: 16, 128>}]} {
    %c0 = arith.constant 0 : index
    %c0_0 = arith.constant 0 : index
    %0 = vector.load %arg2[%c0, %c0_0] : memref<16x1xf32, #tpu.memory_space<vmem>>, vector<16x1xf32>
    %c0_1 = arith.constant 0 : index
    %c0_2 = arith.constant 0 : index
    %1 = vector.load %arg3[%c0_1, %c0_2] : memref<1x128xf32, #tpu.memory_space<vmem>>, vector<1x128xf32>
    %2 = vector.broadcast %0 : vector<16x1xf32> to vector<16x128xf32>
    %3 = vector.broadcast %1 : vector<1x128xf32> to vector<16x128xf32>
    %4 = arith.mulf %2, %3 : vector<16x128xf32>
    %cst = arith.constant 6.28318548 : f32
    %5 = vector.broadcast %cst : f32 to vector<16x128xf32>
    %6 = arith.mulf %4, %5 : vector<16x128xf32>
    %c0_3 = arith.constant 0 : index
    %c0_4 = arith.constant 0 : index
    %7 = vector.load %arg4[%c0_3, %c0_4] : memref<1x128xf32, #tpu.memory_space<vmem>>, vector<1x128xf32>
    %8 = vector.broadcast %0 : vector<16x1xf32> to vector<16x128xf32>
    %9 = vector.broadcast %7 : vector<1x128xf32> to vector<16x128xf32>
    %10 = arith.mulf %8, %9 : vector<16x128xf32>
    %11 = math.sin %6 : vector<16x128xf32>
    %12 = arith.truncf %11 : vector<16x128xf32> to vector<16x128xbf16>
    %c0_5 = arith.constant 0 : index
    %c0_6 = arith.constant 0 : index
    %c0_7 = arith.constant 0 : index
    %13 = vector.load %arg5[%c0_5, %c0_6, %c0_7] : memref<2x128x128xbf16, #tpu.memory_space<vmem>>, vector<1x128x128xbf16>
    %14 = vector.shape_cast %13 : vector<1x128x128xbf16> to vector<128x128xbf16>
    %cst_8 = arith.constant dense<0.000000e+00> : vector<16x128xf32>
    %15 = tpu.matmul %12, %14, %cst_8 {dimension_numbers = #tpu.dot_dimension_numbers<[1], [0], [0], [1], [0, 0, 1, 1], [], []>} : vector<16x128xbf16>, vector<128x128xbf16>, vector<16x128xf32> -> vector<16x128xf32>
    %16 = arith.addf %10, %15 : vector<16x128xf32>
    %17 = math.cos %6 : vector<16x128xf32>
    %18 = arith.truncf %17 : vector<16x128xf32> to vector<16x128xbf16>
    %c1 = arith.constant 1 : index
    %c0_9 = arith.constant 0 : index
    %c0_10 = arith.constant 0 : index
    %19 = vector.load %arg5[%c1, %c0_9, %c0_10] : memref<2x128x128xbf16, #tpu.memory_space<vmem>>, vector<1x128x128xbf16>
    %20 = vector.shape_cast %19 : vector<1x128x128xbf16> to vector<128x128xbf16>
    %cst_11 = arith.constant dense<0.000000e+00> : vector<16x128xf32>
    %21 = tpu.matmul %18, %20, %cst_11 {dimension_numbers = #tpu.dot_dimension_numbers<[1], [0], [0], [1], [0, 0, 1, 1], [], []>} : vector<16x128xbf16>, vector<128x128xbf16>, vector<16x128xf32> -> vector<16x128xf32>
    %22 = arith.addf %16, %21 : vector<16x128xf32>
    %c0_12 = arith.constant 0 : index
    %c0_13 = arith.constant 0 : index
    %23 = vector.load %arg6[%c0_12, %c0_13] : memref<1x128xf32, #tpu.memory_space<vmem>>, vector<1x128xf32>
    %24 = vector.broadcast %23 : vector<1x128xf32> to vector<16x128xf32>
    %25 = arith.addf %22, %24 : vector<16x128xf32>
    %cst_14 = arith.constant 0.000000e+00 : f32
    %26 = vector.broadcast %cst_14 : f32 to vector<16x128xf32>
    %27 = arith.subf %26, %25 : vector<16x128xf32>
    %28 = math.exp %27 : vector<16x128xf32>
    %cst_15 = arith.constant 1.000000e+00 : f32
    %29 = vector.broadcast %cst_15 : f32 to vector<16x128xf32>
    %30 = arith.addf %29, %28 : vector<16x128xf32>
    %31 = tpu.reciprocal %30 {approx = true} : vector<16x128xf32> -> vector<16x128xf32>
    %32 = arith.mulf %25, %31 : vector<16x128xf32>
    %33 = arith.truncf %32 : vector<16x128xf32> to vector<16x128xbf16>
    %c0_16 = arith.constant 0 : index
    %c0_17 = arith.constant 0 : index
    %34 = vector.load %arg7[%c0_16, %c0_17] : memref<128x128xbf16, #tpu.memory_space<vmem>>, vector<128x128xbf16>
    %cst_18 = arith.constant dense<0.000000e+00> : vector<16x128xf32>
    %35 = tpu.matmul %33, %34, %cst_18 {dimension_numbers = #tpu.dot_dimension_numbers<[1], [0], [0], [1], [0, 0, 1, 1], [], []>} : vector<16x128xbf16>, vector<128x128xbf16>, vector<16x128xf32> -> vector<16x128xf32>
    %c0_19 = arith.constant 0 : index
    %c0_20 = arith.constant 0 : index
    %36 = vector.load %arg8[%c0_19, %c0_20] : memref<1x128xf32, #tpu.memory_space<vmem>>, vector<1x128xf32>
    %37 = vector.broadcast %36 : vector<1x128xf32> to vector<16x128xf32>
    %38 = arith.addf %35, %37 : vector<16x128xf32>
    %c0_21 = arith.constant 0 : index
    %c0_22 = arith.constant 0 : index
    %39 = vector.load %arg1[%c0_21, %c0_22] : memref<16x128xf32, #tpu.memory_space<vmem>>, vector<16x128xf32>
    %40 = arith.truncf %39 : vector<16x128xf32> to vector<16x128xbf16>
    %c0_23 = arith.constant 0 : index
    %c0_24 = arith.constant 0 : index
    %41 = vector.load %arg9[%c0_23, %c0_24] : memref<128x128xbf16, #tpu.memory_space<vmem>>, vector<128x128xbf16>
    %cst_25 = arith.constant dense<0.000000e+00> : vector<16x128xf32>
    %42 = tpu.matmul %40, %41, %cst_25 {dimension_numbers = #tpu.dot_dimension_numbers<[1], [0], [0], [1], [0, 0, 1, 1], [], []>} : vector<16x128xbf16>, vector<128x128xbf16>, vector<16x128xf32> -> vector<16x128xf32>
    %c0_26 = arith.constant 0 : index
    %c0_27 = arith.constant 0 : index
    %43 = vector.load %arg10[%c0_26, %c0_27] : memref<1x128xf32, #tpu.memory_space<vmem>>, vector<1x128xf32>
    %44 = vector.broadcast %43 : vector<1x128xf32> to vector<16x128xf32>
    %45 = arith.addf %42, %44 : vector<16x128xf32>
    %46 = arith.addf %45, %38 : vector<16x128xf32>
    %47 = arith.truncf %46 : vector<16x128xf32> to vector<16x128xbf16>
    %c0_28 = arith.constant 0 : index
    %c0_29 = arith.constant 0 : index
    %48 = vector.load %arg11[%c0_28, %c0_29] : memref<128x256xbf16, #tpu.memory_space<vmem>>, vector<128x256xbf16>
    %cst_30 = arith.constant dense<0.000000e+00> : vector<16x256xf32>
    %49 = tpu.matmul %47, %48, %cst_30 {dimension_numbers = #tpu.dot_dimension_numbers<[1], [0], [0], [1], [0, 0, 1, 1], [], []>} : vector<16x128xbf16>, vector<128x256xbf16>, vector<16x256xf32> -> vector<16x256xf32>
    %c0_31 = arith.constant 0 : index
    %c0_32 = arith.constant 0 : index
    %50 = vector.load %arg12[%c0_31, %c0_32] : memref<1x256xf32, #tpu.memory_space<vmem>>, vector<1x256xf32>
    %51 = vector.broadcast %50 : vector<1x256xf32> to vector<16x256xf32>
    %52 = arith.addf %49, %51 : vector<16x256xf32>
    %c0_33 = arith.constant 0 : index
    %c0_34 = arith.constant 0 : index
    %53 = vector.load %arg19[%c0_33, %c0_34] : memref<16x256xf32, #tpu.memory_space<vmem>>, vector<16x256xf32>
    tpu.vector_store %arg19[%c0_33, %c0_34], %52 {strides = array<i32>} : memref<16x256xf32, #tpu.memory_space<vmem>>, vector<16x256xf32>,
    %c0_35 = arith.constant 0 : index
    %c0_36 = arith.constant 0 : index
    %c0_37 = arith.constant 0 : index
    %54 = vector.load %arg14[%c0_35, %c0_36, %c0_37] : memref<3x3x256xf32, #tpu.memory_space<vmem>>, vector<3x3x256xf32>
    %c0_38 = arith.constant 0 : index
    %c0_39 = arith.constant 0 : index
    %55 = vector.load %arg19[%c0_38, %c0_39] : memref<16x256xf32, #tpu.memory_space<vmem>>, vector<16x256xf32>
    %56 = vector.extract_strided_slice %54 {offsets = [0, 0, 0], sizes = [1, 1, 256], strides = [1, 1, 1]} : vector<3x3x256xf32> to vector<1x1x256xf32>
    %57 = vector.shape_cast %56 : vector<1x1x256xf32> to vector<1x256xf32>
    %58 = vector.extract_strided_slice %54 {offsets = [0, 1, 0], sizes = [1, 1, 256], strides = [1, 1, 1]} : vector<3x3x256xf32> to vector<1x1x256xf32>
    %59 = vector.shape_cast %58 : vector<1x1x256xf32> to vector<1x256xf32>
    %cst_40 = arith.constant dense<0.000000e+00> : vector<16xf32>
    %60 = vector.multi_reduction <add>, %55, %cst_40 [1] : vector<16x256xf32> to vector<16xf32>
    %61 = vector.shape_cast %60 : vector<16xf32> to vector<16x1xf32>
    %cst_41 = arith.constant 3.906250e-03 : f32
    %62 = vector.broadcast %cst_41 : f32 to vector<16x1xf32>
    %63 = arith.mulf %61, %62 : vector<16x1xf32>
    %64 = vector.broadcast %63 : vector<16x1xf32> to vector<16x256xf32>
    %65 = arith.subf %55, %64 : vector<16x256xf32>
    %66 = arith.mulf %65, %65 : vector<16x256xf32>
    %cst_42 = arith.constant dense<0.000000e+00> : vector<16xf32>
    %67 = vector.multi_reduction <add>, %66, %cst_42 [1] : vector<16x256xf32> to vector<16xf32>
    %68 = vector.shape_cast %67 : vector<16xf32> to vector<16x1xf32>
    %69 = arith.mulf %63, %63 : vector<16x1xf32>
    %cst_43 = arith.constant 0.000000e+00 : f32
    %70 = vector.broadcast %cst_43 : f32 to vector<16x1xf32>
    %71 = arith.mulf %70, %69 : vector<16x1xf32>
    %72 = arith.subf %68, %71 : vector<16x1xf32>
    %cst_44 = arith.constant 3.906250e-03 : f32
    %73 = vector.broadcast %cst_44 : f32 to vector<16x1xf32>
    %74 = arith.mulf %72, %73 : vector<16x1xf32>
    %cst_45 = arith.constant 9.99999974E-6 : f32
    %75 = vector.broadcast %cst_45 : f32 to vector<16x1xf32>
    %76 = arith.addf %74, %75 : vector<16x1xf32>
    %77 = math.rsqrt %76 : vector<16x1xf32>
    %78 = vector.broadcast %77 : vector<16x1xf32> to vector<16x256xf32>
    %79 = arith.mulf %65, %78 : vector<16x256xf32>
    %80 = vector.broadcast %57 : vector<1x256xf32> to vector<16x256xf32>
    %81 = arith.mulf %79, %80 : vector<16x256xf32>
    %82 = vector.broadcast %59 : vector<1x256xf32> to vector<16x256xf32>
    %83 = arith.addf %81, %82 : vector<16x256xf32>
    %cst_46 = arith.constant 0.000000e+00 : f32
    %84 = vector.broadcast %cst_46 : f32 to vector<16x256xf32>
    %85 = arith.maximumf %83, %84 : vector<16x256xf32>
    %86 = arith.truncf %85 : vector<16x256xf32> to vector<16x256xbf16>
    %c0_47 = arith.constant 0 : index
    %c0_48 = arith.constant 0 : index
    %c0_49 = arith.constant 0 : index
    %87 = vector.load %arg13[%c0_47, %c0_48, %c0_49] : memref<3x256x256xbf16, #tpu.memory_space<vmem>>, vector<1x256x256xbf16>
    %88 = vector.shape_cast %87 : vector<1x256x256xbf16> to vector<256x256xbf16>
    %cst_50 = arith.constant dense<0.000000e+00> : vector<16x256xf32>
    %89 = tpu.matmul %86, %88, %cst_50 {dimension_numbers = #tpu.dot_dimension_numbers<[1], [0], [0], [1], [0, 0, 1, 1], [], []>} : vector<16x256xbf16>, vector<256x256xbf16>, vector<16x256xf32> -> vector<16x256xf32>
    %90 = arith.addf %55, %89 : vector<16x256xf32>
    %91 = vector.extract_strided_slice %54 {offsets = [0, 2, 0], sizes = [1, 1, 256], strides = [1, 1, 1]} : vector<3x3x256xf32> to vector<1x1x256xf32>
    %92 = vector.shape_cast %91 : vector<1x1x256xf32> to vector<1x256xf32>
    %93 = vector.broadcast %92 : vector<1x256xf32> to vector<16x256xf32>
    %94 = arith.addf %90, %93 : vector<16x256xf32>
    %c0_51 = arith.constant 0 : index
    %c0_52 = arith.constant 0 : index
    %95 = vector.load %arg19[%c0_51, %c0_52] : memref<16x256xf32, #tpu.memory_space<vmem>>, vector<16x256xf32>
    tpu.vector_store %arg19[%c0_51, %c0_52], %94 {strides = array<i32>} : memref<16x256xf32, #tpu.memory_space<vmem>>, vector<16x256xf32>,
    %c0_53 = arith.constant 0 : index
    %c0_54 = arith.constant 0 : index
    %96 = vector.load %arg19[%c0_53, %c0_54] : memref<16x256xf32, #tpu.memory_space<vmem>>, vector<16x256xf32>
    %97 = vector.extract_strided_slice %54 {offsets = [1, 0, 0], sizes = [1, 1, 256], strides = [1, 1, 1]} : vector<3x3x256xf32> to vector<1x1x256xf32>
    %98 = vector.shape_cast %97 : vector<1x1x256xf32> to vector<1x256xf32>
    %99 = vector.extract_strided_slice %54 {offsets = [1, 1, 0], sizes = [1, 1, 256], strides = [1, 1, 1]} : vector<3x3x256xf32> to vector<1x1x256xf32>
    %100 = vector.shape_cast %99 : vector<1x1x256xf32> to vector<1x256xf32>
    %cst_55 = arith.constant dense<0.000000e+00> : vector<16xf32>
    %101 = vector.multi_reduction <add>, %96, %cst_55 [1] : vector<16x256xf32> to vector<16xf32>
    %102 = vector.shape_cast %101 : vector<16xf32> to vector<16x1xf32>
    %cst_56 = arith.constant 3.906250e-03 : f32
    %103 = vector.broadcast %cst_56 : f32 to vector<16x1xf32>
    %104 = arith.mulf %102, %103 : vector<16x1xf32>
    %105 = vector.broadcast %104 : vector<16x1xf32> to vector<16x256xf32>
    %106 = arith.subf %96, %105 : vector<16x256xf32>
    %107 = arith.mulf %106, %106 : vector<16x256xf32>
    %cst_57 = arith.constant dense<0.000000e+00> : vector<16xf32>
    %108 = vector.multi_reduction <add>, %107, %cst_57 [1] : vector<16x256xf32> to vector<16xf32>
    %109 = vector.shape_cast %108 : vector<16xf32> to vector<16x1xf32>
    %110 = arith.mulf %104, %104 : vector<16x1xf32>
    %cst_58 = arith.constant 0.000000e+00 : f32
    %111 = vector.broadcast %cst_58 : f32 to vector<16x1xf32>
    %112 = arith.mulf %111, %110 : vector<16x1xf32>
    %113 = arith.subf %109, %112 : vector<16x1xf32>
    %cst_59 = arith.constant 3.906250e-03 : f32
    %114 = vector.broadcast %cst_59 : f32 to vector<16x1xf32>
    %115 = arith.mulf %113, %114 : vector<16x1xf32>
    %cst_60 = arith.constant 9.99999974E-6 : f32
    %116 = vector.broadcast %cst_60 : f32 to vector<16x1xf32>
    %117 = arith.addf %115, %116 : vector<16x1xf32>
    %118 = math.rsqrt %117 : vector<16x1xf32>
    %119 = vector.broadcast %118 : vector<16x1xf32> to vector<16x256xf32>
    %120 = arith.mulf %106, %119 : vector<16x256xf32>
    %121 = vector.broadcast %98 : vector<1x256xf32> to vector<16x256xf32>
    %122 = arith.mulf %120, %121 : vector<16x256xf32>
    %123 = vector.broadcast %100 : vector<1x256xf32> to vector<16x256xf32>
    %124 = arith.addf %122, %123 : vector<16x256xf32>
    %cst_61 = arith.constant 0.000000e+00 : f32
    %125 = vector.broadcast %cst_61 : f32 to vector<16x256xf32>
    %126 = arith.maximumf %124, %125 : vector<16x256xf32>
    %127 = arith.truncf %126 : vector<16x256xf32> to vector<16x256xbf16>
    %c1_62 = arith.constant 1 : index
    %c0_63 = arith.constant 0 : index
    %c0_64 = arith.constant 0 : index
    %128 = vector.load %arg13[%c1_62, %c0_63, %c0_64] : memref<3x256x256xbf16, #tpu.memory_space<vmem>>, vector<1x256x256xbf16>
    %129 = vector.shape_cast %128 : vector<1x256x256xbf16> to vector<256x256xbf16>
    %cst_65 = arith.constant dense<0.000000e+00> : vector<16x256xf32>
    %130 = tpu.matmul %127, %129, %cst_65 {dimension_numbers = #tpu.dot_dimension_numbers<[1], [0], [0], [1], [0, 0, 1, 1], [], []>} : vector<16x256xbf16>, vector<256x256xbf16>, vector<16x256xf32> -> vector<16x256xf32>
    %131 = arith.addf %96, %130 : vector<16x256xf32>
    %132 = vector.extract_strided_slice %54 {offsets = [1, 2, 0], sizes = [1, 1, 256], strides = [1, 1, 1]} : vector<3x3x256xf32> to vector<1x1x256xf32>
    %133 = vector.shape_cast %132 : vector<1x1x256xf32> to vector<1x256xf32>
    %134 = vector.broadcast %133 : vector<1x256xf32> to vector<16x256xf32>
    %135 = arith.addf %131, %134 : vector<16x256xf32>
    %c0_66 = arith.constant 0 : index
    %c0_67 = arith.constant 0 : index
    %136 = vector.load %arg19[%c0_66, %c0_67] : memref<16x256xf32, #tpu.memory_space<vmem>>, vector<16x256xf32>
    tpu.vector_store %arg19[%c0_66, %c0_67], %135 {strides = array<i32>} : memref<16x256xf32, #tpu.memory_space<vmem>>, vector<16x256xf32>,
    %c0_68 = arith.constant 0 : index
    %c0_69 = arith.constant 0 : index
    %137 = vector.load %arg19[%c0_68, %c0_69] : memref<16x256xf32, #tpu.memory_space<vmem>>, vector<16x256xf32>
    %138 = vector.extract_strided_slice %54 {offsets = [2, 0, 0], sizes = [1, 1, 256], strides = [1, 1, 1]} : vector<3x3x256xf32> to vector<1x1x256xf32>
    %139 = vector.shape_cast %138 : vector<1x1x256xf32> to vector<1x256xf32>
    %140 = vector.extract_strided_slice %54 {offsets = [2, 1, 0], sizes = [1, 1, 256], strides = [1, 1, 1]} : vector<3x3x256xf32> to vector<1x1x256xf32>
    %141 = vector.shape_cast %140 : vector<1x1x256xf32> to vector<1x256xf32>
    %cst_70 = arith.constant dense<0.000000e+00> : vector<16xf32>
    %142 = vector.multi_reduction <add>, %137, %cst_70 [1] : vector<16x256xf32> to vector<16xf32>
    %143 = vector.shape_cast %142 : vector<16xf32> to vector<16x1xf32>
    %cst_71 = arith.constant 3.906250e-03 : f32
    %144 = vector.broadcast %cst_71 : f32 to vector<16x1xf32>
    %145 = arith.mulf %143, %144 : vector<16x1xf32>
    %146 = vector.broadcast %145 : vector<16x1xf32> to vector<16x256xf32>
    %147 = arith.subf %137, %146 : vector<16x256xf32>
    %148 = arith.mulf %147, %147 : vector<16x256xf32>
    %cst_72 = arith.constant dense<0.000000e+00> : vector<16xf32>
    %149 = vector.multi_reduction <add>, %148, %cst_72 [1] : vector<16x256xf32> to vector<16xf32>
    %150 = vector.shape_cast %149 : vector<16xf32> to vector<16x1xf32>
    %151 = arith.mulf %145, %145 : vector<16x1xf32>
    %cst_73 = arith.constant 0.000000e+00 : f32
    %152 = vector.broadcast %cst_73 : f32 to vector<16x1xf32>
    %153 = arith.mulf %152, %151 : vector<16x1xf32>
    %154 = arith.subf %150, %153 : vector<16x1xf32>
    %cst_74 = arith.constant 3.906250e-03 : f32
    %155 = vector.broadcast %cst_74 : f32 to vector<16x1xf32>
    %156 = arith.mulf %154, %155 : vector<16x1xf32>
    %cst_75 = arith.constant 9.99999974E-6 : f32
    %157 = vector.broadcast %cst_75 : f32 to vector<16x1xf32>
    %158 = arith.addf %156, %157 : vector<16x1xf32>
    %159 = math.rsqrt %158 : vector<16x1xf32>
    %160 = vector.broadcast %159 : vector<16x1xf32> to vector<16x256xf32>
    %161 = arith.mulf %147, %160 : vector<16x256xf32>
    %162 = vector.broadcast %139 : vector<1x256xf32> to vector<16x256xf32>
    %163 = arith.mulf %161, %162 : vector<16x256xf32>
    %164 = vector.broadcast %141 : vector<1x256xf32> to vector<16x256xf32>
    %165 = arith.addf %163, %164 : vector<16x256xf32>
    %cst_76 = arith.constant 0.000000e+00 : f32
    %166 = vector.broadcast %cst_76 : f32 to vector<16x256xf32>
    %167 = arith.maximumf %165, %166 : vector<16x256xf32>
    %168 = arith.truncf %167 : vector<16x256xf32> to vector<16x256xbf16>
    %c2 = arith.constant 2 : index
    %c0_77 = arith.constant 0 : index
    %c0_78 = arith.constant 0 : index
    %169 = vector.load %arg13[%c2, %c0_77, %c0_78] : memref<3x256x256xbf16, #tpu.memory_space<vmem>>, vector<1x256x256xbf16>
    %170 = vector.shape_cast %169 : vector<1x256x256xbf16> to vector<256x256xbf16>
    %cst_79 = arith.constant dense<0.000000e+00> : vector<16x256xf32>
    %171 = tpu.matmul %168, %170, %cst_79 {dimension_numbers = #tpu.dot_dimension_numbers<[1], [0], [0], [1], [0, 0, 1, 1], [], []>} : vector<16x256xbf16>, vector<256x256xbf16>, vector<16x256xf32> -> vector<16x256xf32>
    %172 = arith.addf %137, %171 : vector<16x256xf32>
    %173 = vector.extract_strided_slice %54 {offsets = [2, 2, 0], sizes = [1, 1, 256], strides = [1, 1, 1]} : vector<3x3x256xf32> to vector<1x1x256xf32>
    %174 = vector.shape_cast %173 : vector<1x1x256xf32> to vector<1x256xf32>
    %175 = vector.broadcast %174 : vector<1x256xf32> to vector<16x256xf32>
    %176 = arith.addf %172, %175 : vector<16x256xf32>
    %c0_80 = arith.constant 0 : index
    %c0_81 = arith.constant 0 : index
    %177 = vector.load %arg19[%c0_80, %c0_81] : memref<16x256xf32, #tpu.memory_space<vmem>>, vector<16x256xf32>
    tpu.vector_store %arg19[%c0_80, %c0_81], %176 {strides = array<i32>} : memref<16x256xf32, #tpu.memory_space<vmem>>, vector<16x256xf32>,
    %c0_82 = arith.constant 0 : index
    %c0_83 = arith.constant 0 : index
    %178 = vector.load %arg15[%c0_82, %c0_83] : memref<2x256xf32, #tpu.memory_space<vmem>>, vector<2x256xf32>
    %c0_84 = arith.constant 0 : index
    %c0_85 = arith.constant 0 : index
    %179 = vector.load %arg19[%c0_84, %c0_85] : memref<16x256xf32, #tpu.memory_space<vmem>>, vector<16x256xf32>
    %180 = vector.extract_strided_slice %178 {offsets = [0, 0], sizes = [1, 256], strides = [1, 1]} : vector<2x256xf32> to vector<1x256xf32>
    %181 = vector.extract_strided_slice %178 {offsets = [1, 0], sizes = [1, 256], strides = [1, 1]} : vector<2x256xf32> to vector<1x256xf32>
    %cst_86 = arith.constant dense<0.000000e+00> : vector<16xf32>
    %182 = vector.multi_reduction <add>, %179, %cst_86 [1] : vector<16x256xf32> to vector<16xf32>
    %183 = vector.shape_cast %182 : vector<16xf32> to vector<16x1xf32>
    %cst_87 = arith.constant 3.906250e-03 : f32
    %184 = vector.broadcast %cst_87 : f32 to vector<16x1xf32>
    %185 = arith.mulf %183, %184 : vector<16x1xf32>
    %186 = vector.broadcast %185 : vector<16x1xf32> to vector<16x256xf32>
    %187 = arith.subf %179, %186 : vector<16x256xf32>
    %188 = arith.mulf %187, %187 : vector<16x256xf32>
    %cst_88 = arith.constant dense<0.000000e+00> : vector<16xf32>
    %189 = vector.multi_reduction <add>, %188, %cst_88 [1] : vector<16x256xf32> to vector<16xf32>
    %190 = vector.shape_cast %189 : vector<16xf32> to vector<16x1xf32>
    %191 = arith.mulf %185, %185 : vector<16x1xf32>
    %cst_89 = arith.constant 0.000000e+00 : f32
    %192 = vector.broadcast %cst_89 : f32 to vector<16x1xf32>
    %193 = arith.mulf %192, %191 : vector<16x1xf32>
    %194 = arith.subf %190, %193 : vector<16x1xf32>
    %cst_90 = arith.constant 3.906250e-03 : f32
    %195 = vector.broadcast %cst_90 : f32 to vector<16x1xf32>
    %196 = arith.mulf %194, %195 : vector<16x1xf32>
    %cst_91 = arith.constant 9.99999974E-6 : f32
    %197 = vector.broadcast %cst_91 : f32 to vector<16x1xf32>
    %198 = arith.addf %196, %197 : vector<16x1xf32>
    %199 = math.rsqrt %198 : vector<16x1xf32>
    %200 = vector.broadcast %199 : vector<16x1xf32> to vector<16x256xf32>
    %201 = arith.mulf %187, %200 : vector<16x256xf32>
    %202 = vector.broadcast %180 : vector<1x256xf32> to vector<16x256xf32>
    %203 = arith.mulf %201, %202 : vector<16x256xf32>
    %204 = vector.broadcast %181 : vector<1x256xf32> to vector<16x256xf32>
    %205 = arith.addf %203, %204 : vector<16x256xf32>
    %cst_92 = arith.constant 0.000000e+00 : f32
    %206 = vector.broadcast %cst_92 : f32 to vector<16x256xf32>
    %207 = arith.maximumf %205, %206 : vector<16x256xf32>
    %208 = arith.truncf %207 : vector<16x256xf32> to vector<16x256xbf16>
    %c0_93 = arith.constant 0 : index
    %c0_94 = arith.constant 0 : index
    %209 = vector.load %arg16[%c0_93, %c0_94] : memref<256x128xbf16, #tpu.memory_space<vmem>>, vector<256x128xbf16>
    %cst_95 = arith.constant dense<0.000000e+00> : vector<16x128xf32>
    %210 = tpu.matmul %208, %209, %cst_95 {dimension_numbers = #tpu.dot_dimension_numbers<[1], [0], [0], [1], [0, 0, 1, 1], [], []>} : vector<16x256xbf16>, vector<256x128xbf16>, vector<16x128xf32> -> vector<16x128xf32>
    %c0_96 = arith.constant 0 : index
    %c0_97 = arith.constant 0 : index
    %211 = vector.load %arg17[%c0_96, %c0_97] : memref<1x128xf32, #tpu.memory_space<vmem>>, vector<1x128xf32>
    %212 = vector.broadcast %211 : vector<1x128xf32> to vector<16x128xf32>
    %213 = arith.addf %210, %212 : vector<16x128xf32>
    %c0_98 = arith.constant 0 : index
    %c0_99 = arith.constant 0 : index
    %214 = vector.load %arg18[%c0_98, %c0_99] : memref<16x128xf32, #tpu.memory_space<vmem>>, vector<16x128xf32>
    tpu.vector_store %arg18[%c0_98, %c0_99], %213 {strides = array<i32>} : memref<16x128xf32, #tpu.memory_space<vmem>>, vector<16x128xf32>,
    return
  }
  func.func @transform_0(%arg0: i32) -> (i32, i32) {
    %c0_i32 = arith.constant 0 : i32
    %c0_i32_0 = arith.constant 0 : i32
    return %arg0, %c0_i32 : i32, i32
  }
  func.func @transform_1(%arg0: i32) -> (i32, i32) {
    %c0_i32 = arith.constant 0 : i32
    %c0_i32_0 = arith.constant 0 : i32
    return %arg0, %c0_i32 : i32, i32
  }
  func.func @transform_2(%arg0: i32) -> (i32, i32) {
    %c0_i32 = arith.constant 0 : i32
    %c0_i32_0 = arith.constant 0 : i32
    %c0_i32_1 = arith.constant 0 : i32
    return %c0_i32, %c0_i32_0 : i32, i32
  }
  func.func @transform_3(%arg0: i32) -> (i32, i32) {
    %c0_i32 = arith.constant 0 : i32
    %c0_i32_0 = arith.constant 0 : i32
    %c0_i32_1 = arith.constant 0 : i32
    return %c0_i32, %c0_i32_0 : i32, i32
  }
  func.func @transform_4(%arg0: i32) -> (i32, i32, i32) {
    %c0_i32 = arith.constant 0 : i32
    %c0_i32_0 = arith.constant 0 : i32
    %c0_i32_1 = arith.constant 0 : i32
    %c0_i32_2 = arith.constant 0 : i32
    return %c0_i32, %c0_i32_0, %c0_i32_1 : i32, i32, i32
  }
  func.func @transform_5(%arg0: i32) -> (i32, i32) {
    %c0_i32 = arith.constant 0 : i32
    %c0_i32_0 = arith.constant 0 : i32
    %c0_i32_1 = arith.constant 0 : i32
    return %c0_i32, %c0_i32_0 : i32, i32
  }
  func.func @transform_6(%arg0: i32) -> (i32, i32) {
    %c0_i32 = arith.constant 0 : i32
    %c0_i32_0 = arith.constant 0 : i32
    %c0_i32_1 = arith.constant 0 : i32
    return %c0_i32, %c0_i32_0 : i32, i32
  }
  func.func @transform_7(%arg0: i32) -> (i32, i32) {
    %c0_i32 = arith.constant 0 : i32
    %c0_i32_0 = arith.constant 0 : i32
    %c0_i32_1 = arith.constant 0 : i32
    return %c0_i32, %c0_i32_0 : i32, i32
  }
  func.func @transform_8(%arg0: i32) -> (i32, i32) {
    %c0_i32 = arith.constant 0 : i32
    %c0_i32_0 = arith.constant 0 : i32
    %c0_i32_1 = arith.constant 0 : i32
    return %c0_i32, %c0_i32_0 : i32, i32
  }
  func.func @transform_9(%arg0: i32) -> (i32, i32) {
    %c0_i32 = arith.constant 0 : i32
    %c0_i32_0 = arith.constant 0 : i32
    %c0_i32_1 = arith.constant 0 : i32
    return %c0_i32, %c0_i32_0 : i32, i32
  }
  func.func @transform_10(%arg0: i32) -> (i32, i32) {
    %c0_i32 = arith.constant 0 : i32
    %c0_i32_0 = arith.constant 0 : i32
    %c0_i32_1 = arith.constant 0 : i32
    return %c0_i32, %c0_i32_0 : i32, i32
  }
  func.func @transform_11(%arg0: i32) -> (i32, i32) {
    %c0_i32 = arith.constant 0 : i32
    %c0_i32_0 = arith.constant 0 : i32
    %c0_i32_1 = arith.constant 0 : i32
    return %c0_i32, %c0_i32_0 : i32, i32
  }
  func.func @transform_12(%arg0: i32) -> (i32, i32, i32) {
    %c0_i32 = arith.constant 0 : i32
    %c0_i32_0 = arith.constant 0 : i32
    %c0_i32_1 = arith.constant 0 : i32
    %c0_i32_2 = arith.constant 0 : i32
    return %c0_i32, %c0_i32_0, %c0_i32_1 : i32, i32, i32
  }
  func.func @transform_13(%arg0: i32) -> (i32, i32, i32) {
    %c0_i32 = arith.constant 0 : i32
    %c0_i32_0 = arith.constant 0 : i32
    %c0_i32_1 = arith.constant 0 : i32
    %c0_i32_2 = arith.constant 0 : i32
    return %c0_i32, %c0_i32_0, %c0_i32_1 : i32, i32, i32
  }
  func.func @transform_14(%arg0: i32) -> (i32, i32) {
    %c0_i32 = arith.constant 0 : i32
    %c0_i32_0 = arith.constant 0 : i32
    %c0_i32_1 = arith.constant 0 : i32
    return %c0_i32, %c0_i32_0 : i32, i32
  }
  func.func @transform_15(%arg0: i32) -> (i32, i32) {
    %c0_i32 = arith.constant 0 : i32
    %c0_i32_0 = arith.constant 0 : i32
    %c0_i32_1 = arith.constant 0 : i32
    return %c0_i32, %c0_i32_0 : i32, i32
  }
  func.func @transform_16(%arg0: i32) -> (i32, i32) {
    %c0_i32 = arith.constant 0 : i32
    %c0_i32_0 = arith.constant 0 : i32
    %c0_i32_1 = arith.constant 0 : i32
    return %c0_i32, %c0_i32_0 : i32, i32
  }
  func.func @transform_17(%arg0: i32) -> (i32, i32) {
    %c0_i32 = arith.constant 0 : i32
    %c0_i32_0 = arith.constant 0 : i32
    return %arg0, %c0_i32 : i32, i32
  }
}

module attributes {stable_mosaic.version = 11 : i64} {
  func.func @_kernel_resident(%arg0: i32, %arg1: memref<16x128xf32, #tpu.memory_space<vmem>>, %arg2: memref<16x1xf32, #tpu.memory_space<vmem>>, %arg3: memref<1x128xf32, #tpu.memory_space<vmem>>, %arg4: memref<1x128xf32, #tpu.memory_space<vmem>>, %arg5: memref<2x128x128xbf16, #tpu.memory_space<vmem>>, %arg6: memref<1x128xf32, #tpu.memory_space<vmem>>, %arg7: memref<128x128xbf16, #tpu.memory_space<vmem>>, %arg8: memref<1x128xf32, #tpu.memory_space<vmem>>, %arg9: memref<128x128xbf16, #tpu.memory_space<vmem>>, %arg10: memref<1x128xf32, #tpu.memory_space<vmem>>, %arg11: memref<128x256xbf16, #tpu.memory_space<vmem>>, %arg12: memref<1x256xf32, #tpu.memory_space<vmem>>, %arg13: memref<3x256x256xbf16, #tpu.memory_space<vmem>>, %arg14: memref<3x3x256xf32, #tpu.memory_space<vmem>>, %arg15: memref<2x256xf32, #tpu.memory_space<vmem>>, %arg16: memref<256x128xbf16, #tpu.memory_space<vmem>>, %arg17: memref<1x128xf32, #tpu.memory_space<vmem>>, %arg18: memref<16x128xf32, #tpu.memory_space<vmem>>, %arg19: memref<16x256xf32, #tpu.memory_space<vmem>>) attributes {dimension_semantics = [#tpu.dimension_semantics<parallel>], iteration_bounds = array<i64: 1>, scalar_prefetch = 0 : i64, scratch_operands = 1 : i64, tpu.core_type = #tpu.core_type<tc>, window_params = [{transform_indices = @transform_0, window_bounds = array<i64: 16, 128>}, {transform_indices = @transform_1, window_bounds = array<i64: 16, 1>}, {pipeline_mode = #tpu.pipeline_mode<synchronous>, transform_indices = @transform_2, window_bounds = array<i64: 1, 128>}, {pipeline_mode = #tpu.pipeline_mode<synchronous>, transform_indices = @transform_3, window_bounds = array<i64: 1, 128>}, {pipeline_mode = #tpu.pipeline_mode<synchronous>, transform_indices = @transform_4, window_bounds = array<i64: 2, 128, 128>}, {pipeline_mode = #tpu.pipeline_mode<synchronous>, transform_indices = @transform_5, window_bounds = array<i64: 1, 128>}, {pipeline_mode = #tpu.pipeline_mode<synchronous>, transform_indices = @transform_6, window_bounds = array<i64: 128, 128>}, {pipeline_mode = #tpu.pipeline_mode<synchronous>, transform_indices = @transform_7, window_bounds = array<i64: 1, 128>}, {pipeline_mode = #tpu.pipeline_mode<synchronous>, transform_indices = @transform_8, window_bounds = array<i64: 128, 128>}, {pipeline_mode = #tpu.pipeline_mode<synchronous>, transform_indices = @transform_9, window_bounds = array<i64: 1, 128>}, {pipeline_mode = #tpu.pipeline_mode<synchronous>, transform_indices = @transform_10, window_bounds = array<i64: 128, 256>}, {pipeline_mode = #tpu.pipeline_mode<synchronous>, transform_indices = @transform_11, window_bounds = array<i64: 1, 256>}, {pipeline_mode = #tpu.pipeline_mode<synchronous>, transform_indices = @transform_12, window_bounds = array<i64: 3, 256, 256>}, {pipeline_mode = #tpu.pipeline_mode<synchronous>, transform_indices = @transform_13, window_bounds = array<i64: 3, 3, 256>}, {pipeline_mode = #tpu.pipeline_mode<synchronous>, transform_indices = @transform_14, window_bounds = array<i64: 2, 256>}, {pipeline_mode = #tpu.pipeline_mode<synchronous>, transform_indices = @transform_15, window_bounds = array<i64: 256, 128>}, {pipeline_mode = #tpu.pipeline_mode<synchronous>, transform_indices = @transform_16, window_bounds = array<i64: 1, 128>}, {transform_indices = @transform_17, window_bounds = array<i64: 16, 128>}]} {
    %c0 = arith.constant 0 : index
    %c0_0 = arith.constant 0 : index
    %0 = vector.load %arg2[%c0, %c0_0] : memref<16x1xf32, #tpu.memory_space<vmem>>, vector<16x1xf32>
    %c0_1 = arith.constant 0 : index
    %c0_2 = arith.constant 0 : index
    %1 = vector.load %arg3[%c0_1, %c0_2] : memref<1x128xf32, #tpu.memory_space<vmem>>, vector<1x128xf32>
    %2 = vector.broadcast %0 : vector<16x1xf32> to vector<16x128xf32>
    %3 = vector.broadcast %1 : vector<1x128xf32> to vector<16x128xf32>
    %4 = arith.mulf %2, %3 : vector<16x128xf32>
    %cst = arith.constant 6.28318548 : f32
    %5 = vector.broadcast %cst : f32 to vector<16x128xf32>
    %6 = arith.mulf %4, %5 : vector<16x128xf32>
    %c0_3 = arith.constant 0 : index
    %c0_4 = arith.constant 0 : index
    %7 = vector.load %arg4[%c0_3, %c0_4] : memref<1x128xf32, #tpu.memory_space<vmem>>, vector<1x128xf32>
    %8 = vector.broadcast %0 : vector<16x1xf32> to vector<16x128xf32>
    %9 = vector.broadcast %7 : vector<1x128xf32> to vector<16x128xf32>
    %10 = arith.mulf %8, %9 : vector<16x128xf32>
    %11 = math.sin %6 : vector<16x128xf32>
    %12 = arith.truncf %11 : vector<16x128xf32> to vector<16x128xbf16>
    %c0_5 = arith.constant 0 : index
    %c0_6 = arith.constant 0 : index
    %c0_7 = arith.constant 0 : index
    %13 = vector.load %arg5[%c0_5, %c0_6, %c0_7] : memref<2x128x128xbf16, #tpu.memory_space<vmem>>, vector<1x128x128xbf16>
    %14 = vector.shape_cast %13 : vector<1x128x128xbf16> to vector<128x128xbf16>
    %cst_8 = arith.constant dense<0.000000e+00> : vector<16x128xf32>
    %15 = tpu.matmul %12, %14, %cst_8 {dimension_numbers = #tpu.dot_dimension_numbers<[1], [0], [0], [1], [0, 0, 1, 1], [], []>} : vector<16x128xbf16>, vector<128x128xbf16>, vector<16x128xf32> -> vector<16x128xf32>
    %16 = arith.addf %10, %15 : vector<16x128xf32>
    %17 = math.cos %6 : vector<16x128xf32>
    %18 = arith.truncf %17 : vector<16x128xf32> to vector<16x128xbf16>
    %c1 = arith.constant 1 : index
    %c0_9 = arith.constant 0 : index
    %c0_10 = arith.constant 0 : index
    %19 = vector.load %arg5[%c1, %c0_9, %c0_10] : memref<2x128x128xbf16, #tpu.memory_space<vmem>>, vector<1x128x128xbf16>
    %20 = vector.shape_cast %19 : vector<1x128x128xbf16> to vector<128x128xbf16>
    %cst_11 = arith.constant dense<0.000000e+00> : vector<16x128xf32>
    %21 = tpu.matmul %18, %20, %cst_11 {dimension_numbers = #tpu.dot_dimension_numbers<[1], [0], [0], [1], [0, 0, 1, 1], [], []>} : vector<16x128xbf16>, vector<128x128xbf16>, vector<16x128xf32> -> vector<16x128xf32>
    %22 = arith.addf %16, %21 : vector<16x128xf32>
    %c0_12 = arith.constant 0 : index
    %c0_13 = arith.constant 0 : index
    %23 = vector.load %arg6[%c0_12, %c0_13] : memref<1x128xf32, #tpu.memory_space<vmem>>, vector<1x128xf32>
    %24 = vector.broadcast %23 : vector<1x128xf32> to vector<16x128xf32>
    %25 = arith.addf %22, %24 : vector<16x128xf32>
    %cst_14 = arith.constant 0.000000e+00 : f32
    %26 = vector.broadcast %cst_14 : f32 to vector<16x128xf32>
    %27 = arith.subf %26, %25 : vector<16x128xf32>
    %28 = math.exp %27 : vector<16x128xf32>
    %cst_15 = arith.constant 1.000000e+00 : f32
    %29 = vector.broadcast %cst_15 : f32 to vector<16x128xf32>
    %30 = arith.addf %29, %28 : vector<16x128xf32>
    %31 = tpu.reciprocal %30 {approx = true} : vector<16x128xf32> -> vector<16x128xf32>
    %32 = arith.mulf %25, %31 : vector<16x128xf32>
    %33 = arith.truncf %32 : vector<16x128xf32> to vector<16x128xbf16>
    %c0_16 = arith.constant 0 : index
    %c0_17 = arith.constant 0 : index
    %34 = vector.load %arg7[%c0_16, %c0_17] : memref<128x128xbf16, #tpu.memory_space<vmem>>, vector<128x128xbf16>
    %cst_18 = arith.constant dense<0.000000e+00> : vector<16x128xf32>
    %35 = tpu.matmul %33, %34, %cst_18 {dimension_numbers = #tpu.dot_dimension_numbers<[1], [0], [0], [1], [0, 0, 1, 1], [], []>} : vector<16x128xbf16>, vector<128x128xbf16>, vector<16x128xf32> -> vector<16x128xf32>
    %c0_19 = arith.constant 0 : index
    %c0_20 = arith.constant 0 : index
    %36 = vector.load %arg8[%c0_19, %c0_20] : memref<1x128xf32, #tpu.memory_space<vmem>>, vector<1x128xf32>
    %37 = vector.broadcast %36 : vector<1x128xf32> to vector<16x128xf32>
    %38 = arith.addf %35, %37 : vector<16x128xf32>
    %c0_21 = arith.constant 0 : index
    %c0_22 = arith.constant 0 : index
    %39 = vector.load %arg1[%c0_21, %c0_22] : memref<16x128xf32, #tpu.memory_space<vmem>>, vector<16x128xf32>
    %40 = arith.truncf %39 : vector<16x128xf32> to vector<16x128xbf16>
    %c0_23 = arith.constant 0 : index
    %c0_24 = arith.constant 0 : index
    %41 = vector.load %arg9[%c0_23, %c0_24] : memref<128x128xbf16, #tpu.memory_space<vmem>>, vector<128x128xbf16>
    %cst_25 = arith.constant dense<0.000000e+00> : vector<16x128xf32>
    %42 = tpu.matmul %40, %41, %cst_25 {dimension_numbers = #tpu.dot_dimension_numbers<[1], [0], [0], [1], [0, 0, 1, 1], [], []>} : vector<16x128xbf16>, vector<128x128xbf16>, vector<16x128xf32> -> vector<16x128xf32>
    %c0_26 = arith.constant 0 : index
    %c0_27 = arith.constant 0 : index
    %43 = vector.load %arg10[%c0_26, %c0_27] : memref<1x128xf32, #tpu.memory_space<vmem>>, vector<1x128xf32>
    %44 = vector.broadcast %43 : vector<1x128xf32> to vector<16x128xf32>
    %45 = arith.addf %42, %44 : vector<16x128xf32>
    %46 = arith.addf %45, %38 : vector<16x128xf32>
    %47 = arith.truncf %46 : vector<16x128xf32> to vector<16x128xbf16>
    %c0_28 = arith.constant 0 : index
    %c0_29 = arith.constant 0 : index
    %48 = vector.load %arg11[%c0_28, %c0_29] : memref<128x256xbf16, #tpu.memory_space<vmem>>, vector<128x256xbf16>
    %cst_30 = arith.constant dense<0.000000e+00> : vector<16x256xf32>
    %49 = tpu.matmul %47, %48, %cst_30 {dimension_numbers = #tpu.dot_dimension_numbers<[1], [0], [0], [1], [0, 0, 1, 1], [], []>} : vector<16x128xbf16>, vector<128x256xbf16>, vector<16x256xf32> -> vector<16x256xf32>
    %c0_31 = arith.constant 0 : index
    %c0_32 = arith.constant 0 : index
    %50 = vector.load %arg12[%c0_31, %c0_32] : memref<1x256xf32, #tpu.memory_space<vmem>>, vector<1x256xf32>
    %51 = vector.broadcast %50 : vector<1x256xf32> to vector<16x256xf32>
    %52 = arith.addf %49, %51 : vector<16x256xf32>
    %c0_33 = arith.constant 0 : index
    %c0_34 = arith.constant 0 : index
    %53 = vector.load %arg19[%c0_33, %c0_34] : memref<16x256xf32, #tpu.memory_space<vmem>>, vector<16x256xf32>
    tpu.vector_store %arg19[%c0_33, %c0_34], %52 {strides = array<i32>} : memref<16x256xf32, #tpu.memory_space<vmem>>, vector<16x256xf32>,
    %c0_35 = arith.constant 0 : index
    %c0_36 = arith.constant 0 : index
    %c0_37 = arith.constant 0 : index
    %54 = vector.load %arg14[%c0_35, %c0_36, %c0_37] : memref<3x3x256xf32, #tpu.memory_space<vmem>>, vector<3x3x256xf32>
    %c0_38 = arith.constant 0 : index
    %c0_39 = arith.constant 0 : index
    %55 = vector.load %arg19[%c0_38, %c0_39] : memref<16x256xf32, #tpu.memory_space<vmem>>, vector<16x256xf32>
    %56 = vector.extract_strided_slice %54 {offsets = [0, 0, 0], sizes = [1, 1, 256], strides = [1, 1, 1]} : vector<3x3x256xf32> to vector<1x1x256xf32>
    %57 = vector.shape_cast %56 : vector<1x1x256xf32> to vector<1x256xf32>
    %58 = vector.extract_strided_slice %54 {offsets = [0, 1, 0], sizes = [1, 1, 256], strides = [1, 1, 1]} : vector<3x3x256xf32> to vector<1x1x256xf32>
    %59 = vector.shape_cast %58 : vector<1x1x256xf32> to vector<1x256xf32>
    %cst_40 = arith.constant dense<0.000000e+00> : vector<16xf32>
    %60 = vector.multi_reduction <add>, %55, %cst_40 [1] : vector<16x256xf32> to vector<16xf32>
    %61 = vector.shape_cast %60 : vector<16xf32> to vector<16x1xf32>
    %cst_41 = arith.constant 3.906250e-03 : f32
    %62 = vector.broadcast %cst_41 : f32 to vector<16x1xf32>
    %63 = arith.mulf %61, %62 : vector<16x1xf32>
    %64 = vector.broadcast %63 : vector<16x1xf32> to vector<16x256xf32>
    %65 = arith.subf %55, %64 : vector<16x256xf32>
    %66 = arith.mulf %65, %65 : vector<16x256xf32>
    %cst_42 = arith.constant dense<0.000000e+00> : vector<16xf32>
    %67 = vector.multi_reduction <add>, %66, %cst_42 [1] : vector<16x256xf32> to vector<16xf32>
    %68 = vector.shape_cast %67 : vector<16xf32> to vector<16x1xf32>
    %69 = arith.mulf %63, %63 : vector<16x1xf32>
    %cst_43 = arith.constant 0.000000e+00 : f32
    %70 = vector.broadcast %cst_43 : f32 to vector<16x1xf32>
    %71 = arith.mulf %70, %69 : vector<16x1xf32>
    %72 = arith.subf %68, %71 : vector<16x1xf32>
    %cst_44 = arith.constant 3.906250e-03 : f32
    %73 = vector.broadcast %cst_44 : f32 to vector<16x1xf32>
    %74 = arith.mulf %72, %73 : vector<16x1xf32>
    %cst_45 = arith.constant 9.99999974E-6 : f32
    %75 = vector.broadcast %cst_45 : f32 to vector<16x1xf32>
    %76 = arith.addf %74, %75 : vector<16x1xf32>
    %77 = math.rsqrt %76 : vector<16x1xf32>
    %78 = vector.broadcast %77 : vector<16x1xf32> to vector<16x256xf32>
    %79 = arith.mulf %65, %78 : vector<16x256xf32>
    %80 = vector.broadcast %57 : vector<1x256xf32> to vector<16x256xf32>
    %81 = arith.mulf %79, %80 : vector<16x256xf32>
    %82 = vector.broadcast %59 : vector<1x256xf32> to vector<16x256xf32>
    %83 = arith.addf %81, %82 : vector<16x256xf32>
    %cst_46 = arith.constant 0.000000e+00 : f32
    %84 = vector.broadcast %cst_46 : f32 to vector<16x256xf32>
    %85 = arith.maximumf %83, %84 : vector<16x256xf32>
    %86 = arith.truncf %85 : vector<16x256xf32> to vector<16x256xbf16>
    %c0_47 = arith.constant 0 : index
    %c0_48 = arith.constant 0 : index
    %c0_49 = arith.constant 0 : index
    %87 = vector.load %arg13[%c0_47, %c0_48, %c0_49] : memref<3x256x256xbf16, #tpu.memory_space<vmem>>, vector<1x256x256xbf16>
    %88 = vector.shape_cast %87 : vector<1x256x256xbf16> to vector<256x256xbf16>
    %cst_50 = arith.constant dense<0.000000e+00> : vector<16x256xf32>
    %89 = tpu.matmul %86, %88, %cst_50 {dimension_numbers = #tpu.dot_dimension_numbers<[1], [0], [0], [1], [0, 0, 1, 1], [], []>} : vector<16x256xbf16>, vector<256x256xbf16>, vector<16x256xf32> -> vector<16x256xf32>
    %90 = arith.addf %55, %89 : vector<16x256xf32>
    %91 = vector.extract_strided_slice %54 {offsets = [0, 2, 0], sizes = [1, 1, 256], strides = [1, 1, 1]} : vector<3x3x256xf32> to vector<1x1x256xf32>
    %92 = vector.shape_cast %91 : vector<1x1x256xf32> to vector<1x256xf32>
    %93 = vector.broadcast %92 : vector<1x256xf32> to vector<16x256xf32>
    %94 = arith.addf %90, %93 : vector<16x256xf32>
    %c0_51 = arith.constant 0 : index
    %c0_52 = arith.constant 0 : index
    %95 = vector.load %arg19[%c0_51, %c0_52] : memref<16x256xf32, #tpu.memory_space<vmem>>, vector<16x256xf32>
    tpu.vector_store %arg19[%c0_51, %c0_52], %94 {strides = array<i32>} : memref<16x256xf32, #tpu.memory_space<vmem>>, vector<16x256xf32>,
    %c0_53 = arith.constant 0 : index
    %c0_54 = arith.constant 0 : index
    %96 = vector.load %arg19[%c0_53, %c0_54] : memref<16x256xf32, #tpu.memory_space<vmem>>, vector<16x256xf32>
    %97 = vector.extract_strided_slice %54 {offsets = [1, 0, 0], sizes = [1, 1, 256], strides = [1, 1, 1]} : vector<3x3x256xf32> to vector<1x1x256xf32>
    %98 = vector.shape_cast %97 : vector<1x1x256xf32> to vector<1x256xf32>
    %99 = vector.extract_strided_slice %54 {offsets = [1, 1, 0], sizes = [1, 1, 256], strides = [1, 1, 1]} : vector<3x3x256xf32> to vector<1x1x256xf32>
    %100 = vector.shape_cast %99 : vector<1x1x256xf32> to vector<1x256xf32>
    %cst_55 = arith.constant dense<0.000000e+00> : vector<16xf32>
    %101 = vector.multi_reduction <add>, %96, %cst_55 [1] : vector<16x256xf32> to vector<16xf32>
    %102 = vector.shape_cast %101 : vector<16xf32> to vector<16x1xf32>
    %cst_56 = arith.constant 3.906250e-03 : f32
    %103 = vector.broadcast %cst_56 : f32 to vector<16x1xf32>
    %104 = arith.mulf %102, %103 : vector<16x1xf32>
    %105 = vector.broadcast %104 : vector<16x1xf32> to vector<16x256xf32>
    %106 = arith.subf %96, %105 : vector<16x256xf32>
    %107 = arith.mulf %106, %106 : vector<16x256xf32>
    %cst_57 = arith.constant dense<0.000000e+00> : vector<16xf32>
    %108 = vector.multi_reduction <add>, %107, %cst_57 [1] : vector<16x256xf32> to vector<16xf32>
    %109 = vector.shape_cast %108 : vector<16xf32> to vector<16x1xf32>
    %110 = arith.mulf %104, %104 : vector<16x1xf32>
    %cst_58 = arith.constant 0.000000e+00 : f32
    %111 = vector.broadcast %cst_58 : f32 to vector<16x1xf32>
    %112 = arith.mulf %111, %110 : vector<16x1xf32>
    %113 = arith.subf %109, %112 : vector<16x1xf32>
    %cst_59 = arith.constant 3.906250e-03 : f32
    %114 = vector.broadcast %cst_59 : f32 to vector<16x1xf32>
    %115 = arith.mulf %113, %114 : vector<16x1xf32>
    %cst_60 = arith.constant 9.99999974E-6 : f32
    %116 = vector.broadcast %cst_60 : f32 to vector<16x1xf32>
    %117 = arith.addf %115, %116 : vector<16x1xf32>
    %118 = math.rsqrt %117 : vector<16x1xf32>
    %119 = vector.broadcast %118 : vector<16x1xf32> to vector<16x256xf32>
    %120 = arith.mulf %106, %119 : vector<16x256xf32>
    %121 = vector.broadcast %98 : vector<1x256xf32> to vector<16x256xf32>
    %122 = arith.mulf %120, %121 : vector<16x256xf32>
    %123 = vector.broadcast %100 : vector<1x256xf32> to vector<16x256xf32>
    %124 = arith.addf %122, %123 : vector<16x256xf32>
    %cst_61 = arith.constant 0.000000e+00 : f32
    %125 = vector.broadcast %cst_61 : f32 to vector<16x256xf32>
    %126 = arith.maximumf %124, %125 : vector<16x256xf32>
    %127 = arith.truncf %126 : vector<16x256xf32> to vector<16x256xbf16>
    %c1_62 = arith.constant 1 : index
    %c0_63 = arith.constant 0 : index
    %c0_64 = arith.constant 0 : index
    %128 = vector.load %arg13[%c1_62, %c0_63, %c0_64] : memref<3x256x256xbf16, #tpu.memory_space<vmem>>, vector<1x256x256xbf16>
    %129 = vector.shape_cast %128 : vector<1x256x256xbf16> to vector<256x256xbf16>
    %cst_65 = arith.constant dense<0.000000e+00> : vector<16x256xf32>
    %130 = tpu.matmul %127, %129, %cst_65 {dimension_numbers = #tpu.dot_dimension_numbers<[1], [0], [0], [1], [0, 0, 1, 1], [], []>} : vector<16x256xbf16>, vector<256x256xbf16>, vector<16x256xf32> -> vector<16x256xf32>
    %131 = arith.addf %96, %130 : vector<16x256xf32>
    %132 = vector.extract_strided_slice %54 {offsets = [1, 2, 0], sizes = [1, 1, 256], strides = [1, 1, 1]} : vector<3x3x256xf32> to vector<1x1x256xf32>
    %133 = vector.shape_cast %132 : vector<1x1x256xf32> to vector<1x256xf32>
    %134 = vector.broadcast %133 : vector<1x256xf32> to vector<16x256xf32>
    %135 = arith.addf %131, %134 : vector<16x256xf32>
    %c0_66 = arith.constant 0 : index
    %c0_67 = arith.constant 0 : index
    %136 = vector.load %arg19[%c0_66, %c0_67] : memref<16x256xf32, #tpu.memory_space<vmem>>, vector<16x256xf32>
    tpu.vector_store %arg19[%c0_66, %c0_67], %135 {strides = array<i32>} : memref<16x256xf32, #tpu.memory_space<vmem>>, vector<16x256xf32>,
    %c0_68 = arith.constant 0 : index
    %c0_69 = arith.constant 0 : index
    %137 = vector.load %arg19[%c0_68, %c0_69] : memref<16x256xf32, #tpu.memory_space<vmem>>, vector<16x256xf32>
    %138 = vector.extract_strided_slice %54 {offsets = [2, 0, 0], sizes = [1, 1, 256], strides = [1, 1, 1]} : vector<3x3x256xf32> to vector<1x1x256xf32>
    %139 = vector.shape_cast %138 : vector<1x1x256xf32> to vector<1x256xf32>
    %140 = vector.extract_strided_slice %54 {offsets = [2, 1, 0], sizes = [1, 1, 256], strides = [1, 1, 1]} : vector<3x3x256xf32> to vector<1x1x256xf32>
    %141 = vector.shape_cast %140 : vector<1x1x256xf32> to vector<1x256xf32>
    %cst_70 = arith.constant dense<0.000000e+00> : vector<16xf32>
    %142 = vector.multi_reduction <add>, %137, %cst_70 [1] : vector<16x256xf32> to vector<16xf32>
    %143 = vector.shape_cast %142 : vector<16xf32> to vector<16x1xf32>
    %cst_71 = arith.constant 3.906250e-03 : f32
    %144 = vector.broadcast %cst_71 : f32 to vector<16x1xf32>
    %145 = arith.mulf %143, %144 : vector<16x1xf32>
    %146 = vector.broadcast %145 : vector<16x1xf32> to vector<16x256xf32>
    %147 = arith.subf %137, %146 : vector<16x256xf32>
    %148 = arith.mulf %147, %147 : vector<16x256xf32>
    %cst_72 = arith.constant dense<0.000000e+00> : vector<16xf32>
    %149 = vector.multi_reduction <add>, %148, %cst_72 [1] : vector<16x256xf32> to vector<16xf32>
    %150 = vector.shape_cast %149 : vector<16xf32> to vector<16x1xf32>
    %151 = arith.mulf %145, %145 : vector<16x1xf32>
    %cst_73 = arith.constant 0.000000e+00 : f32
    %152 = vector.broadcast %cst_73 : f32 to vector<16x1xf32>
    %153 = arith.mulf %152, %151 : vector<16x1xf32>
    %154 = arith.subf %150, %153 : vector<16x1xf32>
    %cst_74 = arith.constant 3.906250e-03 : f32
    %155 = vector.broadcast %cst_74 : f32 to vector<16x1xf32>
    %156 = arith.mulf %154, %155 : vector<16x1xf32>
    %cst_75 = arith.constant 9.99999974E-6 : f32
    %157 = vector.broadcast %cst_75 : f32 to vector<16x1xf32>
    %158 = arith.addf %156, %157 : vector<16x1xf32>
    %159 = math.rsqrt %158 : vector<16x1xf32>
    %160 = vector.broadcast %159 : vector<16x1xf32> to vector<16x256xf32>
    %161 = arith.mulf %147, %160 : vector<16x256xf32>
    %162 = vector.broadcast %139 : vector<1x256xf32> to vector<16x256xf32>
    %163 = arith.mulf %161, %162 : vector<16x256xf32>
    %164 = vector.broadcast %141 : vector<1x256xf32> to vector<16x256xf32>
    %165 = arith.addf %163, %164 : vector<16x256xf32>
    %cst_76 = arith.constant 0.000000e+00 : f32
    %166 = vector.broadcast %cst_76 : f32 to vector<16x256xf32>
    %167 = arith.maximumf %165, %166 : vector<16x256xf32>
    %168 = arith.truncf %167 : vector<16x256xf32> to vector<16x256xbf16>
    %c2 = arith.constant 2 : index
    %c0_77 = arith.constant 0 : index
    %c0_78 = arith.constant 0 : index
    %169 = vector.load %arg13[%c2, %c0_77, %c0_78] : memref<3x256x256xbf16, #tpu.memory_space<vmem>>, vector<1x256x256xbf16>
    %170 = vector.shape_cast %169 : vector<1x256x256xbf16> to vector<256x256xbf16>
    %cst_79 = arith.constant dense<0.000000e+00> : vector<16x256xf32>
    %171 = tpu.matmul %168, %170, %cst_79 {dimension_numbers = #tpu.dot_dimension_numbers<[1], [0], [0], [1], [0, 0, 1, 1], [], []>} : vector<16x256xbf16>, vector<256x256xbf16>, vector<16x256xf32> -> vector<16x256xf32>
    %172 = arith.addf %137, %171 : vector<16x256xf32>
    %173 = vector.extract_strided_slice %54 {offsets = [2, 2, 0], sizes = [1, 1, 256], strides = [1, 1, 1]} : vector<3x3x256xf32> to vector<1x1x256xf32>
    %174 = vector.shape_cast %173 : vector<1x1x256xf32> to vector<1x256xf32>
    %175 = vector.broadcast %174 : vector<1x256xf32> to vector<16x256xf32>
    %176 = arith.addf %172, %175 : vector<16x256xf32>
    %c0_80 = arith.constant 0 : index
    %c0_81 = arith.constant 0 : index
    %177 = vector.load %arg19[%c0_80, %c0_81] : memref<16x256xf32, #tpu.memory_space<vmem>>, vector<16x256xf32>
    tpu.vector_store %arg19[%c0_80, %c0_81], %176 {strides = array<i32>} : memref<16x256xf32, #tpu.memory_space<vmem>>, vector<16x256xf32>,
    %c0_82 = arith.constant 0 : index
    %c0_83 = arith.constant 0 : index
    %178 = vector.load %arg15[%c0_82, %c0_83] : memref<2x256xf32, #tpu.memory_space<vmem>>, vector<2x256xf32>
    %c0_84 = arith.constant 0 : index
    %c0_85 = arith.constant 0 : index
    %179 = vector.load %arg19[%c0_84, %c0_85] : memref<16x256xf32, #tpu.memory_space<vmem>>, vector<16x256xf32>
    %180 = vector.extract_strided_slice %178 {offsets = [0, 0], sizes = [1, 256], strides = [1, 1]} : vector<2x256xf32> to vector<1x256xf32>
    %181 = vector.extract_strided_slice %178 {offsets = [1, 0], sizes = [1, 256], strides = [1, 1]} : vector<2x256xf32> to vector<1x256xf32>
    %cst_86 = arith.constant dense<0.000000e+00> : vector<16xf32>
    %182 = vector.multi_reduction <add>, %179, %cst_86 [1] : vector<16x256xf32> to vector<16xf32>
    %183 = vector.shape_cast %182 : vector<16xf32> to vector<16x1xf32>
    %cst_87 = arith.constant 3.906250e-03 : f32
    %184 = vector.broadcast %cst_87 : f32 to vector<16x1xf32>
    %185 = arith.mulf %183, %184 : vector<16x1xf32>
    %186 = vector.broadcast %185 : vector<16x1xf32> to vector<16x256xf32>
    %187 = arith.subf %179, %186 : vector<16x256xf32>
    %188 = arith.mulf %187, %187 : vector<16x256xf32>
    %cst_88 = arith.constant dense<0.000000e+00> : vector<16xf32>
    %189 = vector.multi_reduction <add>, %188, %cst_88 [1] : vector<16x256xf32> to vector<16xf32>
    %190 = vector.shape_cast %189 : vector<16xf32> to vector<16x1xf32>
    %191 = arith.mulf %185, %185 : vector<16x1xf32>
    %cst_89 = arith.constant 0.000000e+00 : f32
    %192 = vector.broadcast %cst_89 : f32 to vector<16x1xf32>
    %193 = arith.mulf %192, %191 : vector<16x1xf32>
    %194 = arith.subf %190, %193 : vector<16x1xf32>
    %cst_90 = arith.constant 3.906250e-03 : f32
    %195 = vector.broadcast %cst_90 : f32 to vector<16x1xf32>
    %196 = arith.mulf %194, %195 : vector<16x1xf32>
    %cst_91 = arith.constant 9.99999974E-6 : f32
    %197 = vector.broadcast %cst_91 : f32 to vector<16x1xf32>
    %198 = arith.addf %196, %197 : vector<16x1xf32>
    %199 = math.rsqrt %198 : vector<16x1xf32>
    %200 = vector.broadcast %199 : vector<16x1xf32> to vector<16x256xf32>
    %201 = arith.mulf %187, %200 : vector<16x256xf32>
    %202 = vector.broadcast %180 : vector<1x256xf32> to vector<16x256xf32>
    %203 = arith.mulf %201, %202 : vector<16x256xf32>
    %204 = vector.broadcast %181 : vector<1x256xf32> to vector<16x256xf32>
    %205 = arith.addf %203, %204 : vector<16x256xf32>
    %cst_92 = arith.constant 0.000000e+00 : f32
    %206 = vector.broadcast %cst_92 : f32 to vector<16x256xf32>
    %207 = arith.maximumf %205, %206 : vector<16x256xf32>
    %208 = arith.truncf %207 : vector<16x256xf32> to vector<16x256xbf16>
    %c0_93 = arith.constant 0 : index
    %c0_94 = arith.constant 0 : index
    %209 = vector.load %arg16[%c0_93, %c0_94] : memref<256x128xbf16, #tpu.memory_space<vmem>>, vector<256x128xbf16>
    %cst_95 = arith.constant dense<0.000000e+00> : vector<16x128xf32>
    %210 = tpu.matmul %208, %209, %cst_95 {dimension_numbers = #tpu.dot_dimension_numbers<[1], [0], [0], [1], [0, 0, 1, 1], [], []>} : vector<16x256xbf16>, vector<256x128xbf16>, vector<16x128xf32> -> vector<16x128xf32>
    %c0_96 = arith.constant 0 : index
    %c0_97 = arith.constant 0 : index
    %211 = vector.load %arg17[%c0_96, %c0_97] : memref<1x128xf32, #tpu.memory_space<vmem>>, vector<1x128xf32>
    %212 = vector.broadcast %211 : vector<1x128xf32> to vector<16x128xf32>
    %213 = arith.addf %210, %212 : vector<16x128xf32>
    %c0_98 = arith.constant 0 : index
    %c0_99 = arith.constant 0 : index
    %214 = vector.load %arg18[%c0_98, %c0_99] : memref<16x128xf32, #tpu.memory_space<vmem>>, vector<16x128xf32>
    tpu.vector_store %arg18[%c0_98, %c0_99], %213 {strides = array<i32>} : memref<16x128xf32, #tpu.memory_space<vmem>>, vector<16x128xf32>,
    return
  }
  func.func @transform_0(%arg0: i32) -> (i32, i32) {
    %c0_i32 = arith.constant 0 : i32
    %c0_i32_0 = arith.constant 0 : i32
    return %arg0, %c0_i32 : i32, i32
  }
  func.func @transform_1(%arg0: i32) -> (i32, i32) {
    %c0_i32 = arith.constant 0 : i32
    %c0_i32_0 = arith.constant 0 : i32
    return %arg0, %c0_i32 : i32, i32
  }
  func.func @transform_2(%arg0: i32) -> (i32, i32) {
    %c0_i32 = arith.constant 0 : i32
    %c0_i32_0 = arith.constant 0 : i32
    %c0_i32_1 = arith.constant 0 : i32
    return %c0_i32, %c0_i32_0 : i32, i32
  }
  func.func @transform_3(%arg0: i32) -> (i32, i32) {
    %c0_i32 = arith.constant 0 : i32
    %c0_i32_0 = arith.constant 0 : i32
    %c0_i32_1 = arith.constant 0 : i32
    return %c0_i32, %c0_i32_0 : i32, i32
  }
  func.func @transform_4(%arg0: i32) -> (i32, i32, i32) {
    %c0_i32 = arith.constant 0 : i32
    %c0_i32_0 = arith.constant 0 : i32
    %c0_i32_1 = arith.constant 0 : i32
    %c0_i32_2 = arith.constant 0 : i32
    return %c0_i32, %c0_i32_0, %c0_i32_1 : i32, i32, i32
  }
  func.func @transform_5(%arg0: i32) -> (i32, i32) {
    %c0_i32 = arith.constant 0 : i32
    %c0_i32_0 = arith.constant 0 : i32
    %c0_i32_1 = arith.constant 0 : i32
    return %c0_i32, %c0_i32_0 : i32, i32
  }
  func.func @transform_6(%arg0: i32) -> (i32, i32) {
    %c0_i32 = arith.constant 0 : i32
    %c0_i32_0 = arith.constant 0 : i32
    %c0_i32_1 = arith.constant 0 : i32
    return %c0_i32, %c0_i32_0 : i32, i32
  }
  func.func @transform_7(%arg0: i32) -> (i32, i32) {
    %c0_i32 = arith.constant 0 : i32
    %c0_i32_0 = arith.constant 0 : i32
    %c0_i32_1 = arith.constant 0 : i32
    return %c0_i32, %c0_i32_0 : i32, i32
  }
  func.func @transform_8(%arg0: i32) -> (i32, i32) {
    %c0_i32 = arith.constant 0 : i32
    %c0_i32_0 = arith.constant 0 : i32
    %c0_i32_1 = arith.constant 0 : i32
    return %c0_i32, %c0_i32_0 : i32, i32
  }
  func.func @transform_9(%arg0: i32) -> (i32, i32) {
    %c0_i32 = arith.constant 0 : i32
    %c0_i32_0 = arith.constant 0 : i32
    %c0_i32_1 = arith.constant 0 : i32
    return %c0_i32, %c0_i32_0 : i32, i32
  }
  func.func @transform_10(%arg0: i32) -> (i32, i32) {
    %c0_i32 = arith.constant 0 : i32
    %c0_i32_0 = arith.constant 0 : i32
    %c0_i32_1 = arith.constant 0 : i32
    return %c0_i32, %c0_i32_0 : i32, i32
  }
  func.func @transform_11(%arg0: i32) -> (i32, i32) {
    %c0_i32 = arith.constant 0 : i32
    %c0_i32_0 = arith.constant 0 : i32
    %c0_i32_1 = arith.constant 0 : i32
    return %c0_i32, %c0_i32_0 : i32, i32
  }
  func.func @transform_12(%arg0: i32) -> (i32, i32, i32) {
    %c0_i32 = arith.constant 0 : i32
    %c0_i32_0 = arith.constant 0 : i32
    %c0_i32_1 = arith.constant 0 : i32
    %c0_i32_2 = arith.constant 0 : i32
    return %c0_i32, %c0_i32_0, %c0_i32_1 : i32, i32, i32
  }
  func.func @transform_13(%arg0: i32) -> (i32, i32, i32) {
    %c0_i32 = arith.constant 0 : i32
    %c0_i32_0 = arith.constant 0 : i32
    %c0_i32_1 = arith.constant 0 : i32
    %c0_i32_2 = arith.constant 0 : i32
    return %c0_i32, %c0_i32_0, %c0_i32_1 : i32, i32, i32
  }
  func.func @transform_14(%arg0: i32) -> (i32, i32) {
    %c0_i32 = arith.constant 0 : i32
    %c0_i32_0 = arith.constant 0 : i32
    %c0_i32_1 = arith.constant 0 : i32
    return %c0_i32, %c0_i32_0 : i32, i32
  }
  func.func @transform_15(%arg0: i32) -> (i32, i32) {
    %c0_i32 = arith.constant 0 : i32
    %c0_i32_0 = arith.constant 0 : i32
    %c0_i32_1 = arith.constant 0 : i32
    return %c0_i32, %c0_i32_0 : i32, i32
  }
  func.func @transform_16(%arg0: i32) -> (i32, i32) {
    %c0_i32 = arith.constant 0 : i32
    %c0_i32_0 = arith.constant 0 : i32
    %c0_i32_1 = arith.constant 0 : i32
    return %c0_i32, %c0_i32_0 : i32, i32
  }
  func.func @transform_17(%arg0: i32) -> (i32, i32) {
    %c0_i32 = arith.constant 0 : i32
    %c0_i32_0 = arith.constant 0 : i32
    return %arg0, %c0_i32 : i32, i32
  }
}

</mosaic_0001>

<bundles_post_ra>
// kernel: tpu_custom_call.1
= control target key start
LH: loop header
LB: loop body
LE: loop exit
PB: predicated region body
PF: predicated region fallthrough
CT: control target
= control target key end

     0   :  { %s4079_s0 = inlined_call_operand.vmem [shape: f32[16,128], index: 0, kind: input, shape index: {}]   ;;  %s4080_s1 = inlined_call_operand.vmem [shape: f32[16,1], index: 1, kind: input, shape index: {}]   ;;  %s4081_s2 = inlined_call_operand.vmem [shape: f32[1,128], index: 2, kind: input, shape index: {}]   ;;  %s4082_s3 = inlined_call_operand.hbm [shape: f32[1,128], index: 3, kind: input, shape index: {}]   ;;  %s4083_s4 = inlined_call_operand.hbm [shape: bf16[2,128,128], index: 4, kind: input, shape index: {}]   ;;  %s4084_s5 = inlined_call_operand.hbm [shape: f32[1,128], index: 5, kind: input, shape index: {}]   ;;  %s4085_s6 = inlined_call_operand.hbm [shape: bf16[128,128], index: 6, kind: input, shape index: {}]   ;;  %s4086_s7 = inlined_call_operand.hbm [shape: f32[1,128], index: 7, kind: input, shape index: {}]   ;;  %s4087_s8 = inlined_call_operand.hbm [shape: bf16[128,128], index: 8, kind: input, shape index: {}]   ;;  %s4088_s9 = inlined_call_operand.vmem [shape: f32[1,128], index: 9, kind: input, shape index: {}]   ;;  %s4089_s10 = inlined_call_operand.hbm [shape: bf16[128,256], index: 10, kind: input, shape index: {}]   ;;  %s4090_s11 = inlined_call_operand.vmem [shape: f32[1,256], index: 11, kind: input, shape index: {}]   ;;  %s4091_s12 = inlined_call_operand.hbm [shape: bf16[3,256,256], index: 12, kind: input, shape index: {}]   ;;  %s4092_s13 = inlined_call_operand.vmem [shape: f32[3,3,256], index: 13, kind: input, shape index: {}]   ;;  %s4093_s14 = inlined_call_operand.vmem [shape: f32[2,256], index: 14, kind: input, shape index: {}]   ;;  %s4094_s15 = inlined_call_operand.hbm [shape: bf16[256,128], index: 15, kind: input, shape index: {}]   ;;  %s4095_s16 = inlined_call_operand.vmem [shape: f32[1,128], index: 16, kind: input, shape index: {}]   ;;  %s4096_s17 = inlined_call_operand.hbm [shape: f32[16,128], index: 17, kind: output, shape index: {}]  }
   0x1   :  { %4100 = sst [smem:[#allocation25_spill]] %s4079_s0 }
   0x2   :  { %4101 = sst [smem:[#allocation26_spill]] %s4080_s1 }
   0x3   :  { %4102 = sst [smem:[#allocation27_spill]] %s4096_s17 }
   0x4   :  { %22 = vsyncpa [#allocation4], 0 }
   0x5   :  { %23 = vsyncpa [#allocation7], 0 }
   0x6   :  { %24 = vsyncpa [#allocation10], 0 }
   0x7   :  { %25 = vsyncpa [#allocation13], 0 }
   0x8   :  { %26 = vsyncpa [#allocation16], 0 }
   0x9   :  { %27 = vsyncpa [#allocation5], 0  ;;  %s3456_s24 = smov [#allocation6]   ;;  %s3224_s28 = scalar_lea.hbm %s4083_s4, 2048 }
   0xa   :  { %s49_s25 = sshll.u32 %s3456_s24, 4  ;;  %p3225_p0 = scmp.ne.s32.totalorder %s4083_s4, %s3224_s28  ;;  %s50_s25 = int_to_ptr.vmem [resolvable:$true] %s49_s25 }
   0xb   :  { %p3228_p1 = scmp.lt.u32.totalorder %s3224_s28, %s4083_s4 }
   0xd   :  { %p3230_p2 = pnand %p3228_p1, %p3225_p0 }
   0xf   :  { %3233 = shalt.err (!%p3230_p2)
}
  0x10   :  { %s3234_s19 = scalar_lea.vmem %s50_s25, 2048  ;;  %p3239_p4 = scmp.lt.s32.totalorder %s50_s25, %s50_s25 }
  0x11   :  { %p3235_p3 = scmp.ne.s32.totalorder %s50_s25, %s3234_s19  ;;  %p3240_p5 = scmp.lt.s32.totalorder %s3234_s19, %s3234_s19 }
  0x13   :  { %p3241_p6 = por %p3240_p5, %p3239_p4 }
  0x15   :  { %p3242_p7 = pnand %p3241_p6, %p3235_p3 }
  0x17   :  { %3245 = shalt.err (!%p3242_p7)
}
  0x18   :  { %s3457_s1 = smov 64   ;;  %s3458_s20 = smov 4  }
  0x19   :  { %55 = dma.hbm_to_vmem [thread:$0]  %s4083_s4, 2048, %s50_s25, [#allocation7], %s3457_s1, %s3457_s1, %s3458_s20  }
  0x1a   :  { %s3459_s23 = smov [#allocation9]   ;;  %s3460_s26 = smov [#allocation12]  }
  0x1b   :  { %s71_s24 = sshll.u32 %s3459_s23, 4  ;;  %s93_s27 = sshll.u32 %s3460_s26, 4  ;;  %s72_s24 = int_to_ptr.vmem [resolvable:$true] %s71_s24  ;;  %s94_s27 = int_to_ptr.vmem [resolvable:$true] %s93_s27 }
  0x1c   :  { %s3246_s0 = scalar_lea.hbm %s4085_s6, 1024 }
  0x1d   :  { %p3247_p8 = scmp.ne.s32.totalorder %s4085_s6, %s3246_s0  ;;  %p3250_p9 = scmp.lt.u32.totalorder %s3246_s0, %s4085_s6 }
  0x1f   :  { %p3252_p10 = pnand %p3250_p9, %p3247_p8 }
  0x21   :  { %3255 = shalt.err (!%p3252_p10)
}
  0x22   :  { %s3256_s4 = scalar_lea.vmem %s72_s24, 1024  ;;  %p3261_p12 = scmp.lt.s32.totalorder %s72_s24, %s72_s24 }
  0x23   :  { %p3257_p11 = scmp.ne.s32.totalorder %s72_s24, %s3256_s4  ;;  %p3262_p13 = scmp.lt.s32.totalorder %s3256_s4, %s3256_s4 }
  0x25   :  { %p3263_p0 = por %p3262_p13, %p3261_p12 }
  0x27   :  { %p3264_p1 = pnand %p3263_p0, %p3257_p11 }
  0x29   :  { %3267 = shalt.err (!%p3264_p1)
}
  0x2a   :  { %77 = dma.hbm_to_vmem [thread:$0]  %s4085_s6, 1024, %s72_s24, [#allocation10], %s3457_s1, %s3457_s1, %s3458_s20  }
  0x2b   :  { %s3268_s23 = scalar_lea.hbm %s4087_s8, 1024 }
  0x2c   :  { %p3269_p2 = scmp.ne.s32.totalorder %s4087_s8, %s3268_s23  ;;  %p3272_p3 = scmp.lt.u32.totalorder %s3268_s23, %s4087_s8 }
  0x2e   :  { %p3274_p4 = pnand %p3272_p3, %p3269_p2 }
  0x30   :  { %3277 = shalt.err (!%p3274_p4)
}
  0x31   :  { %s3278_s30 = scalar_lea.vmem %s94_s27, 1024  ;;  %p3283_p6 = scmp.lt.s32.totalorder %s94_s27, %s94_s27 }
  0x32   :  { %p3279_p5 = scmp.ne.s32.totalorder %s94_s27, %s3278_s30  ;;  %p3284_p7 = scmp.lt.s32.totalorder %s3278_s30, %s3278_s30 }
  0x34   :  { %p3285_p8 = por %p3284_p7, %p3283_p6 }
  0x36   :  { %p3286_p9 = pnand %p3285_p8, %p3279_p5 }
  0x38   :  { %3289 = shalt.err (!%p3286_p9)
}
  0x39   :  { %99 = dma.hbm_to_vmem [thread:$0]  %s4087_s8, 1024, %s94_s27, [#allocation13], %s3457_s1, %s3457_s1, %s3458_s20  }
  0x3a   :  { %s3461_s18 = smov [#allocation15]   ;;  %s3462_s4 = smov [#allocation3]  }
  0x3b   :  { %s121_s19 = sshll.u32 %s3461_s18, 4  ;;  %s40_s25 = sshll.u32 %s3462_s4, 4  ;;  %s122_s19 = int_to_ptr.vmem [resolvable:$true] %s121_s19  ;;  %s41_s25 = int_to_ptr.vmem [resolvable:$true] %s40_s25 }
  0x3c   :  { %s3290_s17 = scalar_lea.hbm %s4091_s12, 12288 }
  0x3d   :  { %p3291_p10 = scmp.ne.s32.totalorder %s4091_s12, %s3290_s17  ;;  %p3294_p11 = scmp.lt.u32.totalorder %s3290_s17, %s4091_s12 }
  0x3f   :  { %p3296_p12 = pnand %p3294_p11, %p3291_p10 }
  0x41   :  { %3299 = shalt.err (!%p3296_p12)
}
  0x42   :  { %s3300_s8 = scalar_lea.vmem %s122_s19, 12288  ;;  %p3305_p0 = scmp.lt.s32.totalorder %s122_s19, %s122_s19 }
  0x43   :  { %p3301_p13 = scmp.ne.s32.totalorder %s122_s19, %s3300_s8  ;;  %p3306_p1 = scmp.lt.s32.totalorder %s3300_s8, %s3300_s8 }
  0x45   :  { %p3307_p2 = por %p3306_p1, %p3305_p0 }
  0x47   :  { %p3308_p3 = pnand %p3307_p2, %p3301_p13 }
  0x49   :  { %3311 = shalt.err (!%p3308_p3)
}
  0x4a   :  { %s3463_s27 = smov 128   ;;  %s3464_s0 = smov 8  }
  0x4b   :  { %127 = dma.hbm_to_vmem [thread:$0]  %s4091_s12, 12288, %s122_s19, [#allocation16], %s3463_s27, %s3463_s27, %s3464_s0  }
  0x4c   :  { %s3312_s4 = scalar_lea.hbm %s4082_s3, 16 }
  0x4d   :  { %p3313_p4 = scmp.ne.s32.totalorder %s4082_s3, %s3312_s4  ;;  %p3316_p5 = scmp.lt.u32.totalorder %s3312_s4, %s4082_s3 }
  0x4f   :  { %p3318_p6 = pnand %p3316_p5, %p3313_p4 }
  0x51   :  { %3321 = shalt.err (!%p3318_p6)
}
  0x52   :  { %s3322_s26 = scalar_lea.vmem %s41_s25, 16  ;;  %s3326_s28 = scalar_lea.vmem %s41_s25, 32 }
  0x53   :  { %p3323_p7 = scmp.ne.s32.totalorder %s41_s25, %s3322_s26  ;;  %p3327_p8 = scmp.lt.s32.totalorder %s41_s25, %s41_s25 }
  0x54   :  { %p3328_p9 = scmp.lt.s32.totalorder %s3326_s28, %s3322_s26 }
  0x56   :  { %p3329_p10 = por %p3328_p9, %p3327_p8 }
  0x58   :  { %p3330_p11 = pnand %p3329_p10, %p3323_p7 }
  0x5a   :  { %3333 = shalt.err (!%p3330_p11)
}
  0x5b   :  { %43 = dma.hbm_to_vmem [thread:$0]  %s4082_s3, 16, %s41_s25, [#allocation4]  }
  0x5c   :  { %s3465_s29 = smov [#allocation8]   ;;  %s3466_s30 = smov [#allocation11]  }
  0x5d   :  { %s62_s8 = sshll.u32 %s3465_s29, 4  ;;  %s84_s6 = sshll.u32 %s3466_s30, 4  ;;  %s63_s8 = int_to_ptr.vmem [resolvable:$true] %s62_s8  ;;  %s85_s6 = int_to_ptr.vmem [resolvable:$true] %s84_s6 }
  0x5e   :  { %s3334_s4 = scalar_lea.hbm %s4084_s5, 16 }
  0x5f   :  { %p3335_p12 = scmp.ne.s32.totalorder %s4084_s5, %s3334_s4  ;;  %p3338_p13 = scmp.lt.u32.totalorder %s3334_s4, %s4084_s5 }
  0x61   :  { %p3340_p0 = pnand %p3338_p13, %p3335_p12 }
  0x63   :  { %3343 = shalt.err (!%p3340_p0)
}
  0x64   :  { %s3344_s3 = scalar_lea.vmem %s63_s8, 16  ;;  %s3348_s25 = scalar_lea.vmem %s63_s8, 32 }
  0x65   :  { %p3345_p1 = scmp.ne.s32.totalorder %s63_s8, %s3344_s3  ;;  %p3349_p2 = scmp.lt.s32.totalorder %s63_s8, %s63_s8 }
  0x66   :  { %p3350_p3 = scmp.lt.s32.totalorder %s3348_s25, %s3344_s3 }
  0x68   :  { %p3351_p4 = por %p3350_p3, %p3349_p2 }
  0x6a   :  { %p3352_p5 = pnand %p3351_p4, %p3345_p1 }
  0x6c   :  { %3355 = shalt.err (!%p3352_p5)
}
  0x6d   :  { %65 = dma.hbm_to_vmem [thread:$0]  %s4084_s5, 16, %s63_s8, [#allocation7]  }
  0x6e   :  { %s3356_s29 = scalar_lea.hbm %s4086_s7, 16 }
  0x6f   :  { %p3357_p6 = scmp.ne.s32.totalorder %s4086_s7, %s3356_s29  ;;  %p3360_p7 = scmp.lt.u32.totalorder %s3356_s29, %s4086_s7 }
  0x71   :  { %p3362_p8 = pnand %p3360_p7, %p3357_p6 }
  0x73   :  { %3365 = shalt.err (!%p3362_p8)
}
  0x74   :  { %s3366_s21 = scalar_lea.vmem %s85_s6, 16  ;;  %s3370_s22 = scalar_lea.vmem %s85_s6, 32 }
  0x75   :  { %p3367_p9 = scmp.ne.s32.totalorder %s85_s6, %s3366_s21  ;;  %p3371_p10 = scmp.lt.s32.totalorder %s85_s6, %s85_s6 }
  0x76   :  { %p3372_p11 = scmp.lt.s32.totalorder %s3370_s22, %s3366_s21 }
  0x78   :  { %p3373_p12 = por %p3372_p11, %p3371_p10 }
  0x7a   :  { %p3374_p13 = pnand %p3373_p12, %p3367_p9 }
  0x7c   :  { %3377 = shalt.err (!%p3374_p13)
}
  0x7d   :  { %87 = dma.hbm_to_vmem [thread:$0]  %s4086_s7, 16, %s85_s6, [#allocation10]  }
  0x7e   :  { %s3467_s17 = smov [#allocation14]   ;;  %s3468_s3 = smov [#allocation17]  }
  0x7f   :  { %s107_s23 = sshll.u32 %s3467_s17, 4  ;;  %s137_s25 = sshll.u32 %s3468_s3, 4  ;;  %s108_s23 = int_to_ptr.vmem [resolvable:$true] %s107_s23  ;;  %s138_s25 = int_to_ptr.vmem [resolvable:$true] %s137_s25 }
  0x80   :  { %s3378_s12 = scalar_lea.hbm %s4089_s10, 2048 }
  0x81   :  { %p3379_p0 = scmp.ne.s32.totalorder %s4089_s10, %s3378_s12  ;;  %p3382_p1 = scmp.lt.u32.totalorder %s3378_s12, %s4089_s10 }
  0x83   :  { %p3384_p2 = pnand %p3382_p1, %p3379_p0 }
  0x85   :  { %3387 = shalt.err (!%p3384_p2)
}
  0x86   :  { %s3388_s7 = scalar_lea.vmem %s108_s23, 2048  ;;  %p3393_p4 = scmp.lt.s32.totalorder %s108_s23, %s108_s23 }
  0x87   :  { %p3389_p3 = scmp.ne.s32.totalorder %s108_s23, %s3388_s7  ;;  %p3394_p5 = scmp.lt.s32.totalorder %s3388_s7, %s3388_s7 }
  0x89   :  { %p3395_p6 = por %p3394_p5, %p3393_p4 }
  0x8b   :  { %p3396_p7 = pnand %p3395_p6, %p3389_p3 }
  0x8d   :  { %3399 = shalt.err (!%p3396_p7)
}
  0x8e   :  { %113 = dma.hbm_to_vmem [thread:$0]  %s4089_s10, 2048, %s108_s23, [#allocation13], %s3463_s27, %s3463_s27, %s3464_s0  }
  0x8f   :  { %s3400_s22 = scalar_lea.hbm %s4094_s15, 2048 }
  0x90   :  { %p3401_p8 = scmp.ne.s32.totalorder %s4094_s15, %s3400_s22  ;;  %p3404_p9 = scmp.lt.u32.totalorder %s3400_s22, %s4094_s15 }
  0x92   :  { %p3406_p10 = pnand %p3404_p9, %p3401_p8 }
  0x94   :  { %3409 = shalt.err (!%p3406_p10)
}
  0x95   :  { %s3410_s26 = scalar_lea.vmem %s138_s25, 2048  ;;  %p3415_p12 = scmp.lt.s32.totalorder %s138_s25, %s138_s25 }
  0x96   :  { %p3411_p11 = scmp.ne.s32.totalorder %s138_s25, %s3410_s26  ;;  %p3416_p13 = scmp.lt.s32.totalorder %s3410_s26, %s3410_s26 }
  0x98   :  { %p3417_p0 = por %p3416_p13, %p3415_p12 }
  0x9a   :  { %p3418_p1 = pnand %p3417_p0, %p3411_p11 }
  0x9c   :  { %3421 = shalt.err (!%p3418_p1)
}
  0x9d   :  { %143 = dma.hbm_to_vmem [thread:$0]  %s4094_s15, 2048, %s138_s25, [#allocation16], %s3457_s1, %s3457_s1, %s3458_s20  }
  0x9e   :  { %3444 = dma.done.wait [#allocation4], 16  }
  0x9f   :  { %3445 = vsyncadd [#allocation4], 4294967280 }
  0xa0   :  { %3446 = dma.done.wait [#allocation7], 2064  }
  0xa1   :  { %3447 = vsyncadd [#allocation7], 4294965232 }
  0xa2   :  { %3448 = dma.done.wait [#allocation10], 1040  }
  0xa3   :  { %3449 = vsyncadd [#allocation10], 4294966256 }
  0xa4   :  { %3450 = dma.done.wait [#allocation13], 3072  }
  0xa5   :  { %3451 = vsyncadd [#allocation13], 4294964224 }
  0xa6   :  { %3452 = dma.done.wait [#allocation16], 14336  }
  0xa7   :  { %3453 = vsyncadd [#allocation16], 4294952960  ;;  %v3469_v0 = vmov 0   ;;  %s4103_s19 = sld [smem:[#allocation26_spill]]  ;;  %v2976_v3 = vld [vmem:[#allocation6] sm:$0xff]   ;;  %v3470_v5 = vmov 0.0  }
  0xa8   :  { %2975 = vset.pattern.permute.xlu0 %v3469_v0  ;;  %v2977_v4 = vld [vmem:[#allocation6 + $0x40] sm:$0xff]   ;;  %2856 = vmatprep.subr.bf16.mxu0 %v3470_v5  ;;  %v2978_v6 = vld [vmem:[#allocation6 + $0x8] sm:$0xff]   ;;  %v2980_v8 = vld [vmem:[#allocation6 + $0x10] sm:$0xff]   ;;  %vm3471_vm0 = vmmov 0   ;;  %v3472_v43 = vmov 683565275  }
  0xa9   :  { %2876 = vmatprep.subr.bf16.mxu1 %v3470_v5  ;;  %2857 = vmatpush3.bf16.msra.mxu0 %v2976_v3  ;;  %v2979_v7 = vld [vmem:[#allocation6 + $0x48] sm:$0xff]   ;;  %v2981_v9 = vld [vmem:[#allocation6 + $0x50] sm:$0xff]   ;;  %v2982_v10 = vld [vmem:[#allocation6 + $0x18] sm:$0xff]   ;;  %v3473_v47 = vmov 2475754826   ;;  %s4106_s30 = sld [smem:[#allocation25_spill]] }
  0xaa   :  { %2877 = vmatpush3.bf16.msra.mxu1 %v2977_v4  ;;  %2858 = vmatprep.subr.bf16.mxu0 %v3470_v5  ;;  %v2983_v11 = vld [vmem:[#allocation6 + $0x58] sm:$0xff]   ;;  %v2984_v12 = vld [vmem:[#allocation6 + $0x20] sm:$0xff]   ;;  %v2986_v14 = vld [vmem:[#allocation6 + $0x28] sm:$0xff]   ;;  %v3474_v49 = vmov 2131351028   ;;  %s3478_s10 = smov [#allocation18]  }
  0xab   :  { %2878 = vmatprep.subr.bf16.mxu1 %v3470_v5  ;;  %2872 = vmatprep.mubr.msk.bf16.mxu0 %vm3471_vm0, %v3470_v5  ;;  %v2985_v13 = vld [vmem:[#allocation6 + $0x60] sm:$0xff]   ;;  %v2987_v15 = vld [vmem:[#allocation6 + $0x68] sm:$0xff]   ;;  %v2988_v16 = vld [vmem:[#allocation6 + $0x30] sm:$0xff]   ;;  %v3475_v51 = vmov 2102212464   ;;  %s2600_s23 = sshll.u32 %s3478_s10, 4  ;;  %s2601_s23 = int_to_ptr.vmem [resolvable:$true] %s2600_s23 }
  0xac   :  { %2892 = vmatprep.mubr.msk.bf16.mxu1 %vm3471_vm0, %v3470_v5  ;;  %v2989_v17 = vld [vmem:[#allocation6 + $0x70] sm:$0xff]   ;;  %v2990_v18 = vld [vmem:[#allocation6 + $0x38] sm:$0xff]   ;;  %v3476_v53 = vmov 920167782   ;;  %v3477_v60 = vmov 1326507024   ;;  %p3427_p3 = scmp.lt.s32.totalorder %s2601_s23, %s2601_s23 }
  0xad   :  { %v174_v1 = vld [vmem:[%s4103_s19] sm:$0xff]  ;;  %v175_v2 = vld [vmem:[%s4103_s19 + $0x8] sm:$0xff]  ;;  %2859 = vmatpush3.bf16.msra.mxu0 %v2978_v6  ;;  %s3422_s28 = scalar_lea.vmem %s2601_s23, 256 }
  0xae   :  { %179 = vperm.xlu0 %2975, %v174_v1   ;;  %2879 = vmatpush3.bf16.msra.mxu1 %v2979_v7  ;;  %v2991_v19 = vld [vmem:[#allocation6 + $0x78] sm:$0xff]   ;;  %p3423_p2 = scmp.ne.s32.totalorder %s2601_s23, %s3422_s28  ;;  %p3428_p4 = scmp.lt.s32.totalorder %s3422_s28, %s3422_s28 }
  0xaf   :  { %2860 = vmatprep.subr.bf16.mxu0 %v3470_v5  ;;  %2880 = vmatprep.subr.bf16.mxu1 %v3470_v5  ;;  %v2616_v20 = vld [vmem:[%s4081_s2] ss:$0 sm:$0xff] }
  0xb0   :  { %p3429_p5 = por %p3428_p4, %p3427_p3 }
  0xb1   :  { %2861 = vmatpush3.bf16.msra.mxu0 %v2980_v8 }
  0xb2   :  { %184 = vperm.xlu0 %2975, %v175_v2   ;;  %2881 = vmatpush3.bf16.msra.mxu1 %v2981_v9  ;;  %p3430_p6 = pnand %p3429_p5, %p3423_p2 }
  0xb3   :  { %2862 = vmatprep.subr.bf16.mxu0 %v3470_v5  ;;  %2882 = vmatprep.subr.bf16.mxu1 %v3470_v5 }
  0xb5   :  { %2863 = vmatpush3.bf16.msra.mxu0 %v2982_v10 }
  0xb6   :  { %2883 = vmatpush3.bf16.msra.mxu1 %v2983_v11  ;;  %2864 = vmatprep.subr.bf16.mxu0 %v3470_v5 }
  0xb7   :  { %2884 = vmatprep.subr.bf16.mxu1 %v3470_v5 }
  0xb9   :  { %2865 = vmatpush3.bf16.msra.mxu0 %v2984_v12 }
  0xba   :  { %2885 = vmatpush3.bf16.msra.mxu1 %v2985_v13  ;;  %2866 = vmatprep.subr.bf16.mxu0 %v3470_v5 }
  0xbb   :  { %2886 = vmatprep.subr.bf16.mxu1 %v3470_v5 }
  0xbd   :  { %2867 = vmatpush3.bf16.msra.mxu0 %v2986_v14 }
  0xbe   :  { %2887 = vmatpush3.bf16.msra.mxu1 %v2987_v15  ;;  %2868 = vmatprep.subr.bf16.mxu0 %v3470_v5 }
  0xbf   :  { %2888 = vmatprep.subr.bf16.mxu1 %v3470_v5 }
  0xc1   :  { %2869 = vmatpush3.bf16.msra.mxu0 %v2988_v16 }
  0xc2   :  { %2889 = vmatpush3.bf16.msra.mxu1 %v2989_v17  ;;  %2870 = vmatprep.subr.bf16.mxu0 %v3470_v5 }
  0xc3   :  { %2890 = vmatprep.subr.bf16.mxu1 %v3470_v5 }
  0xc5   :  { %2871 = vmatpush3.bf16.msra.mxu0 %v2990_v18 }
  0xc6   :  { %2891 = vmatpush3.bf16.msra.mxu1 %v2991_v19  ;;  %2896 = vmatprep.subr.bf16.mxu0 %v3470_v5 }
 0x12d   :  { %v3726_v21 = vpop.permute.xlu0 %179 }
 0x12e   :  { %v193_v22 = vmul.f32 %v2616_v20, %v3726_v21 }
 0x130   :  { %v3729_v23 = vmul.f32 6.2831855, %v193_v22 }
 0x131   :  { %v3731_v24 = vpop.permute.xlu0 %184 }
 0x132   :  { %v206_v25 = vand.u32 2147483647, %v3729_v23  ;;  %v209_v26 = vand.u32 2139095040, %v3729_v23  ;;  %v194_v27 = vmul.f32 %v2616_v20, %v3731_v24  ;;  %vm208_vm15 = vcmp.lt.s32.totalorder %v3729_v23, 0 }
 0x134   :  { %v210_v28 = vshrl.u32 %v209_v26, 23  ;;  %v213_v29 = vand.u32 8388607, %v206_v25  ;;  %v3738_v30 = vmul.f32 6.2831855, %v194_v27 }
 0x136   :  { %v2618_v31 = vadd.s32 4294967169, %v210_v28  ;;  %v313_v32 = vand.u32 2139095040, %v3738_v30  ;;  %v214_v34 = vor.u32 8388608, %v213_v29  ;;  %v310_v36 = vand.u32 2147483647, %v3738_v30 }
 0x138   :  { %v216_v33 = vadd.s32 1, %v2618_v31  ;;  %v314_v35 = vshrl.u32 %v313_v32, 23  ;;  %v3742_v41 = vshll.u32 %v214_v34, 8  ;;  %v317_v45 = vand.u32 8388607, %v310_v36 }
 0x13a   :  { %vm217_vm1 = vcmp.gt.s32.totalorder %v216_v33, 0  ;;  %v2622_v38 = vadd.s32 4294967169, %v314_v35  ;;  %v318_v13 = vor.u32 8388608, %v317_v45 }
 0x13b   :  { %v218_v37 = vsel %vm217_vm1, %v216_v33, 0  ;;  %vm3790_vm1 = vcmp.le.f32.partialorder %v206_v25, 0.7853982 }
 0x13c   :  { %v219_v39 = vshrl.u32 %v218_v37, 5  ;;  %v220_v40 = vand.u32 31, %v218_v37  ;;  %v320_v46 = vadd.s32 1, %v2622_v38  ;;  %v358_v31 = vshll.u32 %v318_v13, 8 }
 0x13e   :  { %v221_v42 = vsub.s32 32, %v220_v40  ;;  %v223_v44 = vshll.u32 %v3472_v43, %v220_v40  ;;  %v226_v48 = vshll.u32 %v3473_v47, %v220_v40  ;;  %v229_v50 = vshll.u32 %v3474_v49, %v220_v40 }
 0x13f   :  { %v232_v52 = vshll.u32 %v3475_v51, %v220_v40  ;;  %v235_v54 = vshll.u32 %v3476_v53, %v220_v40  ;;  %vm238_vm2 = vcmp.lt.s32.totalorder %v219_v39, 1  ;;  %vm240_vm3 = vcmp.lt.s32.totalorder %v219_v39, 3 }
 0x140   :  { %v224_v55 = vshrl.u32 %v3473_v47, %v221_v42  ;;  %v227_v56 = vshrl.u32 %v3474_v49, %v221_v42  ;;  %v230_v57 = vshrl.u32 %v3475_v51, %v221_v42  ;;  %v222_v58 = vshrl.u32 %v3472_v43, %v221_v42 }
 0x141   :  { %v233_v59 = vshrl.u32 %v3476_v53, %v221_v42  ;;  %v236_v61 = vshrl.u32 %v3477_v60, %v221_v42  ;;  %vm321_vm4 = vcmp.gt.s32.totalorder %v320_v46, 0  ;;  %vm241_vm5 = vcmp.lt.s32.totalorder %v219_v39, 4 }
 0x142   :  { %v225_v62 = vor.u32 %v224_v55, %v223_v44  ;;  %v228_v63 = vor.u32 %v227_v56, %v226_v48  ;;  %v231_v1 = vor.u32 %v230_v57, %v229_v50  ;;  %v322_v4 = vsel %vm321_vm4, %v320_v46, 0 }
 0x143   :  { %v234_v2 = vor.u32 %v233_v59, %v232_v52  ;;  %v237_v3 = vor.u32 %v236_v61, %v235_v54  ;;  %vm239_vm6 = vcmp.lt.s32.totalorder %v219_v39, 2  ;;  %v324_v16 = vand.u32 31, %v322_v4 }
 0x144   :  { %v242_v6 = vsel %vm238_vm2, %v222_v58, %v225_v62  ;;  %v243_v7 = vsel %vm241_vm5, %v231_v1, 2102212464  ;;  %v246_v8 = vsel %vm238_vm2, %v225_v62, %v228_v63  ;;  %v250_v9 = vsel %vm238_vm2, %v228_v63, %v231_v1 }
 0x145   :  { %v244_v10 = vsel %vm240_vm3, %v228_v63, %v243_v7  ;;  %v247_v11 = vsel %vm241_vm5, %v234_v2, 920167782  ;;  %v251_v12 = vsel %vm241_vm5, %v237_v3, 1326507024  ;;  %v323_v28 = vshrl.u32 %v322_v4, 5 }
 0x146   :  { %v248_v14 = vsel %vm240_vm3, %v231_v1, %v247_v11  ;;  %v252_v15 = vsel %vm240_vm3, %v234_v2, %v251_v12  ;;  %v245_v17 = vsel %vm239_vm6, %v242_v6, %v244_v10  ;;  %v325_v29 = vsub.s32 32, %v324_v16 }
 0x147   :  { %v249_v18 = vsel %vm239_vm6, %v246_v8, %v248_v14  ;;  %v253_v19 = vsel %vm239_vm6, %v250_v9, %v252_v15  ;;  %v261_v32 = vmul.u32 %v3742_v41, %v245_v17  ;;  %v327_v33 = vshll.u32 %v3472_v43, %v324_v16 }
 0x148   :  { %v3755_v20 = vmul.u32.u64.low %v3742_v41, %v253_v19  ;;  %v3756_v22 = vmul.u32.u64.high %v3742_v41, %v253_v19, %v3755_v20  ;;  %v3759_v26 = vmul.u32.u64.low %v3742_v41, %v249_v18  ;;  %v3760_v27 = vmul.u32.u64.high %v3742_v41, %v249_v18, %v3759_v26 }
 0x149   :  { %v330_v34 = vshll.u32 %v3473_v47, %v324_v16  ;;  %v333_v35 = vshll.u32 %v3474_v49, %v324_v16  ;;  %v328_v37 = vshrl.u32 %v3473_v47, %v325_v29  ;;  %v331_v38 = vshrl.u32 %v3474_v49, %v325_v29 }
 0x14a   :  { %v334_v39 = vshrl.u32 %v3475_v51, %v325_v29  ;;  %v336_v40 = vshll.u32 %v3475_v51, %v324_v16  ;;  %vm263_vm7 = vc.u32 %v3756_v22, %v3759_v26  ;;  %v264_v42 = vadd.s32 1, %v3760_v27 }
 0x14b   :  { %v337_v44 = vshrl.u32 %v3476_v53, %v325_v29  ;;  %v339_v45 = vshll.u32 %v3476_v53, %v324_v16  ;;  %v329_v46 = vor.u32 %v328_v37, %v327_v33  ;;  %v332_v48 = vor.u32 %v331_v38, %v330_v34 }
 0x14c   :  { %v335_v50 = vor.u32 %v334_v39, %v333_v35  ;;  %v340_v52 = vshrl.u32 %v3477_v60, %v325_v29  ;;  %v265_v41 = vsel %vm263_vm7, %v264_v42, %v3760_v27  ;;  %vm342_vm8 = vcmp.lt.s32.totalorder %v323_v28, 1 }
 0x14d   :  { %v338_v54 = vor.u32 %v337_v44, %v336_v40  ;;  %vm345_vm9 = vcmp.lt.s32.totalorder %v323_v28, 4  ;;  %v266_v47 = vadd.s32 %v265_v41, %v261_v32  ;;  %vm344_vm10 = vcmp.lt.s32.totalorder %v323_v28, 3 }
 0x14e   :  { %v341_v49 = vor.u32 %v340_v52, %v339_v45  ;;  %v347_v51 = vsel %vm345_vm9, %v335_v50, 2102212464  ;;  %v326_v55 = vshrl.u32 %v3472_v43, %v325_v29  ;;  %v350_v56 = vsel %vm342_vm8, %v329_v46, %v332_v48 }
 0x14f   :  { %v351_v57 = vsel %vm345_vm9, %v338_v54, 920167782  ;;  %v354_v58 = vsel %vm342_vm8, %v332_v48, %v335_v50  ;;  %v267_v59 = vadd.s32 536870912, %v266_v47  ;;  %vm343_vm11 = vcmp.lt.s32.totalorder %v323_v28, 2 }
 0x150   :  { %v352_v53 = vsel %vm344_vm10, %v335_v50, %v351_v57  ;;  %v355_v61 = vsel %vm345_vm9, %v341_v49, 1326507024  ;;  %v346_v62 = vsel %vm342_vm8, %v326_v55, %v329_v46  ;;  %v348_v60 = vsel %vm344_vm10, %v332_v48, %v347_v51  ;;  %v3016_v57 = vld [vmem:[#allocation14 + $0x24] ss:$8 sps:$4 sm:$0xff]  }
 0x151   :  { %v353_v63 = vsel %vm343_vm11, %v350_v56, %v352_v53  ;;  %v356_v1 = vsel %vm344_vm10, %v338_v54, %v355_v61  ;;  %v3770_v2 = vshrl.u32 %v267_v59, 30  ;;  %v349_v9 = vsel %vm343_vm11, %v346_v62, %v348_v60 }
 0x152   :  { %v357_v3 = vsel %vm343_vm11, %v354_v58, %v356_v1  ;;  %v3772_v4 = vmul.u32.u64.low %v358_v31, %v353_v63  ;;  %v3773_v6 = vmul.u32.u64.high %v358_v31, %v353_v63, %v3772_v4  ;;  %v365_v12 = vmul.u32 %v358_v31, %v349_v9 }
 0x153   :  { %v3775_v7 = vmul.u32.u64.low %v358_v31, %v357_v3  ;;  %v3776_v8 = vmul.u32.u64.high %v358_v31, %v357_v3, %v3775_v7  ;;  %v269_v43 = vshll.u32 %v3770_v2, 30  ;;  %v262_v32 = vadd.s32 %v3759_v26, %v3756_v22 }
 0x154   :  { %v368_v11 = vadd.s32 1, %v3773_v6  ;;  %v292_v62 = vsub.s32 4, %v3770_v2  ;;  %vm312_vm2 = vcmp.lt.s32.totalorder %v3738_v30, 0  ;;  %vm311_vm3 = vcmp.le.f32.partialorder %v310_v36, 0.7853982 }
 0x155   :  { %v270_v10 = vsub.s32 %v266_v47, %v269_v43  ;;  %vm367_vm12 = vc.u32 %v3776_v8, %v3772_v4  ;;  %v366_v54 = vadd.s32 %v3772_v4, %v3776_v8 }
 0x156   :  { %v369_v14 = vsel %vm367_vm12, %v368_v11, %v3773_v6  ;;  %v293_v25 = vsel %vm208_vm15, %v292_v62, %v3770_v2  ;;  %v3020_v62 = vld [vmem:[#allocation14 + $0x40] ss:$8 sps:$4 sm:$0xff]  }
 0x157   :  { %v272_v13 = vsub.s32 0, %v270_v10  ;;  %v370_v15 = vadd.s32 %v369_v14, %v365_v12  ;;  %v295_v7 = vsel %vm3790_vm1, 0, %v293_v25  ;;  %v2617_v25 = vld [vmem:[#allocation3] ss:$0 sm:$0xff] }
 0x158   :  { %v299_v9 = vadd.s32 3, %v295_v7  ;;  %v615_v14 = vand.u32 3, %v295_v7 }
 0x159   :  { %v2619_v16 = vmin.u32 %v272_v13, %v270_v10  ;;  %v371_v17 = vadd.s32 536870912, %v370_v15 }
 0x15a   :  { %v300_v13 = vand.u32 3, %v299_v9  ;;  %vm617_vm6 = vcmp.eq.s32.totalorder %v615_v14, 0  ;;  %vm620_vm7 = vcmp.eq.s32.totalorder %v615_v14, 2  ;;  %vm616_vm9 = vcmp.lt.s32.totalorder %v615_v14, 2 }
 0x15b   :  { %v274_v18 = vclz %v2619_v16  ;;  %v372_v19 = vshrl.u32 %v371_v17, 30 }
 0x15c   :  { %vm302_vm4 = vcmp.eq.s32.totalorder %v300_v13, 0  ;;  %vm305_vm5 = vcmp.eq.s32.totalorder %v300_v13, 2  ;;  %vm301_vm8 = vcmp.lt.s32.totalorder %v300_v13, 2 }
 0x15d   :  { %v2620_v20 = vadd.s32 4294967294, %v274_v18  ;;  %v373_v27 = vshll.u32 %v372_v19, 30  ;;  %v396_v3 = vsub.s32 4, %v372_v19 }
 0x15f   :  { %vm2621_vm13 = vcmp.lt.s32.totalorder %v2620_v20, 0  ;;  %v374_v29 = vsub.s32 %v370_v15, %v373_v27  ;;  %v397_v8 = vsel %vm312_vm2, %v396_v3, %v372_v19  ;;  %v3026_v3 = vld [vmem:[#allocation14 + $0x60] ss:$8 sps:$4 sm:$0xff]  }
 0x160   :  { %v277_v28 = vsel %vm2621_vm13, 0, %v2620_v20 }
 0x161   :  { %v278_v33 = vsub.s32 32, %v277_v28  ;;  %v282_v31 = vsub.s32 4294967266, %v277_v28  ;;  %v376_v34 = vsub.s32 0, %v374_v29  ;;  %v279_v35 = vshll.u32 %v270_v10, %v277_v28 }
 0x162   :  { %v399_v10 = vsel %vm311_vm3, 0, %v397_v8  ;;  %v205_v8 = vmul.f32 %v2617_v25, %v3731_v24 }
 0x163   :  { %v280_v37 = vshrl.u32 %v262_v32, %v278_v33  ;;  %v283_v38 = vadd.s32 127, %v282_v31  ;;  %v2623_v39 = vmin.u32 %v376_v34, %v374_v29  ;;  %v403_v2 = vadd.s32 3, %v399_v10 }
 0x164   :  { %v718_v17 = vand.u32 3, %v399_v10 }
 0x165   :  { %v281_v40 = vor.u32 %v280_v37, %v279_v35  ;;  %v284_v42 = vshll.u32 %v283_v38, 23  ;;  %v378_v44 = vclz %v2623_v39  ;;  %v404_v36 = vand.u32 3, %v403_v2 }
 0x166   :  { %vm720_vm10 = vcmp.eq.s32.totalorder %v718_v17, 0  ;;  %vm723_vm13 = vcmp.eq.s32.totalorder %v718_v17, 2 }
 0x167   :  { %v285_v45 = vor.u32 4788187, %v284_v42  ;;  %v2624_v46 = vadd.s32 4294967294, %v378_v44  ;;  %v288_v50 = vcvt.s32.f32 %v281_v40  ;;  %vm406_vm11 = vcmp.eq.s32.totalorder %v404_v36, 0 }
 0x168   :  { %vm409_vm12 = vcmp.eq.s32.totalorder %v404_v36, 2 }
 0x169   :  { %v286_v48 = vand.u32 2147483647, %v285_v45  ;;  %vm2625_vm14 = vcmp.lt.s32.totalorder %v2624_v46, 0 }
 0x16a   :  { %v381_v41 = vsel %vm2625_vm14, 0, %v2624_v46  ;;  %vm405_vm14 = vcmp.lt.s32.totalorder %v404_v36, 2 }
 0x16b   :  { %v289_v52 = vmul.f32 %v288_v50, %v286_v48  ;;  %v382_v22 = vsub.s32 32, %v381_v41  ;;  %v386_v26 = vsub.s32 4294967266, %v381_v41  ;;  %v383_v49 = vshll.u32 %v374_v29, %v381_v41  ;;  %v2992_v41 = vld [vmem:[#allocation9] sm:$0xff]  }
 0x16d   :  { %v290_v47 = vxor.u32 2147483648, %v289_v52  ;;  %v384_v51 = vshrl.u32 %v366_v54, %v382_v22  ;;  %v387_v55 = vadd.s32 127, %v386_v26  ;;  %v2995_v54 = vld [vmem:[#allocation9 + $0x18] sm:$0xff]   ;;  %v2996_v22 = vld [vmem:[#allocation9 + $0x20] sm:$0xff]   ;;  %v2998_v26 = vld [vmem:[#allocation9 + $0x30] sm:$0xff]  }
 0x16f   :  { %v291_v56 = vsel %vm208_vm15, %v290_v47, %v289_v52  ;;  %v385_v58 = vor.u32 %v384_v51, %v383_v49  ;;  %v388_v59 = vshll.u32 %v387_v55, 23  ;;  %vm719_vm15 = vcmp.lt.s32.totalorder %v718_v17, 2  ;;  %v2999_v47 = vld [vmem:[#allocation9 + $0x38] sm:$0xff]   ;;  %v3008_v49 = vld [vmem:[#allocation14] ss:$8 sps:$4 sm:$0xff]  }
 0x170   :  { %v294_v53 = vsel %vm3790_vm1, %v3729_v23, %v291_v56  ;;  %vm298_vm1 = vweird.f32 %v3729_v23  ;;  %v2993_v23 = vld [vmem:[#allocation9 + $0x8] sm:$0xff]   ;;  %v3013_v55 = vld [vmem:[#allocation14 + $0x14] ss:$8 sps:$4 sm:$0xff]   ;;  %v3011_v56 = vld [vmem:[#allocation14 + $0x10] ss:$8 sps:$4 sm:$0xff]  }
 0x171   :  { %v389_v61 = vor.u32 4788187, %v388_v59  ;;  %3192 = vcosq.f32 %v294_v53  ;;  %v392_v63 = vcvt.s32.f32 %v385_v58  ;;  %v3010_v51 = vld [vmem:[#allocation14 + $0x4] ss:$8 sps:$4 sm:$0xff]   ;;  %v3014_v58 = vld [vmem:[#allocation14 + $0x20] ss:$8 sps:$4 sm:$0xff]  }
 0x172   :  { %3194 = vsinq.f32 %v294_v53  ;;  %1197 = vmatprep.subr.bf16.mxu1 %v3010_v51  ;;  %v3019_v59 = vld [vmem:[#allocation14 + $0x34] ss:$8 sps:$4 sm:$0xff]   ;;  %v3017_v53 = vld [vmem:[#allocation14 + $0x30] ss:$8 sps:$4 sm:$0xff]  }
 0x173   :  { %v390_v60 = vand.u32 2147483647, %v389_v61  ;;  %v3022_v61 = vld [vmem:[#allocation14 + $0x44] ss:$8 sps:$4 sm:$0xff]  }
 0x175   :  { %v393_v1 = vmul.f32 %v392_v63, %v390_v60  ;;  %v3025_v60 = vld [vmem:[#allocation14 + $0x54] ss:$8 sps:$4 sm:$0xff]   ;;  %v3023_v63 = vld [vmem:[#allocation14 + $0x50] ss:$8 sps:$4 sm:$0xff]  }
 0x177   :  { %v394_v4 = vxor.u32 2147483648, %v393_v1 }
 0x179   :  { %v395_v6 = vsel %vm312_vm2, %v394_v4, %v393_v1  ;;  %vm402_vm2 = vweird.f32 %v3738_v30  ;;  %v3028_v1 = vld [vmem:[#allocation14 + $0x64] ss:$8 sps:$4 sm:$0xff]   ;;  %v204_v4 = vmul.f32 %v2617_v25, %v3726_v21 }
 0x17a   :  { %v398_v43 = vsel %vm311_vm3, %v3738_v30, %v395_v6  ;;  %v2994_v30 = vld [vmem:[#allocation9 + $0x10] sm:$0xff]  }
 0x17b   :  { %3196 = vcosq.f32 %v398_v43  ;;  %v3193_v11 = vpop.eup %3192 }
 0x17c   :  { %3198 = vsinq.f32 %v398_v43  ;;  %v3195_v12 = vpop.eup %3194  ;;  %v306_v16 = vxor.u32 2147483648, %v3193_v11 }
 0x17d   :  { %v303_v15 = vxor.u32 2147483648, %v3195_v12 }
 0x17e   :  { %v307_v20 = vsel %vm305_vm5, %v306_v16, %v3195_v12  ;;  %v622_v28 = vsel %vm620_vm7, %v306_v16, %v3195_v12 }
 0x17f   :  { %v304_v19 = vsel %vm302_vm4, %v3193_v11, %v303_v15  ;;  %v619_v27 = vsel %vm617_vm6, %v3193_v11, %v303_v15  ;;  %v2650_v11 = vld [vmem:[#allocation8] ss:$0 sm:$0xff] }
 0x180   :  { %v308_v31 = vsel %vm301_vm8, %v304_v19, %v307_v20  ;;  %v623_v35 = vsel %vm616_vm9, %v619_v27, %v622_v28 }
 0x181   :  { %v309_v44 = vsel %vm298_vm1, nan, %v308_v31  ;;  %v624_v46 = vsel %vm298_vm1, nan, %v623_v35 }
 0x185   :  { %v3197_v18 = vpop.eup %3196 }
 0x186   :  { %v3199_v29 = vpop.eup %3198  ;;  %v410_v32 = vxor.u32 2147483648, %v3197_v18 }
 0x187   :  { %v407_v33 = vxor.u32 2147483648, %v3199_v29 }
 0x188   :  { %v411_v34 = vsel %vm409_vm12, %v410_v32, %v3199_v29  ;;  %v725_v37 = vsel %vm723_vm13, %v410_v32, %v3199_v29 }
 0x189   :  { %v408_v38 = vsel %vm406_vm11, %v3197_v18, %v407_v33  ;;  %v722_v39 = vsel %vm720_vm10, %v3197_v18, %v407_v33 }
 0x18a   :  { %v412_v40 = vsel %vm405_vm14, %v408_v38, %v411_v34  ;;  %v726_v42 = vsel %vm719_vm15, %v722_v39, %v725_v37  ;;  %v3000_v37 = vld [vmem:[#allocation12] sm:$0xff]   ;;  %v3001_v39 = vld [vmem:[#allocation12 + $0x8] sm:$0xff]  }
 0x18b   :  { %v413_v45 = vsel %vm402_vm2, nan, %v412_v40  ;;  %v727_v48 = vsel %vm402_vm2, nan, %v726_v42  ;;  %v3002_v40 = vld [vmem:[#allocation12 + $0x10] sm:$0xff]   ;;  %v3003_v42 = vld [vmem:[#allocation12 + $0x18] sm:$0xff]  }
 0x18c   :  { %v414_v50 = vpack.c.bf16 %v413_v45, %v309_v44  ;;  %v728_v52 = vpack.c.bf16 %v727_v48, %v624_v46  ;;  %v3004_v44 = vld [vmem:[#allocation12 + $0x20] sm:$0xff]   ;;  %v3005_v45 = vld [vmem:[#allocation12 + $0x28] sm:$0xff]   ;;  %v3006_v46 = vld [vmem:[#allocation12 + $0x30] sm:$0xff]  }
 0x18d   :  { %v3007_v48 = vld [vmem:[#allocation12 + $0x38] sm:$0xff]  }
 0x18e   :  { %2873 = vmatmul.mubr.bf16.vlgmr.msra.gmra.mrb[0].mxu0 %v414_v50  ;;  %2893 = vmatmul.mubr.bf16.vlgmr.msra.gmra.mrb[0].mxu1 %v728_v52  ;;  %v971_v50 = vld [vmem:[%s4106_s30] sm:$0xff]  ;;  %v972_v52 = vld [vmem:[%s4106_s30 + $0x8] sm:$0xff] }
 0x18f   :  { %2912 = vmatprep.mubr.msk.bf16.mxu0 %vm3471_vm0, %v3470_v5  ;;  %1229 = vmatprep.mubr.bf16.mxu1 %v3469_v0  ;;  %v2997_v0 = vld [vmem:[#allocation9 + $0x28] sm:$0xff]  }
 0x190   :  { %2897 = vmatpush3.bf16.msra.mxu0 %v2992_v41  ;;  %1198 = vmatpush1.bf16.msra.mxu1 %v3008_v49  ;;  %v973_v41 = vpack.c.bf16 %v972_v52, %v971_v50  ;;  %v3061_v50 = vld [vmem:[#allocation15 + $0x94] ss:$8 sps:$4 sm:$0xff]   ;;  %v3059_v52 = vld [vmem:[#allocation15 + $0x90] ss:$8 sps:$4 sm:$0xff]  }
 0x191   :  { %2898 = vmatprep.subr.bf16.mxu0 %v3470_v5  ;;  %1199 = vmatprep.subr.bf16.mxu1 %v3013_v55 }
 0x194   :  { %2899 = vmatpush3.bf16.msra.mxu0 %v2993_v23  ;;  %1200 = vmatpush1.bf16.msra.mxu1 %v3011_v56  ;;  %v3031_v23 = vld [vmem:[#allocation14 + $0x74] ss:$8 sps:$4 sm:$0xff]  }
 0x195   :  { %2900 = vmatprep.subr.bf16.mxu0 %v3470_v5  ;;  %1201 = vmatprep.subr.bf16.mxu1 %v3016_v57  ;;  %v1107_v57 = vlaneseq }
 0x198   :  { %2901 = vmatpush3.bf16.msra.mxu0 %v2994_v30  ;;  %1202 = vmatpush1.bf16.msra.mxu1 %v3014_v58  ;;  %v3029_v30 = vld [vmem:[#allocation14 + $0x70] ss:$8 sps:$4 sm:$0xff]   ;;  %v3840_v58 = vshrl.u32 %v1107_v57, 7 }
 0x199   :  { %2902 = vmatprep.subr.bf16.mxu0 %v3470_v5  ;;  %1203 = vmatprep.subr.bf16.mxu1 %v3019_v59 }
 0x19a   :  { %v3843_v59 = vsub.s32 0, %v3840_v58 }
 0x19c   :  { %2903 = vmatpush3.bf16.msra.mxu0 %v2995_v54  ;;  %1204 = vmatpush1.bf16.msra.mxu1 %v3017_v53  ;;  %v2651_v54 = vld [vmem:[#allocation11] ss:$0 sm:$0xff]  ;;  %v1105_v53 = vld [vmem:[%s4090_s11] sm:$0x3] }
 0x19d   :  { %2904 = vmatprep.subr.bf16.mxu0 %v3470_v5  ;;  %1205 = vmatprep.subr.bf16.mxu1 %v3022_v61  ;;  %v3849_v61 = vsub.s32 1, %v3840_v58 }
 0x1a0   :  { %2905 = vmatpush3.bf16.msra.mxu0 %v2996_v22  ;;  %1206 = vmatpush1.bf16.msra.mxu1 %v3020_v62  ;;  %v2660_v22 = vld [vmem:[%s4088_s9] ss:$0 sm:$0xff]  ;;  %v1110_v62 = vrot.slane %v1105_v53, %v3843_v59 }
 0x1a1   :  { %2906 = vmatprep.subr.bf16.mxu0 %v3470_v5  ;;  %1207 = vmatprep.subr.bf16.mxu1 %v3025_v60  ;;  %v1114_v60 = vrot.slane %v1105_v53, %v3849_v61 }
 0x1a4   :  { %2907 = vmatpush3.bf16.msra.mxu0 %v2997_v0  ;;  %1208 = vmatpush1.bf16.msra.mxu1 %v3023_v63  ;;  %v2936_v0 = vadd.f32 %v2660_v22, %v2651_v54  ;;  %v3065_v54 = vld [vmem:[#allocation15 + $0xb0] ss:$8 sps:$4 sm:$0xff]   ;;  %v3070_v22 = vld [vmem:[#allocation15 + $0xc4] ss:$8 sps:$4 sm:$0xff]  }
 0x1a5   :  { %2908 = vmatprep.subr.bf16.mxu0 %v3470_v5  ;;  %1209 = vmatprep.subr.bf16.mxu1 %v3028_v1 }
 0x1a8   :  { %2909 = vmatpush3.bf16.msra.mxu0 %v2998_v26  ;;  %1210 = vmatpush1.bf16.msra.mxu1 %v3026_v3 }
 0x1a9   :  { %2910 = vmatprep.subr.bf16.mxu0 %v3470_v5  ;;  %1211 = vmatprep.subr.bf16.mxu1 %v3031_v23  ;;  %v3062_v23 = vld [vmem:[#allocation15 + $0xa0] ss:$8 sps:$4 sm:$0xff]  }
 0x1ac   :  { %2911 = vmatpush3.bf16.msra.mxu0 %v2999_v47  ;;  %1212 = vmatpush1.bf16.msra.mxu1 %v3029_v30  ;;  %v3067_v30 = vld [vmem:[#allocation15 + $0xb4] ss:$8 sps:$4 sm:$0xff]  }
 0x1ad   :  { %2916 = vmatprep.subr.bf16.mxu0 %v3470_v5 }
 0x261   :  { %v513_v6 = vpop.f32.mrb[0].mxu0  ;;  %v828_v7 = vpop.f32.mrb[0].mxu1 }
 0x262   :  { %v520_v43 = vadd.f32 %v513_v6, %v204_v4  ;;  %v2874_v9 = vpop.f32.mrb[1].mxu0  ;;  %v2894_v10 = vpop.f32.mrb[1].mxu1 }
 0x263   :  { %v516_v12 = vpop.f32.mrb[2].mxu0  ;;  %v831_v2 = vpop.f32.mrb[2].mxu1  ;;  %v3032_v10 = vld [vmem:[#allocation15] ss:$8 sps:$4 sm:$0xff]  }
 0x264   :  { %v835_v13 = vadd.f32 %v828_v7, %v520_v43  ;;  %v521_v14 = vadd.f32 %v516_v12, %v205_v8  ;;  %v2875_v15 = vpop.f32.mrb[3].mxu0  ;;  %v2895_v16 = vpop.f32.mrb[3].mxu1  ;;  %v3037_v12 = vld [vmem:[#allocation15 + $0x14] ss:$8 sps:$4 sm:$0xff]  }
 0x265   :  { %v3043_v15 = vld [vmem:[#allocation15 + $0x34] ss:$8 sps:$4 sm:$0xff]   ;;  %v3041_v16 = vld [vmem:[#allocation15 + $0x30] ss:$8 sps:$4 sm:$0xff]  }
 0x266   :  { %v844_v17 = vadd.f32 %v2650_v11, %v835_v13  ;;  %v836_v36 = vadd.f32 %v831_v2, %v521_v14  ;;  %v3035_v2 = vld [vmem:[#allocation15 + $0x10] ss:$8 sps:$4 sm:$0xff]   ;;  %v3040_v13 = vld [vmem:[#allocation15 + $0x24] ss:$8 sps:$4 sm:$0xff]   ;;  %v3038_v14 = vld [vmem:[#allocation15 + $0x20] ss:$8 sps:$4 sm:$0xff]  }
 0x268   :  { %v846_v18 = vsub.f32 0.0, %v844_v17  ;;  %v845_v19 = vadd.f32 %v2650_v11, %v836_v36  ;;  %v3034_v11 = vld [vmem:[#allocation15 + $0x4] ss:$8 sps:$4 sm:$0xff]   ;;  %v3044_v36 = vld [vmem:[#allocation15 + $0x40] ss:$8 sps:$4 sm:$0xff]  }
 0x269   :  { %1532 = vmatprep.subr.bf16.mxu1 %v3034_v11 }
 0x26a   :  { %v848_v20 = vmul.f32 1.442695, %v846_v18  ;;  %v847_v21 = vsub.f32 0.0, %v845_v19  ;;  %v3049_v18 = vld [vmem:[#allocation15 + $0x54] ss:$8 sps:$4 sm:$0xff]  }
 0x26c   :  { %3200 = vpow2.f32 %v848_v20  ;;  %v850_v27 = vmul.f32 1.442695, %v847_v21  ;;  %v3052_v20 = vld [vmem:[#allocation15 + $0x64] ss:$8 sps:$4 sm:$0xff]   ;;  %v3050_v21 = vld [vmem:[#allocation15 + $0x60] ss:$8 sps:$4 sm:$0xff]  }
 0x26e   :  { %3202 = vpow2.f32 %v850_v27  ;;  %v3055_v27 = vld [vmem:[#allocation15 + $0x74] ss:$8 sps:$4 sm:$0xff]  }
 0x276   :  { %v3201_v24 = vpop.eup %3200 }
 0x277   :  { %v852_v28 = vadd.f32 1.0, %v3201_v24  ;;  %v3053_v24 = vld [vmem:[#allocation15 + $0x70] ss:$8 sps:$4 sm:$0xff]  }
 0x278   :  { %v3203_v29 = vpop.eup %3202 }
 0x279   :  { %3204 = vrcp.f32 %v852_v28  ;;  %v853_v32 = vadd.f32 1.0, %v3203_v29 }
 0x27b   :  { %3206 = vrcp.f32 %v853_v32 }
 0x283   :  { %v3205_v33 = vpop.eup %3204 }
 0x284   :  { %v856_v34 = vmul.f32 %v3205_v33, %v844_v17  ;;  %v3046_v17 = vld [vmem:[#allocation15 + $0x44] ss:$8 sps:$4 sm:$0xff]  }
 0x285   :  { %v3207_v31 = vpop.eup %3206 }
 0x286   :  { %v857_v35 = vmul.f32 %v3207_v31, %v845_v19  ;;  %v3047_v19 = vld [vmem:[#allocation15 + $0x50] ss:$8 sps:$4 sm:$0xff]  }
 0x288   :  { %v858_v38 = vpack.c.bf16 %v857_v35, %v856_v34 }
 0x28a   :  { %2913 = vmatmul.mubr.bf16.vlgmr.msra.gmra.mrb[4].mxu0 %v858_v38 }
 0x28b   :  { %2917 = vmatpush3.bf16.msra.mxu0 %v3000_v37  ;;  %2932 = vmatprep.mubr.msk.bf16.mxu0 %vm3471_vm0, %v3470_v5 }
 0x28c   :  { %2918 = vmatprep.subr.bf16.mxu0 %v3470_v5 }
 0x28f   :  { %2919 = vmatpush3.bf16.msra.mxu0 %v3001_v39 }
 0x290   :  { %2920 = vmatprep.subr.bf16.mxu0 %v3470_v5 }
 0x293   :  { %2921 = vmatpush3.bf16.msra.mxu0 %v3002_v40 }
 0x294   :  { %2922 = vmatprep.subr.bf16.mxu0 %v3470_v5 }
 0x297   :  { %2923 = vmatpush3.bf16.msra.mxu0 %v3003_v42 }
 0x298   :  { %2924 = vmatprep.subr.bf16.mxu0 %v3470_v5 }
 0x29b   :  { %2925 = vmatpush3.bf16.msra.mxu0 %v3004_v44 }
 0x29c   :  { %2926 = vmatprep.subr.bf16.mxu0 %v3470_v5 }
 0x29f   :  { %2927 = vmatpush3.bf16.msra.mxu0 %v3005_v45 }
 0x2a0   :  { %2928 = vmatprep.subr.bf16.mxu0 %v3470_v5 }
 0x2a3   :  { %2929 = vmatpush3.bf16.msra.mxu0 %v3006_v46  ;;  %v3058_v46 = vld [vmem:[#allocation15 + $0x84] ss:$8 sps:$4 sm:$0xff]  }
 0x2a4   :  { %2930 = vmatprep.subr.bf16.mxu0 %v3470_v5 }
 0x2a7   :  { %2931 = vmatpush3.bf16.msra.mxu0 %v3007_v48  ;;  %v3056_v48 = vld [vmem:[#allocation15 + $0x80] ss:$8 sps:$4 sm:$0xff]  }
 0x2aa   :  { %2933 = vmatmul.mubr.bf16.vlgmr.msra.gmra.mrb[4].mxu0 %v973_v41  ;;  %v3064_v41 = vld [vmem:[#allocation15 + $0xa4] ss:$8 sps:$4 sm:$0xff]  }
 0x37d   :  { %v1079_v26 = vpop.f32.mrb[4].mxu0 }
 0x37e   :  { %v2934_v47 = vpop.f32.mrb[5].mxu0  ;;  %v2937_v51 = vadd.f32 %v2936_v0, %v1079_v26  ;;  %v3073_v26 = vld [vmem:[#allocation15 + $0xd4] ss:$8 sps:$4 sm:$0xff]  }
 0x37f   :  { %v1082_v49 = vpop.f32.mrb[6].mxu0  ;;  %v3071_v47 = vld [vmem:[#allocation15 + $0xd0] ss:$8 sps:$4 sm:$0xff]  }
 0x380   :  { %v2939_v55 = vadd.f32 %v2936_v0, %v1082_v49  ;;  %v2935_v56 = vpop.f32.mrb[7].mxu0  ;;  %v3068_v0 = vld [vmem:[#allocation15 + $0xc0] ss:$8 sps:$4 sm:$0xff]   ;;  %v3076_v49 = vld [vmem:[#allocation15 + $0xe4] ss:$8 sps:$4 sm:$0xff]  }
 0x381   :  { %v3077_v56 = vld [vmem:[#allocation15 + $0xf0] ss:$8 sps:$4 sm:$0xff]  }
 0x382   :  { %v1088_v5 = vpack.c.bf16 %v2939_v55, %v2937_v51  ;;  %v3074_v51 = vld [vmem:[#allocation15 + $0xe0] ss:$8 sps:$4 sm:$0xff]   ;;  %v3079_v55 = vld [vmem:[#allocation15 + $0xf4] ss:$8 sps:$4 sm:$0xff]  }
 0x384   :  { %1230 = vmatmul.mubr.bf16.vlgmr.msra.gmra.mrb[4].mxu1 %v1088_v5 }
 0x385   :  { %1533 = vmatpush1.bf16.msra.mxu1 %v3032_v10  ;;  %v3886_v10 = vsub.s32 4, %v3840_v58 }
 0x386   :  { %1534 = vmatprep.subr.bf16.mxu1 %v3037_v12  ;;  %v1244_v12 = vld [vmem:[%s4092_s13] sm:$0x77] }
 0x389   :  { %1535 = vmatpush1.bf16.msra.mxu1 %v3035_v2  ;;  %v1297_v2 = vrot.slane %v1244_v12, %v3886_v10 }
 0x38a   :  { %1536 = vmatprep.subr.bf16.mxu1 %v3040_v13  ;;  %v3893_v13 = vsub.s32 5, %v3840_v58 }
 0x38d   :  { %1537 = vmatpush1.bf16.msra.mxu1 %v3038_v14  ;;  %v1293_v14 = vrot.slane %v1244_v12, %v3843_v59 }
 0x38e   :  { %1538 = vmatprep.subr.bf16.mxu1 %v3043_v15  ;;  %v1307_v15 = vrot.slane %v1297_v2, %v3843_v59  ;;  %v3095_v2 = vld [vmem:[#allocation15 + $0x150] ss:$8 sps:$4 sm:$0xff]  }
 0x391   :  { %1539 = vmatpush1.bf16.msra.mxu1 %v3041_v16  ;;  %v1319_v16 = vrot.slane %v1244_v12, %v3893_v13 }
 0x392   :  { %1540 = vmatprep.subr.bf16.mxu1 %v3046_v17  ;;  %v1303_v17 = vrot.slane %v1293_v14, %v3843_v59  ;;  %v3100_v14 = vld [vmem:[#allocation15 + $0x164] ss:$8 sps:$4 sm:$0xff]  }
 0x395   :  { %1541 = vmatpush1.bf16.msra.mxu1 %v3044_v36  ;;  %v1315_v36 = vrot.slane %v1244_v12, %v3849_v61 }
 0x396   :  { %1542 = vmatprep.subr.bf16.mxu1 %v3049_v18 }
 0x399   :  { %1543 = vmatpush1.bf16.msra.mxu1 %v3047_v19 }
 0x39a   :  { %1544 = vmatprep.subr.bf16.mxu1 %v3052_v20 }
 0x39d   :  { %1545 = vmatpush1.bf16.msra.mxu1 %v3050_v21 }
 0x39e   :  { %1546 = vmatprep.subr.bf16.mxu1 %v3055_v27  ;;  %v1329_v27 = vrot.slane %v1319_v16, %v3849_v61  ;;  %v3103_v16 = vld [vmem:[#allocation15 + $0x174] ss:$8 sps:$4 sm:$0xff]  }
 0x3a1   :  { %1547 = vmatpush1.bf16.msra.mxu1 %v3053_v24 }
 0x3a2   :  { %1548 = vmatprep.subr.bf16.mxu1 %v3058_v46 }
 0x3a5   :  { %1549 = vmatpush1.bf16.msra.mxu1 %v3056_v48 }
 0x3a6   :  { %1550 = vmatprep.subr.bf16.mxu1 %v3061_v50 }
 0x3a9   :  { %1551 = vmatpush1.bf16.msra.mxu1 %v3059_v52 }
 0x3aa   :  { %1552 = vmatprep.subr.bf16.mxu1 %v3064_v41  ;;  %v3907_v41 = vsub.s32 2, %v3840_v58 }
 0x3ad   :  { %1553 = vmatpush1.bf16.msra.mxu1 %v3062_v23 }
 0x3ae   :  { %1554 = vmatprep.subr.bf16.mxu1 %v3067_v30 }
 0x3b1   :  { %1555 = vmatpush1.bf16.msra.mxu1 %v3065_v54 }
 0x3b2   :  { %1556 = vmatprep.subr.bf16.mxu1 %v3070_v22 }
 0x3b5   :  { %1557 = vmatpush1.bf16.msra.mxu1 %v3068_v0 }
 0x3b6   :  { %1558 = vmatprep.subr.bf16.mxu1 %v3073_v26 }
 0x3b9   :  { %1559 = vmatpush1.bf16.msra.mxu1 %v3071_v47 }
 0x3ba   :  { %1560 = vmatprep.subr.bf16.mxu1 %v3076_v49 }
 0x3bd   :  { %1561 = vmatpush1.bf16.msra.mxu1 %v3074_v51 }
 0x3be   :  { %1562 = vmatprep.subr.bf16.mxu1 %v3079_v55 }
 0x3c1   :  { %1563 = vmatpush1.bf16.msra.mxu1 %v3077_v56 }
 0x457   :  { %v1231_v63 = vpop.f32.mrb[4].mxu1 }
 0x458   :  { %v3853_v1 = vadd.f32 %v1231_v63, %v1110_v62  ;;  %v1233_v3 = vpop.f32.mrb[5].mxu1 }
 0x459   :  { %v3855_v25 = vadd.f32 %v1233_v3, %v1114_v60  ;;  %v1235_v4 = vpop.f32.mrb[6].mxu1 }
 0x45a   :  { %v1237_v6 = vpop.f32.mrb[7].mxu1  ;;  %v3857_v7 = vadd.f32 %v1235_v4, %v1110_v62 }
 0x45b   :  { %v3859_v8 = vadd.f32 %v1237_v6, %v1114_v60  ;;  %v1251_v43 = vadd.f32 %v3855_v25, %v3853_v1 }
 0x45d   :  { %1252 = vadd.xlane.f32.xlu1 %v1251_v43  ;;  %v1254_v9 = vadd.f32 %v3859_v8, %v3857_v7 }
 0x461   :  { %1255 = vadd.xlane.f32.xlu1 %v1254_v9 }
 0x4ea   :  { %v1253_v28 = vpop.xlane.xlu1 %1252 }
 0x4eb   :  { %v1257_v29 = vmul.f32 0.00390625, %v1253_v28  ;;  %v1325_v28 = vrot.slane %v1315_v36, %v3849_v61 }
 0x4ed   :  { %v3866_v32 = vsub.f32 %v3853_v1, %v1257_v29  ;;  %v3869_v33 = vsub.f32 %v3855_v25, %v1257_v29  ;;  %v1273_v5 = vmul.f32 %v1257_v29, %v1257_v29 }
 0x4ee   :  { %v1256_v31 = vpop.xlane.xlu1 %1255 }
 0x4ef   :  { %v1258_v34 = vmul.f32 0.00390625, %v1256_v31  ;;  %v1263_v35 = vmul.f32 %v3866_v32, %v3866_v32  ;;  %v1264_v37 = vmul.f32 %v3869_v33, %v3869_v33  ;;  %v1275_v57 = vmul.f32 0.0, %v1273_v5 }
 0x4f1   :  { %v3876_v38 = vsub.f32 %v3857_v7, %v1258_v34  ;;  %v3879_v39 = vsub.f32 %v3859_v8, %v1258_v34  ;;  %v1267_v40 = vadd.f32 %v1264_v37, %v1263_v35  ;;  %v1274_v53 = vmul.f32 %v1258_v34, %v1258_v34 }
 0x4f3   :  { %1268 = vadd.xlane.f32.xlu0 %v1267_v40  ;;  %v1265_v42 = vmul.f32 %v3876_v38, %v3876_v38  ;;  %v1266_v44 = vmul.f32 %v3879_v39, %v3879_v39  ;;  %v1276_v3 = vmul.f32 0.0, %v1274_v53 }
 0x4f5   :  { %v1270_v45 = vadd.f32 %v1266_v44, %v1265_v42 }
 0x4f7   :  { %1271 = vadd.xlane.f32.xlu1 %v1270_v45 }
 0x580   :  { %v1269_v62 = vpop.xlane.xlu0 %1268 }
 0x581   :  { %v1277_v60 = vsub.f32 %v1269_v62, %v1275_v57 }
 0x583   :  { %v1279_v63 = vmul.f32 0.00390625, %v1277_v60  ;;  %v3080_v60 = vld [vmem:[#allocation15 + $0x100] ss:$8 sps:$4 sm:$0xff]  }
 0x584   :  { %v1272_v4 = vpop.xlane.xlu1 %1271 }
 0x585   :  { %v1281_v6 = vadd.f32 1e-05, %v1279_v63  ;;  %v1278_v43 = vsub.f32 %v1272_v4, %v1276_v3  ;;  %v3082_v63 = vld [vmem:[#allocation15 + $0x104] ss:$8 sps:$4 sm:$0xff]   ;;  %v3083_v3 = vld [vmem:[#allocation15 + $0x110] ss:$8 sps:$4 sm:$0xff]  }
 0x586   :  { %1891 = vmatprep.subr.bf16.mxu0 %v3082_v63  ;;  %v3086_v4 = vld [vmem:[#allocation15 + $0x120] ss:$8 sps:$4 sm:$0xff]  }
 0x587   :  { %3208 = vrsqrt.f32 %v1281_v6  ;;  %v1280_v9 = vmul.f32 0.00390625, %v1278_v43  ;;  %1892 = vmatpush1.bf16.msra.mxu0 %v3080_v60  ;;  %v3091_v6 = vld [vmem:[#allocation15 + $0x134] ss:$8 sps:$4 sm:$0xff]   ;;  %v3089_v43 = vld [vmem:[#allocation15 + $0x130] ss:$8 sps:$4 sm:$0xff]  }
 0x589   :  { %v1282_v11 = vadd.f32 1e-05, %v1280_v9  ;;  %v3094_v9 = vld [vmem:[#allocation15 + $0x144] ss:$8 sps:$4 sm:$0xff]  }
 0x58b   :  { %3210 = vrsqrt.f32 %v1282_v11  ;;  %v3092_v11 = vld [vmem:[#allocation15 + $0x140] ss:$8 sps:$4 sm:$0xff]  }
 0x591   :  { %v3209_v18 = vpop.eup %3208 }
 0x592   :  { %v1285_v19 = vmul.f32 %v3209_v18, %v3866_v32  ;;  %v1286_v20 = vmul.f32 %v3209_v18, %v3869_v33 }
 0x594   :  { %v1309_v21 = vmul.f32 %v1307_v15, %v1286_v20  ;;  %v1308_v24 = vmul.f32 %v1303_v17, %v1285_v19 }
 0x595   :  { %v3211_v29 = vpop.eup %3210 }
 0x596   :  { %v1287_v31 = vmul.f32 %v3211_v29, %v3876_v38  ;;  %v1288_v34 = vmul.f32 %v3211_v29, %v3879_v39  ;;  %v1331_v37 = vadd.f32 %v1329_v27, %v1309_v21  ;;  %v1330_v42 = vadd.f32 %v1325_v28, %v1308_v24 }
 0x597   :  { %v3910_v38 = vsub.s32 6, %v3840_v58  ;;  %v1582_v39 = vrot.slane %v1244_v12, %v3907_v41 }
 0x598   :  { %v1311_v35 = vmul.f32 %v1307_v15, %v1288_v34  ;;  %v1310_v40 = vmul.f32 %v1303_v17, %v1287_v31  ;;  %v1335_v32 = vmax.f32 %v1331_v37, 0.0  ;;  %v1334_v33 = vmax.f32 %v1330_v42, 0.0  ;;  %v3098_v15 = vld [vmem:[#allocation15 + $0x160] ss:$8 sps:$4 sm:$0xff]   ;;  %v3101_v17 = vld [vmem:[#allocation15 + $0x170] ss:$8 sps:$4 sm:$0xff]  }
 0x599   :  { %v1586_v23 = vrot.slane %v1244_v12, %v3910_v38  ;;  %v1592_v30 = vrot.slane %v1582_v39, %v3907_v41  ;;  %v3097_v12 = vld [vmem:[#allocation15 + $0x154] ss:$8 sps:$4 sm:$0xff]   ;;  %v3106_v42 = vld [vmem:[#allocation15 + $0x184] ss:$8 sps:$4 sm:$0xff]   ;;  %v3116_v39 = vld [vmem:[#allocation15 + $0x1c0] ss:$8 sps:$4 sm:$0xff]  }
 0x59a   :  { %v1333_v44 = vadd.f32 %v1329_v27, %v1311_v35  ;;  %v1332_v45 = vadd.f32 %v1325_v28, %v1310_v40 }
 0x59b   :  { %v1596_v22 = vrot.slane %v1586_v23, %v3907_v41  ;;  %v3121_v23 = vld [vmem:[#allocation15 + $0x1d4] ss:$8 sps:$4 sm:$0xff]  }
 0x59c   :  { %v1337_v46 = vmax.f32 %v1333_v44, 0.0  ;;  %v1336_v48 = vmax.f32 %v1332_v45, 0.0  ;;  %v3104_v44 = vld [vmem:[#allocation15 + $0x180] ss:$8 sps:$4 sm:$0xff]   ;;  %v3109_v45 = vld [vmem:[#allocation15 + $0x194] ss:$8 sps:$4 sm:$0xff]  }
 0x59e   :  { %v1339_v50 = vpack.c.bf16 %v1337_v46, %v1335_v32  ;;  %v1338_v52 = vpack.c.bf16 %v1336_v48, %v1334_v33  ;;  %v3107_v32 = vld [vmem:[#allocation15 + $0x190] ss:$8 sps:$4 sm:$0xff]   ;;  %v3112_v46 = vld [vmem:[#allocation15 + $0x1a4] ss:$8 sps:$4 sm:$0xff]   ;;  %v3110_v33 = vld [vmem:[#allocation15 + $0x1a0] ss:$8 sps:$4 sm:$0xff]  }
 0x59f   :  { %v3115_v48 = vld [vmem:[#allocation15 + $0x1b4] ss:$8 sps:$4 sm:$0xff]  }
 0x5a0   :  { %1564 = vmatprep.mubr.bf16.mxu1 %v1339_v50  ;;  %v3113_v50 = vld [vmem:[#allocation15 + $0x1b0] ss:$8 sps:$4 sm:$0xff]  }
 0x5a1   :  { %1565 = vmatmul.mubr.bf16.vlgmr.msra.gmra.mrb[8].mxu1 %v1338_v52  ;;  %v3118_v52 = vld [vmem:[#allocation15 + $0x1c4] ss:$8 sps:$4 sm:$0xff]  }
 0x674   :  { %v1566_v54 = vpop.f32.mrb[8].mxu1 }
 0x675   :  { %v1575_v0 = vadd.f32 %v1566_v54, %v3853_v1  ;;  %v1568_v26 = vpop.f32.mrb[9].mxu1  ;;  %v3124_v54 = vld [vmem:[#allocation15 + $0x1e4] ss:$8 sps:$4 sm:$0xff]  }
 0x676   :  { %v1576_v47 = vadd.f32 %v1568_v26, %v3855_v25  ;;  %v1570_v49 = vpop.f32.mrb[10].mxu1  ;;  %v3125_v26 = vld [vmem:[#allocation15 + $0x1f0] ss:$8 sps:$4 sm:$0xff]  }
 0x677   :  { %v3918_v51 = vadd.f32 %v1592_v30, %v1575_v0  ;;  %v1577_v55 = vadd.f32 %v1570_v49, %v3857_v7  ;;  %v1572_v56 = vpop.f32.mrb[11].mxu1  ;;  %v3085_v7 = vld [vmem:[#allocation15 + $0x114] ss:$8 sps:$4 sm:$0xff]  }
 0x678   :  { %v3921_v5 = vadd.f32 %v1596_v22, %v1576_v47  ;;  %v1578_v57 = vadd.f32 %v1572_v56, %v3859_v8  ;;  %1893 = vmatprep.subr.bf16.mxu0 %v3085_v7  ;;  %v3088_v8 = vld [vmem:[#allocation15 + $0x124] ss:$8 sps:$4 sm:$0xff]   ;;  %v3127_v0 = vld [vmem:[#allocation15 + $0x1f4] ss:$8 sps:$4 sm:$0xff]  }
 0x679   :  { %v3924_v53 = vadd.f32 %v1592_v30, %v1577_v55  ;;  %1894 = vmatpush1.bf16.msra.mxu0 %v3083_v3  ;;  %v3119_v30 = vld [vmem:[#allocation15 + $0x1d0] ss:$8 sps:$4 sm:$0xff]  }
 0x67a   :  { %v3926_v62 = vadd.f32 %v1596_v22, %v1578_v57  ;;  %v1609_v1 = vadd.f32 %v3921_v5, %v3918_v51  ;;  %1895 = vmatprep.subr.bf16.mxu0 %v3088_v8  ;;  %v3122_v22 = vld [vmem:[#allocation15 + $0x1e0] ss:$8 sps:$4 sm:$0xff]  }
 0x67c   :  { %1610 = vadd.xlane.f32.xlu1 %v1609_v1  ;;  %v1612_v25 = vadd.f32 %v3926_v62, %v3924_v53 }
 0x67d   :  { %1896 = vmatpush1.bf16.msra.mxu0 %v3086_v4  ;;  %v1245_v4 = vld [vmem:[%s4092_s13 + $0x8] sm:$0x77] }
 0x67e   :  { %1897 = vmatprep.subr.bf16.mxu0 %v3091_v6  ;;  %v1655_v6 = vrot.slane %v1245_v4, %v3886_v10 }
 0x680   :  { %1613 = vadd.xlane.f32.xlu1 %v1612_v25 }
 0x681   :  { %1898 = vmatpush1.bf16.msra.mxu0 %v3089_v43  ;;  %v1651_v43 = vrot.slane %v1245_v4, %v3843_v59 }
 0x682   :  { %1899 = vmatprep.subr.bf16.mxu0 %v3094_v9  ;;  %v1665_v9 = vrot.slane %v1655_v6, %v3843_v59  ;;  %v3143_v6 = vld [vmem:[#allocation15 + $0x250] ss:$8 sps:$4 sm:$0xff]  }
 0x685   :  { %1900 = vmatpush1.bf16.msra.mxu0 %v3092_v11  ;;  %v1677_v11 = vrot.slane %v1245_v4, %v3893_v13 }
 0x686   :  { %1901 = vmatprep.subr.bf16.mxu0 %v3097_v12  ;;  %v1661_v12 = vrot.slane %v1651_v43, %v3843_v59  ;;  %v3148_v43 = vld [vmem:[#allocation15 + $0x264] ss:$8 sps:$4 sm:$0xff]  }
 0x689   :  { %1902 = vmatpush1.bf16.msra.mxu0 %v3095_v2  ;;  %v1673_v2 = vrot.slane %v1245_v4, %v3849_v61 }
 0x68a   :  { %1903 = vmatprep.subr.bf16.mxu0 %v3100_v14 }
 0x68d   :  { %1904 = vmatpush1.bf16.msra.mxu0 %v3098_v15 }
 0x68e   :  { %1905 = vmatprep.subr.bf16.mxu0 %v3103_v16 }
 0x691   :  { %1906 = vmatpush1.bf16.msra.mxu0 %v3101_v17 }
 0x692   :  { %1907 = vmatprep.subr.bf16.mxu0 %v3106_v42 }
 0x695   :  { %1908 = vmatpush1.bf16.msra.mxu0 %v3104_v44 }
 0x696   :  { %1909 = vmatprep.subr.bf16.mxu0 %v3109_v45 }
 0x699   :  { %1910 = vmatpush1.bf16.msra.mxu0 %v3107_v32 }
 0x69a   :  { %1911 = vmatprep.subr.bf16.mxu0 %v3112_v46 }
 0x69d   :  { %1912 = vmatpush1.bf16.msra.mxu0 %v3110_v33 }
 0x69e   :  { %1913 = vmatprep.subr.bf16.mxu0 %v3115_v48  ;;  %v1941_v48 = vrot.slane %v1245_v4, %v3907_v41 }
 0x6a1   :  { %1914 = vmatpush1.bf16.msra.mxu0 %v3113_v50 }
 0x6a2   :  { %1915 = vmatprep.subr.bf16.mxu0 %v3118_v52 }
 0x6a5   :  { %1916 = vmatpush1.bf16.msra.mxu0 %v3116_v39 }
 0x6a6   :  { %1917 = vmatprep.subr.bf16.mxu0 %v3121_v23 }
 0x6a9   :  { %1918 = vmatpush1.bf16.msra.mxu0 %v3119_v30 }
 0x6aa   :  { %1919 = vmatprep.subr.bf16.mxu0 %v3124_v54 }
 0x6ad   :  { %1920 = vmatpush1.bf16.msra.mxu0 %v3122_v22 }
 0x6ae   :  { %1921 = vmatprep.subr.bf16.mxu0 %v3127_v0 }
 0x6b1   :  { %1922 = vmatpush1.bf16.msra.mxu0 %v3125_v26 }
 0x709   :  { %v1611_v36 = vpop.xlane.xlu1 %1610 }
 0x70a   :  { %v1615_v18 = vmul.f32 0.00390625, %v1611_v36  ;;  %v1687_v36 = vrot.slane %v1677_v11, %v3849_v61  ;;  %v3151_v11 = vld [vmem:[#allocation15 + $0x274] ss:$8 sps:$4 sm:$0xff]  }
 0x70c   :  { %v3933_v19 = vsub.f32 %v3918_v51, %v1615_v18  ;;  %v3936_v20 = vsub.f32 %v3921_v5, %v1615_v18  ;;  %v1631_v47 = vmul.f32 %v1615_v18, %v1615_v18 }
 0x70d   :  { %v1614_v21 = vpop.xlane.xlu1 %1613 }
 0x70e   :  { %v1616_v27 = vmul.f32 0.00390625, %v1614_v21  ;;  %v1621_v24 = vmul.f32 %v3933_v19, %v3933_v19  ;;  %v1622_v28 = vmul.f32 %v3936_v20, %v3936_v20  ;;  %v1633_v49 = vmul.f32 0.0, %v1631_v47 }
 0x70f   :  { %v1683_v21 = vrot.slane %v1673_v2, %v3849_v61 }
 0x710   :  { %v3943_v29 = vsub.f32 %v3924_v53, %v1616_v27  ;;  %v3946_v31 = vsub.f32 %v3926_v62, %v1616_v27  ;;  %v1625_v34 = vadd.f32 %v1622_v28, %v1621_v24  ;;  %v1632_v55 = vmul.f32 %v1616_v27, %v1616_v27 }
 0x712   :  { %1626 = vadd.xlane.f32.xlu1 %v1625_v34  ;;  %v1623_v35 = vmul.f32 %v3943_v29, %v3943_v29  ;;  %v1624_v37 = vmul.f32 %v3946_v31, %v3946_v31  ;;  %v1634_v25 = vmul.f32 0.0, %v1632_v55 }
 0x714   :  { %v1628_v40 = vadd.f32 %v1624_v37, %v1623_v35 }
 0x716   :  { %1629 = vadd.xlane.f32.xlu1 %v1628_v40 }
 0x79f   :  { %v1627_v56 = vpop.xlane.xlu1 %1626 }
 0x7a0   :  { %v1635_v57 = vsub.f32 %v1627_v56, %v1633_v49 }
 0x7a2   :  { %v1637_v1 = vmul.f32 0.00390625, %v1635_v57  ;;  %v3128_v57 = vld [vmem:[#allocation15 + $0x200] ss:$8 sps:$4 sm:$0xff]  }
 0x7a3   :  { %v1630_v60 = vpop.xlane.xlu1 %1629 }
 0x7a4   :  { %v1639_v63 = vadd.f32 1e-05, %v1637_v1  ;;  %v1636_v7 = vsub.f32 %v1630_v60, %v1634_v25  ;;  %v3130_v1 = vld [vmem:[#allocation15 + $0x204] ss:$8 sps:$4 sm:$0xff]   ;;  %v3131_v25 = vld [vmem:[#allocation15 + $0x210] ss:$8 sps:$4 sm:$0xff]  }
 0x7a5   :  { %2250 = vmatprep.subr.bf16.mxu1 %v3130_v1  ;;  %v3134_v60 = vld [vmem:[#allocation15 + $0x220] ss:$8 sps:$4 sm:$0xff]  }
 0x7a6   :  { %3212 = vrsqrt.f32 %v1639_v63  ;;  %v1638_v3 = vmul.f32 0.00390625, %v1636_v7  ;;  %2251 = vmatpush1.bf16.msra.mxu1 %v3128_v57  ;;  %v3139_v63 = vld [vmem:[#allocation15 + $0x234] ss:$8 sps:$4 sm:$0xff]   ;;  %v3137_v7 = vld [vmem:[#allocation15 + $0x230] ss:$8 sps:$4 sm:$0xff]  }
 0x7a8   :  { %v1640_v8 = vadd.f32 1e-05, %v1638_v3  ;;  %v3142_v3 = vld [vmem:[#allocation15 + $0x244] ss:$8 sps:$4 sm:$0xff]  }
 0x7aa   :  { %3214 = vrsqrt.f32 %v1640_v8  ;;  %v3140_v8 = vld [vmem:[#allocation15 + $0x240] ss:$8 sps:$4 sm:$0xff]  }
 0x7b0   :  { %v3213_v14 = vpop.eup %3212 }
 0x7b1   :  { %v1643_v15 = vmul.f32 %v3213_v14, %v3933_v19  ;;  %v1644_v16 = vmul.f32 %v3213_v14, %v3936_v20 }
 0x7b3   :  { %v1667_v17 = vmul.f32 %v1665_v9, %v1644_v16  ;;  %v1666_v18 = vmul.f32 %v1661_v12, %v1643_v15 }
 0x7b4   :  { %v3215_v27 = vpop.eup %3214 }
 0x7b5   :  { %v1645_v24 = vmul.f32 %v3215_v27, %v3943_v29  ;;  %v1646_v28 = vmul.f32 %v3215_v27, %v3946_v31  ;;  %v1689_v35 = vadd.f32 %v1687_v36, %v1667_v17  ;;  %v1688_v40 = vadd.f32 %v1683_v21, %v1666_v18 }
 0x7b6   :  { %v1945_v29 = vrot.slane %v1245_v4, %v3910_v38  ;;  %v1951_v31 = vrot.slane %v1941_v48, %v3907_v41  ;;  %v3145_v4 = vld [vmem:[#allocation15 + $0x254] ss:$8 sps:$4 sm:$0xff]   ;;  %v3164_v48 = vld [vmem:[#allocation15 + $0x2c0] ss:$8 sps:$4 sm:$0xff]  }
 0x7b7   :  { %v1669_v34 = vmul.f32 %v1665_v9, %v1646_v28  ;;  %v1668_v37 = vmul.f32 %v1661_v12, %v1645_v24  ;;  %v1693_v19 = vmax.f32 %v1689_v35, 0.0  ;;  %v1692_v20 = vmax.f32 %v1688_v40, 0.0  ;;  %v3146_v9 = vld [vmem:[#allocation15 + $0x260] ss:$8 sps:$4 sm:$0xff]   ;;  %v3149_v12 = vld [vmem:[#allocation15 + $0x270] ss:$8 sps:$4 sm:$0xff]  }
 0x7b8   :  { %v1955_v52 = vrot.slane %v1945_v29, %v3907_v41  ;;  %v3154_v40 = vld [vmem:[#allocation15 + $0x284] ss:$8 sps:$4 sm:$0xff]   ;;  %v3169_v29 = vld [vmem:[#allocation15 + $0x2d4] ss:$8 sps:$4 sm:$0xff]  }
 0x7b9   :  { %v1691_v42 = vadd.f32 %v1687_v36, %v1669_v34  ;;  %v1690_v44 = vadd.f32 %v1683_v21, %v1668_v37 }
 0x7bb   :  { %v1695_v45 = vmax.f32 %v1691_v42, 0.0  ;;  %v1694_v32 = vmax.f32 %v1690_v44, 0.0  ;;  %v3152_v42 = vld [vmem:[#allocation15 + $0x280] ss:$8 sps:$4 sm:$0xff]   ;;  %v3157_v44 = vld [vmem:[#allocation15 + $0x294] ss:$8 sps:$4 sm:$0xff]  }
 0x7bd   :  { %v1697_v46 = vpack.c.bf16 %v1695_v45, %v1693_v19  ;;  %v1696_v33 = vpack.c.bf16 %v1694_v32, %v1692_v20  ;;  %v3155_v19 = vld [vmem:[#allocation15 + $0x290] ss:$8 sps:$4 sm:$0xff]   ;;  %v3160_v45 = vld [vmem:[#allocation15 + $0x2a4] ss:$8 sps:$4 sm:$0xff]   ;;  %v3158_v20 = vld [vmem:[#allocation15 + $0x2a0] ss:$8 sps:$4 sm:$0xff]  }
 0x7be   :  { %v3163_v32 = vld [vmem:[#allocation15 + $0x2b4] ss:$8 sps:$4 sm:$0xff]  }
 0x7bf   :  { %1923 = vmatprep.mubr.bf16.mxu0 %v1697_v46  ;;  %v3161_v46 = vld [vmem:[#allocation15 + $0x2b0] ss:$8 sps:$4 sm:$0xff]  }
 0x7c0   :  { %1924 = vmatmul.mubr.bf16.vlgmr.msra.gmra.mrb[8].mxu0 %v1696_v33  ;;  %v3166_v33 = vld [vmem:[#allocation15 + $0x2c4] ss:$8 sps:$4 sm:$0xff]  }
 0x893   :  { %v1925_v50 = vpop.f32.mrb[8].mxu0 }
 0x894   :  { %v1934_v39 = vadd.f32 %v1925_v50, %v3918_v51  ;;  %v1927_v23 = vpop.f32.mrb[9].mxu0  ;;  %v3172_v50 = vld [vmem:[#allocation15 + $0x2e4] ss:$8 sps:$4 sm:$0xff]  }
 0x895   :  { %v1935_v30 = vadd.f32 %v1927_v23, %v3921_v5  ;;  %v1929_v54 = vpop.f32.mrb[10].mxu0  ;;  %v3173_v23 = vld [vmem:[#allocation15 + $0x2f0] ss:$8 sps:$4 sm:$0xff]  }
 0x896   :  { %v3973_v22 = vadd.f32 %v1951_v31, %v1934_v39  ;;  %v1936_v0 = vadd.f32 %v1929_v54, %v3924_v53  ;;  %v1931_v26 = vpop.f32.mrb[11].mxu0  ;;  %v3133_v53 = vld [vmem:[#allocation15 + $0x214] ss:$8 sps:$4 sm:$0xff]  }
 0x897   :  { %v3976_v47 = vadd.f32 %v1955_v52, %v1935_v30  ;;  %v1937_v49 = vadd.f32 %v1931_v26, %v3926_v62  ;;  %2252 = vmatprep.subr.bf16.mxu1 %v3133_v53  ;;  %v3136_v62 = vld [vmem:[#allocation15 + $0x224] ss:$8 sps:$4 sm:$0xff]   ;;  %v3175_v39 = vld [vmem:[#allocation15 + $0x2f4] ss:$8 sps:$4 sm:$0xff]  }
 0x898   :  { %v3979_v55 = vadd.f32 %v1951_v31, %v1936_v0  ;;  %2253 = vmatpush1.bf16.msra.mxu1 %v3131_v25  ;;  %v3167_v31 = vld [vmem:[#allocation15 + $0x2d0] ss:$8 sps:$4 sm:$0xff]  }
 0x899   :  { %v3981_v56 = vadd.f32 %v1955_v52, %v1937_v49  ;;  %v1968_v51 = vadd.f32 %v3976_v47, %v3973_v22  ;;  %2254 = vmatprep.subr.bf16.mxu1 %v3136_v62  ;;  %v3170_v52 = vld [vmem:[#allocation15 + $0x2e0] ss:$8 sps:$4 sm:$0xff]  }
 0x89b   :  { %1969 = vadd.xlane.f32.xlu1 %v1968_v51  ;;  %v1971_v5 = vadd.f32 %v3981_v56, %v3979_v55 }
 0x89c   :  { %2255 = vmatpush1.bf16.msra.mxu1 %v3134_v60  ;;  %v1246_v60 = vld [vmem:[%s4092_s13 + $0x10] sm:$0x77] }
 0x89d   :  { %2256 = vmatprep.subr.bf16.mxu1 %v3139_v63  ;;  %v2014_v63 = vrot.slane %v1246_v60, %v3886_v10 }
 0x89f   :  { %1972 = vadd.xlane.f32.xlu1 %v1971_v5 }
 0x8a0   :  { %2257 = vmatpush1.bf16.msra.mxu1 %v3137_v7  ;;  %v2010_v7 = vrot.slane %v1246_v60, %v3843_v59 }
 0x8a1   :  { %2258 = vmatprep.subr.bf16.mxu1 %v3142_v3  ;;  %v2024_v3 = vrot.slane %v2014_v63, %v3843_v59 }
 0x8a4   :  { %2259 = vmatpush1.bf16.msra.mxu1 %v3140_v8  ;;  %v2036_v8 = vrot.slane %v1246_v60, %v3893_v13 }
 0x8a5   :  { %2260 = vmatprep.subr.bf16.mxu1 %v3145_v4  ;;  %v2020_v4 = vrot.slane %v2010_v7, %v3843_v59 }
 0x8a8   :  { %2261 = vmatpush1.bf16.msra.mxu1 %v3143_v6  ;;  %v2032_v6 = vrot.slane %v1246_v60, %v3849_v61 }
 0x8a9   :  { %2262 = vmatprep.subr.bf16.mxu1 %v3148_v43 }
 0x8aa   :  { %v2042_v10 = vrot.slane %v2032_v6, %v3849_v61  ;;  %v3181_v6 = vld [vmem:[#allocation17 + $0x10] sm:$0xff]  }
 0x8ac   :  { %2263 = vmatpush1.bf16.msra.mxu1 %v3146_v9 }
 0x8ad   :  { %2264 = vmatprep.subr.bf16.mxu1 %v3151_v11 }
 0x8b0   :  { %2265 = vmatpush1.bf16.msra.mxu1 %v3149_v12 }
 0x8b1   :  { %2266 = vmatprep.subr.bf16.mxu1 %v3154_v40 }
 0x8b4   :  { %2267 = vmatpush1.bf16.msra.mxu1 %v3152_v42 }
 0x8b5   :  { %2268 = vmatprep.subr.bf16.mxu1 %v3157_v44 }
 0x8b8   :  { %2269 = vmatpush1.bf16.msra.mxu1 %v3155_v19 }
 0x8b9   :  { %2270 = vmatprep.subr.bf16.mxu1 %v3160_v45  ;;  %v2300_v45 = vrot.slane %v1246_v60, %v3907_v41 }
 0x8bc   :  { %2271 = vmatpush1.bf16.msra.mxu1 %v3158_v20 }
 0x8bd   :  { %2272 = vmatprep.subr.bf16.mxu1 %v3163_v32 }
 0x8c0   :  { %2273 = vmatpush1.bf16.msra.mxu1 %v3161_v46 }
 0x8c1   :  { %2274 = vmatprep.subr.bf16.mxu1 %v3166_v33 }
 0x8c4   :  { %2275 = vmatpush1.bf16.msra.mxu1 %v3164_v48 }
 0x8c5   :  { %2276 = vmatprep.subr.bf16.mxu1 %v3169_v29 }
 0x8c8   :  { %2277 = vmatpush1.bf16.msra.mxu1 %v3167_v31 }
 0x8c9   :  { %2278 = vmatprep.subr.bf16.mxu1 %v3172_v50 }
 0x8cc   :  { %2279 = vmatpush1.bf16.msra.mxu1 %v3170_v52 }
 0x8cd   :  { %2280 = vmatprep.subr.bf16.mxu1 %v3175_v39 }
 0x8d0   :  { %2281 = vmatpush1.bf16.msra.mxu1 %v3173_v23 }
 0x928   :  { %v1970_v2 = vpop.xlane.xlu1 %1969 }
 0x929   :  { %v1974_v14 = vmul.f32 0.00390625, %v1970_v2  ;;  %v2046_v2 = vrot.slane %v2036_v8, %v3849_v61  ;;  %v3179_v8 = vld [vmem:[#allocation17 + $0x8] sm:$0xff]  }
 0x92b   :  { %v3988_v15 = vsub.f32 %v3973_v22, %v1974_v14  ;;  %v3991_v16 = vsub.f32 %v3976_v47, %v1974_v14  ;;  %v1990_v30 = vmul.f32 %v1974_v14, %v1974_v14 }
 0x92c   :  { %v1973_v17 = vpop.xlane.xlu1 %1972 }
 0x92d   :  { %v1975_v36 = vmul.f32 0.00390625, %v1973_v17  ;;  %v1980_v18 = vmul.f32 %v3988_v15, %v3988_v15  ;;  %v1981_v21 = vmul.f32 %v3991_v16, %v3991_v16  ;;  %v1992_v54 = vmul.f32 0.0, %v1990_v30 }
 0x92f   :  { %v3998_v27 = vsub.f32 %v3979_v55, %v1975_v36  ;;  %v4001_v24 = vsub.f32 %v3981_v56, %v1975_v36  ;;  %v1984_v28 = vadd.f32 %v1981_v21, %v1980_v18  ;;  %v1991_v0 = vmul.f32 %v1975_v36, %v1975_v36 }
 0x931   :  { %1985 = vadd.xlane.f32.xlu1 %v1984_v28  ;;  %v1982_v34 = vmul.f32 %v3998_v27, %v3998_v27  ;;  %v1983_v35 = vmul.f32 %v4001_v24, %v4001_v24  ;;  %v1993_v5 = vmul.f32 0.0, %v1991_v0 }
 0x933   :  { %v1987_v37 = vadd.f32 %v1983_v35, %v1982_v34 }
 0x935   :  { %1988 = vadd.xlane.f32.xlu0 %v1987_v37 }
 0x9be   :  { %v1986_v26 = vpop.xlane.xlu1 %1985 }
 0x9bf   :  { %v1994_v49 = vsub.f32 %v1986_v26, %v1992_v54  ;;  %v3176_v26 = vld [vmem:[#allocation17 + $0x40] sm:$0xff]  }
 0x9c0   :  { %2834 = vmatprep.subr.bf16.mxu0 %v3176_v26 }
 0x9c1   :  { %v1996_v51 = vmul.f32 0.00390625, %v1994_v49  ;;  %v3177_v49 = vld [vmem:[#allocation17] sm:$0xff]  }
 0x9c2   :  { %v1989_v57 = vpop.xlane.xlu0 %1988  ;;  %2835 = vmatpush3.bf16.msra.mxu0 %v3177_v49 }
 0x9c3   :  { %v1998_v1 = vadd.f32 1e-05, %v1996_v51  ;;  %v1995_v53 = vsub.f32 %v1989_v57, %v1993_v5 }
 0x9c5   :  { %3216 = vrsqrt.f32 %v1998_v1  ;;  %v1997_v25 = vmul.f32 0.00390625, %v1995_v53 }
 0x9c7   :  { %v1999_v62 = vadd.f32 1e-05, %v1997_v25 }
 0x9c9   :  { %3218 = vrsqrt.f32 %v1999_v62 }
 0x9cf   :  { %v3217_v43 = vpop.eup %3216 }
 0x9d0   :  { %v2002_v9 = vmul.f32 %v3217_v43, %v3988_v15  ;;  %v2003_v11 = vmul.f32 %v3217_v43, %v3991_v16  ;;  %v3182_v43 = vld [vmem:[#allocation17 + $0x58] sm:$0xff]  }
 0x9d2   :  { %v2026_v12 = vmul.f32 %v2024_v3, %v2003_v11  ;;  %v2025_v14 = vmul.f32 %v2020_v4, %v2002_v9  ;;  %v3183_v9 = vld [vmem:[#allocation17 + $0x18] sm:$0xff]   ;;  %v3184_v11 = vld [vmem:[#allocation17 + $0x60] sm:$0xff]  }
 0x9d3   :  { %v3219_v17 = vpop.eup %3218 }
 0x9d4   :  { %v2004_v36 = vmul.f32 %v3219_v17, %v3998_v27  ;;  %v2005_v13 = vmul.f32 %v3219_v17, %v4001_v24  ;;  %v2048_v21 = vadd.f32 %v2046_v2, %v2026_v12  ;;  %v2047_v34 = vadd.f32 %v2042_v10, %v2025_v14  ;;  %v3185_v12 = vld [vmem:[#allocation17 + $0x20] sm:$0xff]   ;;  %v3187_v14 = vld [vmem:[#allocation17 + $0x28] sm:$0xff]   ;;  %v3189_v17 = vld [vmem:[#allocation17 + $0x30] sm:$0xff]  }
 0x9d5   :  { %v2304_v27 = vrot.slane %v1246_v60, %v3910_v38  ;;  %v2310_v24 = vrot.slane %v2300_v45, %v3907_v41  ;;  %v2323_v45 = vld [vmem:[%s4093_s14] sm:$0xf] }
 0x9d6   :  { %v2028_v18 = vmul.f32 %v2024_v3, %v2005_v13  ;;  %v2027_v28 = vmul.f32 %v2020_v4, %v2004_v36  ;;  %v2052_v15 = vmax.f32 %v2048_v21, 0.0  ;;  %v2051_v16 = vmax.f32 %v2047_v34, 0.0  ;;  %v3178_v3 = vld [vmem:[#allocation17 + $0x48] sm:$0xff]   ;;  %v3180_v4 = vld [vmem:[#allocation17 + $0x50] sm:$0xff]   ;;  %v3190_v36 = vld [vmem:[#allocation17 + $0x78] sm:$0xff]  }
 0x9d7   :  { %v2314_v32 = vrot.slane %v2304_v27, %v3907_v41  ;;  %2836 = vmatprep.subr.bf16.mxu0 %v3178_v3  ;;  %v3191_v13 = vld [vmem:[#allocation17 + $0x38] sm:$0xff]   ;;  %v2395_v27 = vsub.s32 3, %v3840_v58 }
 0x9d8   :  { %v2050_v35 = vadd.f32 %v2046_v2, %v2028_v18  ;;  %v2049_v37 = vadd.f32 %v2042_v10, %v2027_v28  ;;  %2837 = vmatpush3.bf16.msra.mxu0 %v3179_v8  ;;  %v3186_v2 = vld [vmem:[#allocation17 + $0x68] sm:$0xff]   ;;  %v3188_v10 = vld [vmem:[#allocation17 + $0x70] sm:$0xff]  }
 0x9d9   :  { %2838 = vmatprep.subr.bf16.mxu0 %v3180_v4 }
 0x9da   :  { %v2054_v40 = vmax.f32 %v2050_v35, 0.0  ;;  %v2053_v42 = vmax.f32 %v2049_v37, 0.0 }
 0x9dc   :  { %v2056_v44 = vpack.c.bf16 %v2054_v40, %v2052_v15  ;;  %v2055_v19 = vpack.c.bf16 %v2053_v42, %v2051_v16  ;;  %2839 = vmatpush3.bf16.msra.mxu0 %v3181_v6 }
 0x9dd   :  { %2840 = vmatprep.subr.bf16.mxu0 %v3182_v43 }
 0x9de   :  { %2282 = vmatprep.mubr.bf16.mxu1 %v2056_v44 }
 0x9df   :  { %2283 = vmatmul.mubr.bf16.vlgmr.msra.gmra.mrb[12].mxu1 %v2055_v19 }
 0x9e0   :  { %2841 = vmatpush3.bf16.msra.mxu0 %v3183_v9 }
 0x9e1   :  { %2842 = vmatprep.subr.bf16.mxu0 %v3184_v11 }
 0x9e4   :  { %2843 = vmatpush3.bf16.msra.mxu0 %v3185_v12 }
 0x9e5   :  { %2844 = vmatprep.subr.bf16.mxu0 %v3186_v2 }
 0x9e8   :  { %2845 = vmatpush3.bf16.msra.mxu0 %v3187_v14 }
 0x9e9   :  { %2846 = vmatprep.subr.bf16.mxu0 %v3188_v10 }
 0x9ec   :  { %2847 = vmatpush3.bf16.msra.mxu0 %v3189_v17 }
 0x9ed   :  { %2848 = vmatprep.subr.bf16.mxu0 %v3190_v36 }
 0x9f0   :  { %2849 = vmatpush3.bf16.msra.mxu0 %v3191_v13 }
 0xab2   :  { %v2284_v20 = vpop.f32.mrb[12].mxu1 }
 0xab3   :  { %v2293_v46 = vadd.f32 %v2284_v20, %v3973_v22  ;;  %v2286_v33 = vpop.f32.mrb[13].mxu1  ;;  %v2370_v20 = vrot.slane %v2323_v45, %v3843_v59 }
 0xab4   :  { %v2294_v48 = vadd.f32 %v2286_v33, %v3976_v47  ;;  %v2288_v29 = vpop.f32.mrb[14].mxu1 }
 0xab5   :  { %v2315_v31 = vadd.f32 %v2310_v24, %v2293_v46  ;;  %v2295_v50 = vadd.f32 %v2288_v29, %v3979_v55  ;;  %v2290_v52 = vpop.f32.mrb[15].mxu1  ;;  %v2392_v46 = vrot.slane %v2323_v45, %v3849_v61 }
 0xab6   :  { %v2316_v39 = vadd.f32 %v2314_v32, %v2294_v48  ;;  %v2296_v23 = vadd.f32 %v2290_v52, %v3981_v56  ;;  %v2380_v48 = vrot.slane %v2370_v20, %v3843_v59 }
 0xab7   :  { %v2317_v30 = vadd.f32 %v2310_v24, %v2295_v50  ;;  %v2374_v24 = vrot.slane %v2323_v45, %v3907_v41  ;;  %v2402_v58 = vrot.slane %v2392_v46, %v3849_v61 }
 0xab8   :  { %v2318_v38 = vadd.f32 %v2314_v32, %v2296_v23  ;;  %v2328_v54 = vadd.f32 %v2316_v39, %v2315_v31  ;;  %v2396_v32 = vrot.slane %v2323_v45, %v2395_v27 }
 0xab9   :  { %v2384_v33 = vrot.slane %v2374_v24, %v3843_v59 }
 0xaba   :  { %2329 = vadd.xlane.f32.xlu1 %v2328_v54  ;;  %v2331_v0 = vadd.f32 %v2318_v38, %v2317_v30  ;;  %v2406_v52 = vrot.slane %v2396_v32, %v3849_v61 }
 0xabc   :  { %2332 = vadd.xlane.f32.xlu0 %v2331_v0 }
 0xb47   :  { %v2330_v22 = vpop.xlane.xlu1 %2329 }
 0xb48   :  { %v2334_v47 = vmul.f32 0.00390625, %v2330_v22 }
 0xb49   :  { %v2333_v51 = vpop.xlane.xlu0 %2332 }
 0xb4a   :  { %v4030_v5 = vsub.f32 %v2315_v31, %v2334_v47  ;;  %v4032_v55 = vsub.f32 %v2316_v39, %v2334_v47  ;;  %v2335_v57 = vmul.f32 0.00390625, %v2333_v51  ;;  %v2350_v18 = vmul.f32 %v2334_v47, %v2334_v47 }
 0xb4c   :  { %v4034_v1 = vsub.f32 %v2317_v30, %v2335_v57  ;;  %v4036_v56 = vsub.f32 %v2318_v38, %v2335_v57  ;;  %v2340_v53 = vmul.f32 %v4030_v5, %v4030_v5  ;;  %v2341_v25 = vmul.f32 %v4032_v55, %v4032_v55 }
 0xb4d   :  { %v2351_v21 = vmul.f32 %v2335_v57, %v2335_v57  ;;  %v2352_v28 = vmul.f32 0.0, %v2350_v18 }
 0xb4e   :  { %v2344_v62 = vadd.f32 %v2341_v25, %v2340_v53  ;;  %v2342_v60 = vmul.f32 %v4034_v1, %v4034_v1  ;;  %v2343_v63 = vmul.f32 %v4036_v56, %v4036_v56 }
 0xb4f   :  { %v2353_v37 = vmul.f32 0.0, %v2351_v21 }
 0xb50   :  { %2345 = vadd.xlane.f32.xlu1 %v2344_v62  ;;  %v2347_v7 = vadd.f32 %v2343_v63, %v2342_v60 }
 0xb52   :  { %2348 = vadd.xlane.f32.xlu0 %v2347_v7 }
 0xbdd   :  { %v2346_v34 = vpop.xlane.xlu1 %2345 }
 0xbde   :  { %v2354_v35 = vsub.f32 %v2346_v34, %v2352_v28 }
 0xbdf   :  { %v2349_v15 = vpop.xlane.xlu0 %2348 }
 0xbe0   :  { %v2356_v40 = vmul.f32 0.00390625, %v2354_v35  ;;  %v2355_v16 = vsub.f32 %v2349_v15, %v2353_v37 }
 0xbe2   :  { %v2358_v42 = vadd.f32 1e-05, %v2356_v40  ;;  %v2357_v44 = vmul.f32 0.00390625, %v2355_v16 }
 0xbe4   :  { %3220 = vrsqrt.f32 %v2358_v42  ;;  %v2359_v19 = vadd.f32 1e-05, %v2357_v44 }
 0xbe6   :  { %3222 = vrsqrt.f32 %v2359_v19 }
 0xbee   :  { %v3221_v29 = vpop.eup %3220 }
 0xbef   :  { %v2362_v31 = vmul.f32 %v3221_v29, %v4030_v5  ;;  %v2363_v50 = vmul.f32 %v3221_v29, %v4032_v55 }
 0xbf0   :  { %v3223_v39 = vpop.eup %3222 }
 0xbf1   :  { %v2364_v41 = vmul.f32 %v3223_v39, %v4034_v1  ;;  %v2365_v23 = vmul.f32 %v3223_v39, %v4036_v56  ;;  %v2386_v30 = vmul.f32 %v2384_v33, %v2363_v50  ;;  %v2385_v38 = vmul.f32 %v2380_v48, %v2362_v31  ;;  %v2781_v1 = vld [vmem:[%s4095_s16] ss:$0 sm:$0xff] }
 0xbf3   :  { %v2388_v54 = vmul.f32 %v2384_v33, %v2365_v23  ;;  %v2408_v0 = vadd.f32 %v2406_v52, %v2386_v30  ;;  %v2387_v26 = vmul.f32 %v2380_v48, %v2364_v41  ;;  %v2407_v59 = vadd.f32 %v2402_v58, %v2385_v38 }
 0xbf5   :  { %v2410_v49 = vadd.f32 %v2406_v52, %v2388_v54  ;;  %v2409_v22 = vadd.f32 %v2402_v58, %v2387_v26  ;;  %v2412_v47 = vmax.f32 %v2408_v0, 0.0  ;;  %v2411_v5 = vmax.f32 %v2407_v59, 0.0 }
 0xbf7   :  { %v2414_v51 = vmax.f32 %v2410_v49, 0.0  ;;  %v2413_v55 = vmax.f32 %v2409_v22, 0.0 }
 0xbf9   :  { %v2416_v57 = vpack.c.bf16 %v2414_v51, %v2412_v47  ;;  %v2415_v53 = vpack.c.bf16 %v2413_v55, %v2411_v5 }
 0xbfb   :  { %2584 = vmatprep.mubr.bf16.mxu0 %v2416_v57 }
 0xbfc   :  { %2585 = vmatmul.mubr.bf16.vlgmr.msra.gmra.mrb[12].mxu0 %v2415_v53 }
 0xccf   :  { %v2850_v61 = vpop.f32.mrb[12].mxu0 }
 0xcd0   :  { %v2851_v56 = vpop.f32.mrb[13].mxu0 }
 0xcd1   :  { %v2852_v25 = vadd.f32 %v2851_v56, %v2850_v61  ;;  %v2853_v62 = vpop.f32.mrb[14].mxu0 }
 0xcd2   :  { %v2854_v60 = vpop.f32.mrb[15].mxu0 }
 0xcd3   :  { %v2587_v63 = vadd.f32 %v2852_v25, %v2781_v1  ;;  %v2855_v7 = vadd.f32 %v2854_v60, %v2853_v62 }
 0xcd5   :  { %2593 = vst [vmem:[#allocation18] sm:$0xff] %v2587_v63  ;;  %v2590_v3 = vadd.f32 %v2855_v7, %v2781_v1 }
 0xcd7   :  { %2594 = vst [vmem:[#allocation18 + $0x8] sm:$0xff] %v2590_v3 }
 0xcd8   :  { %3433 = shalt.err (!%p3430_p6)
}
 0xcd9   :  { %s4107_s19 = sld [smem:[#allocation27_spill]] }
 0xcdf   :  { %s3434_s29 = scalar_lea.hbm %s4107_s19, 256 }
 0xce0   :  { %p3435_p7 = scmp.ne.s32.totalorder %s4107_s19, %s3434_s29  ;;  %p3438_p8 = scmp.lt.u32.totalorder %s3434_s29, %s4107_s19 }
 0xce2   :  { %p3440_p9 = pnand %p3438_p8, %p3435_p7 }
 0xce4   :  { %3443 = shalt.err (!%p3440_p9)
}
 0xce5   :  { %2606 = dma.vmem_to_hbm [thread:$0]  %s2601_s23, 256, %s4107_s19, [#allocation5], %s3463_s27, %s3463_s27, %s3464_s0  }
 0xce6   :  { %3454 = dma.done.wait [#allocation5], 256  }
 0xce7   :  { %3455 = vsyncadd [#allocation5], 4294967040 }
 0xce8   :  { %2610 = vsyncpa [#allocation4], 1 }
 0xce9   :  { %2611 = vsyncpa [#allocation7], 1 }
 0xcea   :  { %2612 = vsyncpa [#allocation10], 1 }
 0xceb   :  { %2613 = vsyncpa [#allocation13], 1 }
 0xcec   :  { %2614 = vsyncpa [#allocation16], 1 }
 0xced   :  { %2615 = vsyncpa [#allocation5], 1 }

// kernel: tpu_custom_call.1
= control target key start
LH: loop header
LB: loop body
LE: loop exit
PB: predicated region body
PF: predicated region fallthrough
CT: control target
= control target key end

     0   :  { %s4079_s0 = inlined_call_operand.vmem [shape: f32[16,128], index: 0, kind: input, shape index: {}]   ;;  %s4080_s1 = inlined_call_operand.vmem [shape: f32[16,1], index: 1, kind: input, shape index: {}]   ;;  %s4081_s2 = inlined_call_operand.vmem [shape: f32[1,128], index: 2, kind: input, shape index: {}]   ;;  %s4082_s3 = inlined_call_operand.hbm [shape: f32[1,128], index: 3, kind: input, shape index: {}]   ;;  %s4083_s4 = inlined_call_operand.hbm [shape: bf16[2,128,128], index: 4, kind: input, shape index: {}]   ;;  %s4084_s5 = inlined_call_operand.hbm [shape: f32[1,128], index: 5, kind: input, shape index: {}]   ;;  %s4085_s6 = inlined_call_operand.hbm [shape: bf16[128,128], index: 6, kind: input, shape index: {}]   ;;  %s4086_s7 = inlined_call_operand.hbm [shape: f32[1,128], index: 7, kind: input, shape index: {}]   ;;  %s4087_s8 = inlined_call_operand.hbm [shape: bf16[128,128], index: 8, kind: input, shape index: {}]   ;;  %s4088_s9 = inlined_call_operand.vmem [shape: f32[1,128], index: 9, kind: input, shape index: {}]   ;;  %s4089_s10 = inlined_call_operand.hbm [shape: bf16[128,256], index: 10, kind: input, shape index: {}]   ;;  %s4090_s11 = inlined_call_operand.vmem [shape: f32[1,256], index: 11, kind: input, shape index: {}]   ;;  %s4091_s12 = inlined_call_operand.hbm [shape: bf16[3,256,256], index: 12, kind: input, shape index: {}]   ;;  %s4092_s13 = inlined_call_operand.vmem [shape: f32[3,3,256], index: 13, kind: input, shape index: {}]   ;;  %s4093_s14 = inlined_call_operand.vmem [shape: f32[2,256], index: 14, kind: input, shape index: {}]   ;;  %s4094_s15 = inlined_call_operand.hbm [shape: bf16[256,128], index: 15, kind: input, shape index: {}]   ;;  %s4095_s16 = inlined_call_operand.vmem [shape: f32[1,128], index: 16, kind: input, shape index: {}]   ;;  %s4096_s17 = inlined_call_operand.hbm [shape: f32[16,128], index: 17, kind: output, shape index: {}]  }
   0x1   :  { %4100 = sst [smem:[#allocation25_spill]] %s4079_s0 }
   0x2   :  { %4101 = sst [smem:[#allocation26_spill]] %s4080_s1 }
   0x3   :  { %4102 = sst [smem:[#allocation27_spill]] %s4096_s17 }
   0x4   :  { %22 = vsyncpa [#allocation4], 0 }
   0x5   :  { %23 = vsyncpa [#allocation7], 0 }
   0x6   :  { %24 = vsyncpa [#allocation10], 0 }
   0x7   :  { %25 = vsyncpa [#allocation13], 0 }
   0x8   :  { %26 = vsyncpa [#allocation16], 0 }
   0x9   :  { %27 = vsyncpa [#allocation5], 0  ;;  %s3456_s24 = smov [#allocation6]   ;;  %s3224_s28 = scalar_lea.hbm %s4083_s4, 2048 }
   0xa   :  { %s49_s25 = sshll.u32 %s3456_s24, 4  ;;  %p3225_p0 = scmp.ne.s32.totalorder %s4083_s4, %s3224_s28  ;;  %s50_s25 = int_to_ptr.vmem [resolvable:$true] %s49_s25 }
   0xb   :  { %p3228_p1 = scmp.lt.u32.totalorder %s3224_s28, %s4083_s4 }
   0xd   :  { %p3230_p2 = pnand %p3228_p1, %p3225_p0 }
   0xf   :  { %3233 = shalt.err (!%p3230_p2)
}
  0x10   :  { %s3234_s19 = scalar_lea.vmem %s50_s25, 2048  ;;  %p3239_p4 = scmp.lt.s32.totalorder %s50_s25, %s50_s25 }
  0x11   :  { %p3235_p3 = scmp.ne.s32.totalorder %s50_s25, %s3234_s19  ;;  %p3240_p5 = scmp.lt.s32.totalorder %s3234_s19, %s3234_s19 }
  0x13   :  { %p3241_p6 = por %p3240_p5, %p3239_p4 }
  0x15   :  { %p3242_p7 = pnand %p3241_p6, %p3235_p3 }
  0x17   :  { %3245 = shalt.err (!%p3242_p7)
}
  0x18   :  { %s3457_s1 = smov 64   ;;  %s3458_s20 = smov 4  }
  0x19   :  { %55 = dma.hbm_to_vmem [thread:$0]  %s4083_s4, 2048, %s50_s25, [#allocation7], %s3457_s1, %s3457_s1, %s3458_s20  }
  0x1a   :  { %s3459_s23 = smov [#allocation9]   ;;  %s3460_s26 = smov [#allocation12]  }
  0x1b   :  { %s71_s24 = sshll.u32 %s3459_s23, 4  ;;  %s93_s27 = sshll.u32 %s3460_s26, 4  ;;  %s72_s24 = int_to_ptr.vmem [resolvable:$true] %s71_s24  ;;  %s94_s27 = int_to_ptr.vmem [resolvable:$true] %s93_s27 }
  0x1c   :  { %s3246_s0 = scalar_lea.hbm %s4085_s6, 1024 }
  0x1d   :  { %p3247_p8 = scmp.ne.s32.totalorder %s4085_s6, %s3246_s0  ;;  %p3250_p9 = scmp.lt.u32.totalorder %s3246_s0, %s4085_s6 }
  0x1f   :  { %p3252_p10 = pnand %p3250_p9, %p3247_p8 }
  0x21   :  { %3255 = shalt.err (!%p3252_p10)
}
  0x22   :  { %s3256_s4 = scalar_lea.vmem %s72_s24, 1024  ;;  %p3261_p12 = scmp.lt.s32.totalorder %s72_s24, %s72_s24 }
  0x23   :  { %p3257_p11 = scmp.ne.s32.totalorder %s72_s24, %s3256_s4  ;;  %p3262_p13 = scmp.lt.s32.totalorder %s3256_s4, %s3256_s4 }
  0x25   :  { %p3263_p0 = por %p3262_p13, %p3261_p12 }
  0x27   :  { %p3264_p1 = pnand %p3263_p0, %p3257_p11 }
  0x29   :  { %3267 = shalt.err (!%p3264_p1)
}
  0x2a   :  { %77 = dma.hbm_to_vmem [thread:$0]  %s4085_s6, 1024, %s72_s24, [#allocation10], %s3457_s1, %s3457_s1, %s3458_s20  }
  0x2b   :  { %s3268_s23 = scalar_lea.hbm %s4087_s8, 1024 }
  0x2c   :  { %p3269_p2 = scmp.ne.s32.totalorder %s4087_s8, %s3268_s23  ;;  %p3272_p3 = scmp.lt.u32.totalorder %s3268_s23, %s4087_s8 }
  0x2e   :  { %p3274_p4 = pnand %p3272_p3, %p3269_p2 }
  0x30   :  { %3277 = shalt.err (!%p3274_p4)
}
  0x31   :  { %s3278_s30 = scalar_lea.vmem %s94_s27, 1024  ;;  %p3283_p6 = scmp.lt.s32.totalorder %s94_s27, %s94_s27 }
  0x32   :  { %p3279_p5 = scmp.ne.s32.totalorder %s94_s27, %s3278_s30  ;;  %p3284_p7 = scmp.lt.s32.totalorder %s3278_s30, %s3278_s30 }
  0x34   :  { %p3285_p8 = por %p3284_p7, %p3283_p6 }
  0x36   :  { %p3286_p9 = pnand %p3285_p8, %p3279_p5 }
  0x38   :  { %3289 = shalt.err (!%p3286_p9)
}
  0x39   :  { %99 = dma.hbm_to_vmem [thread:$0]  %s4087_s8, 1024, %s94_s27, [#allocation13], %s3457_s1, %s3457_s1, %s3458_s20  }
  0x3a   :  { %s3461_s18 = smov [#allocation15]   ;;  %s3462_s4 = smov [#allocation3]  }
  0x3b   :  { %s121_s19 = sshll.u32 %s3461_s18, 4  ;;  %s40_s25 = sshll.u32 %s3462_s4, 4  ;;  %s122_s19 = int_to_ptr.vmem [resolvable:$true] %s121_s19  ;;  %s41_s25 = int_to_ptr.vmem [resolvable:$true] %s40_s25 }
  0x3c   :  { %s3290_s17 = scalar_lea.hbm %s4091_s12, 12288 }
  0x3d   :  { %p3291_p10 = scmp.ne.s32.totalorder %s4091_s12, %s3290_s17  ;;  %p3294_p11 = scmp.lt.u32.totalorder %s3290_s17, %s4091_s12 }
  0x3f   :  { %p3296_p12 = pnand %p3294_p11, %p3291_p10 }
  0x41   :  { %3299 = shalt.err (!%p3296_p12)
}
  0x42   :  { %s3300_s8 = scalar_lea.vmem %s122_s19, 12288  ;;  %p3305_p0 = scmp.lt.s32.totalorder %s122_s19, %s122_s19 }
  0x43   :  { %p3301_p13 = scmp.ne.s32.totalorder %s122_s19, %s3300_s8  ;;  %p3306_p1 = scmp.lt.s32.totalorder %s3300_s8, %s3300_s8 }
  0x45   :  { %p3307_p2 = por %p3306_p1, %p3305_p0 }
  0x47   :  { %p3308_p3 = pnand %p3307_p2, %p3301_p13 }
  0x49   :  { %3311 = shalt.err (!%p3308_p3)
}
  0x4a   :  { %s3463_s27 = smov 128   ;;  %s3464_s0 = smov 8  }
  0x4b   :  { %127 = dma.hbm_to_vmem [thread:$0]  %s4091_s12, 12288, %s122_s19, [#allocation16], %s3463_s27, %s3463_s27, %s3464_s0  }
  0x4c   :  { %s3312_s4 = scalar_lea.hbm %s4082_s3, 16 }
  0x4d   :  { %p3313_p4 = scmp.ne.s32.totalorder %s4082_s3, %s3312_s4  ;;  %p3316_p5 = scmp.lt.u32.totalorder %s3312_s4, %s4082_s3 }
  0x4f   :  { %p3318_p6 = pnand %p3316_p5, %p3313_p4 }
  0x51   :  { %3321 = shalt.err (!%p3318_p6)
}
  0x52   :  { %s3322_s26 = scalar_lea.vmem %s41_s25, 16  ;;  %s3326_s28 = scalar_lea.vmem %s41_s25, 32 }
  0x53   :  { %p3323_p7 = scmp.ne.s32.totalorder %s41_s25, %s3322_s26  ;;  %p3327_p8 = scmp.lt.s32.totalorder %s41_s25, %s41_s25 }
  0x54   :  { %p3328_p9 = scmp.lt.s32.totalorder %s3326_s28, %s3322_s26 }
  0x56   :  { %p3329_p10 = por %p3328_p9, %p3327_p8 }
  0x58   :  { %p3330_p11 = pnand %p3329_p10, %p3323_p7 }
  0x5a   :  { %3333 = shalt.err (!%p3330_p11)
}
  0x5b   :  { %43 = dma.hbm_to_vmem [thread:$0]  %s4082_s3, 16, %s41_s25, [#allocation4]  }
  0x5c   :  { %s3465_s29 = smov [#allocation8]   ;;  %s3466_s30 = smov [#allocation11]  }
  0x5d   :  { %s62_s8 = sshll.u32 %s3465_s29, 4  ;;  %s84_s6 = sshll.u32 %s3466_s30, 4  ;;  %s63_s8 = int_to_ptr.vmem [resolvable:$true] %s62_s8  ;;  %s85_s6 = int_to_ptr.vmem [resolvable:$true] %s84_s6 }
  0x5e   :  { %s3334_s4 = scalar_lea.hbm %s4084_s5, 16 }
  0x5f   :  { %p3335_p12 = scmp.ne.s32.totalorder %s4084_s5, %s3334_s4  ;;  %p3338_p13 = scmp.lt.u32.totalorder %s3334_s4, %s4084_s5 }
  0x61   :  { %p3340_p0 = pnand %p3338_p13, %p3335_p12 }
  0x63   :  { %3343 = shalt.err (!%p3340_p0)
}
  0x64   :  { %s3344_s3 = scalar_lea.vmem %s63_s8, 16  ;;  %s3348_s25 = scalar_lea.vmem %s63_s8, 32 }
  0x65   :  { %p3345_p1 = scmp.ne.s32.totalorder %s63_s8, %s3344_s3  ;;  %p3349_p2 = scmp.lt.s32.totalorder %s63_s8, %s63_s8 }
  0x66   :  { %p3350_p3 = scmp.lt.s32.totalorder %s3348_s25, %s3344_s3 }
  0x68   :  { %p3351_p4 = por %p3350_p3, %p3349_p2 }
  0x6a   :  { %p3352_p5 = pnand %p3351_p4, %p3345_p1 }
  0x6c   :  { %3355 = shalt.err (!%p3352_p5)
}
  0x6d   :  { %65 = dma.hbm_to_vmem [thread:$0]  %s4084_s5, 16, %s63_s8, [#allocation7]  }
  0x6e   :  { %s3356_s29 = scalar_lea.hbm %s4086_s7, 16 }
  0x6f   :  { %p3357_p6 = scmp.ne.s32.totalorder %s4086_s7, %s3356_s29  ;;  %p3360_p7 = scmp.lt.u32.totalorder %s3356_s29, %s4086_s7 }
  0x71   :  { %p3362_p8 = pnand %p3360_p7, %p3357_p6 }
  0x73   :  { %3365 = shalt.err (!%p3362_p8)
}
  0x74   :  { %s3366_s21 = scalar_lea.vmem %s85_s6, 16  ;;  %s3370_s22 = scalar_lea.vmem %s85_s6, 32 }
  0x75   :  { %p3367_p9 = scmp.ne.s32.totalorder %s85_s6, %s3366_s21  ;;  %p3371_p10 = scmp.lt.s32.totalorder %s85_s6, %s85_s6 }
  0x76   :  { %p3372_p11 = scmp.lt.s32.totalorder %s3370_s22, %s3366_s21 }
  0x78   :  { %p3373_p12 = por %p3372_p11, %p3371_p10 }
  0x7a   :  { %p3374_p13 = pnand %p3373_p12, %p3367_p9 }
  0x7c   :  { %3377 = shalt.err (!%p3374_p13)
}
  0x7d   :  { %87 = dma.hbm_to_vmem [thread:$0]  %s4086_s7, 16, %s85_s6, [#allocation10]  }
  0x7e   :  { %s3467_s17 = smov [#allocation14]   ;;  %s3468_s3 = smov [#allocation17]  }
  0x7f   :  { %s107_s23 = sshll.u32 %s3467_s17, 4  ;;  %s137_s25 = sshll.u32 %s3468_s3, 4  ;;  %s108_s23 = int_to_ptr.vmem [resolvable:$true] %s107_s23  ;;  %s138_s25 = int_to_ptr.vmem [resolvable:$true] %s137_s25 }
  0x80   :  { %s3378_s12 = scalar_lea.hbm %s4089_s10, 2048 }
  0x81   :  { %p3379_p0 = scmp.ne.s32.totalorder %s4089_s10, %s3378_s12  ;;  %p3382_p1 = scmp.lt.u32.totalorder %s3378_s12, %s4089_s10 }
  0x83   :  { %p3384_p2 = pnand %p3382_p1, %p3379_p0 }
  0x85   :  { %3387 = shalt.err (!%p3384_p2)
}
  0x86   :  { %s3388_s7 = scalar_lea.vmem %s108_s23, 2048  ;;  %p3393_p4 = scmp.lt.s32.totalorder %s108_s23, %s108_s23 }
  0x87   :  { %p3389_p3 = scmp.ne.s32.totalorder %s108_s23, %s3388_s7  ;;  %p3394_p5 = scmp.lt.s32.totalorder %s3388_s7, %s3388_s7 }
  0x89   :  { %p3395_p6 = por %p3394_p5, %p3393_p4 }
  0x8b   :  { %p3396_p7 = pnand %p3395_p6, %p3389_p3 }
  0x8d   :  { %3399 = shalt.err (!%p3396_p7)
}
  0x8e   :  { %113 = dma.hbm_to_vmem [thread:$0]  %s4089_s10, 2048, %s108_s23, [#allocation13], %s3463_s27, %s3463_s27, %s3464_s0  }
  0x8f   :  { %s3400_s22 = scalar_lea.hbm %s4094_s15, 2048 }
  0x90   :  { %p3401_p8 = scmp.ne.s32.totalorder %s4094_s15, %s3400_s22  ;;  %p3404_p9 = scmp.lt.u32.totalorder %s3400_s22, %s4094_s15 }
  0x92   :  { %p3406_p10 = pnand %p3404_p9, %p3401_p8 }
  0x94   :  { %3409 = shalt.err (!%p3406_p10)
}
  0x95   :  { %s3410_s26 = scalar_lea.vmem %s138_s25, 2048  ;;  %p3415_p12 = scmp.lt.s32.totalorder %s138_s25, %s138_s25 }
  0x96   :  { %p3411_p11 = scmp.ne.s32.totalorder %s138_s25, %s3410_s26  ;;  %p3416_p13 = scmp.lt.s32.totalorder %s3410_s26, %s3410_s26 }
  0x98   :  { %p3417_p0 = por %p3416_p13, %p3415_p12 }
  0x9a   :  { %p3418_p1 = pnand %p3417_p0, %p3411_p11 }
  0x9c   :  { %3421 = shalt.err (!%p3418_p1)
}
  0x9d   :  { %143 = dma.hbm_to_vmem [thread:$0]  %s4094_s15, 2048, %s138_s25, [#allocation16], %s3457_s1, %s3457_s1, %s3458_s20  }
  0x9e   :  { %3444 = dma.done.wait [#allocation4], 16  }
  0x9f   :  { %3445 = vsyncadd [#allocation4], 4294967280 }
  0xa0   :  { %3446 = dma.done.wait [#allocation7], 2064  }
  0xa1   :  { %3447 = vsyncadd [#allocation7], 4294965232 }
  0xa2   :  { %3448 = dma.done.wait [#allocation10], 1040  }
  0xa3   :  { %3449 = vsyncadd [#allocation10], 4294966256 }
  0xa4   :  { %3450 = dma.done.wait [#allocation13], 3072  }
  0xa5   :  { %3451 = vsyncadd [#allocation13], 4294964224 }
  0xa6   :  { %3452 = dma.done.wait [#allocation16], 14336  }
  0xa7   :  { %3453 = vsyncadd [#allocation16], 4294952960  ;;  %v3469_v0 = vmov 0   ;;  %s4103_s19 = sld [smem:[#allocation26_spill]]  ;;  %v2976_v3 = vld [vmem:[#allocation6] sm:$0xff]   ;;  %v3470_v5 = vmov 0.0  }
  0xa8   :  { %2975 = vset.pattern.permute.xlu0 %v3469_v0  ;;  %v2977_v4 = vld [vmem:[#allocation6 + $0x40] sm:$0xff]   ;;  %2856 = vmatprep.subr.bf16.mxu0 %v3470_v5  ;;  %v2978_v6 = vld [vmem:[#allocation6 + $0x8] sm:$0xff]   ;;  %v2980_v8 = vld [vmem:[#allocation6 + $0x10] sm:$0xff]   ;;  %vm3471_vm0 = vmmov 0   ;;  %v3472_v43 = vmov 683565275  }
  0xa9   :  { %2876 = vmatprep.subr.bf16.mxu1 %v3470_v5  ;;  %2857 = vmatpush3.bf16.msra.mxu0 %v2976_v3  ;;  %v2979_v7 = vld [vmem:[#allocation6 + $0x48] sm:$0xff]   ;;  %v2981_v9 = vld [vmem:[#allocation6 + $0x50] sm:$0xff]   ;;  %v2982_v10 = vld [vmem:[#allocation6 + $0x18] sm:$0xff]   ;;  %v3473_v47 = vmov 2475754826   ;;  %s4106_s30 = sld [smem:[#allocation25_spill]] }
  0xaa   :  { %2877 = vmatpush3.bf16.msra.mxu1 %v2977_v4  ;;  %2858 = vmatprep.subr.bf16.mxu0 %v3470_v5  ;;  %v2983_v11 = vld [vmem:[#allocation6 + $0x58] sm:$0xff]   ;;  %v2984_v12 = vld [vmem:[#allocation6 + $0x20] sm:$0xff]   ;;  %v2986_v14 = vld [vmem:[#allocation6 + $0x28] sm:$0xff]   ;;  %v3474_v49 = vmov 2131351028   ;;  %s3478_s10 = smov [#allocation18]  }
  0xab   :  { %2878 = vmatprep.subr.bf16.mxu1 %v3470_v5  ;;  %2872 = vmatprep.mubr.msk.bf16.mxu0 %vm3471_vm0, %v3470_v5  ;;  %v2985_v13 = vld [vmem:[#allocation6 + $0x60] sm:$0xff]   ;;  %v2987_v15 = vld [vmem:[#allocation6 + $0x68] sm:$0xff]   ;;  %v2988_v16 = vld [vmem:[#allocation6 + $0x30] sm:$0xff]   ;;  %v3475_v51 = vmov 2102212464   ;;  %s2600_s23 = sshll.u32 %s3478_s10, 4  ;;  %s2601_s23 = int_to_ptr.vmem [resolvable:$true] %s2600_s23 }
  0xac   :  { %2892 = vmatprep.mubr.msk.bf16.mxu1 %vm3471_vm0, %v3470_v5  ;;  %v2989_v17 = vld [vmem:[#allocation6 + $0x70] sm:$0xff]   ;;  %v2990_v18 = vld [vmem:[#allocation6 + $0x38] sm:$0xff]   ;;  %v3476_v53 = vmov 920167782   ;;  %v3477_v60 = vmov 1326507024   ;;  %p3427_p3 = scmp.lt.s32.totalorder %s2601_s23, %s2601_s23 }
  0xad   :  { %v174_v1 = vld [vmem:[%s4103_s19] sm:$0xff]  ;;  %v175_v2 = vld [vmem:[%s4103_s19 + $0x8] sm:$0xff]  ;;  %2859 = vmatpush3.bf16.msra.mxu0 %v2978_v6  ;;  %s3422_s28 = scalar_lea.vmem %s2601_s23, 256 }
  0xae   :  { %179 = vperm.xlu0 %2975, %v174_v1   ;;  %2879 = vmatpush3.bf16.msra.mxu1 %v2979_v7  ;;  %v2991_v19 = vld [vmem:[#allocation6 + $0x78] sm:$0xff]   ;;  %p3423_p2 = scmp.ne.s32.totalorder %s2601_s23, %s3422_s28  ;;  %p3428_p4 = scmp.lt.s32.totalorder %s3422_s28, %s3422_s28 }
  0xaf   :  { %2860 = vmatprep.subr.bf16.mxu0 %v3470_v5  ;;  %2880 = vmatprep.subr.bf16.mxu1 %v3470_v5  ;;  %v2616_v20 = vld [vmem:[%s4081_s2] ss:$0 sm:$0xff] }
  0xb0   :  { %p3429_p5 = por %p3428_p4, %p3427_p3 }
  0xb1   :  { %2861 = vmatpush3.bf16.msra.mxu0 %v2980_v8 }
  0xb2   :  { %184 = vperm.xlu0 %2975, %v175_v2   ;;  %2881 = vmatpush3.bf16.msra.mxu1 %v2981_v9  ;;  %p3430_p6 = pnand %p3429_p5, %p3423_p2 }
  0xb3   :  { %2862 = vmatprep.subr.bf16.mxu0 %v3470_v5  ;;  %2882 = vmatprep.subr.bf16.mxu1 %v3470_v5 }
  0xb5   :  { %2863 = vmatpush3.bf16.msra.mxu0 %v2982_v10 }
  0xb6   :  { %2883 = vmatpush3.bf16.msra.mxu1 %v2983_v11  ;;  %2864 = vmatprep.subr.bf16.mxu0 %v3470_v5 }
  0xb7   :  { %2884 = vmatprep.subr.bf16.mxu1 %v3470_v5 }
  0xb9   :  { %2865 = vmatpush3.bf16.msra.mxu0 %v2984_v12 }
  0xba   :  { %2885 = vmatpush3.bf16.msra.mxu1 %v2985_v13  ;;  %2866 = vmatprep.subr.bf16.mxu0 %v3470_v5 }
  0xbb   :  { %2886 = vmatprep.subr.bf16.mxu1 %v3470_v5 }
  0xbd   :  { %2867 = vmatpush3.bf16.msra.mxu0 %v2986_v14 }
  0xbe   :  { %2887 = vmatpush3.bf16.msra.mxu1 %v2987_v15  ;;  %2868 = vmatprep.subr.bf16.mxu0 %v3470_v5 }
  0xbf   :  { %2888 = vmatprep.subr.bf16.mxu1 %v3470_v5 }
  0xc1   :  { %2869 = vmatpush3.bf16.msra.mxu0 %v2988_v16 }
  0xc2   :  { %2889 = vmatpush3.bf16.msra.mxu1 %v2989_v17  ;;  %2870 = vmatprep.subr.bf16.mxu0 %v3470_v5 }
  0xc3   :  { %2890 = vmatprep.subr.bf16.mxu1 %v3470_v5 }
  0xc5   :  { %2871 = vmatpush3.bf16.msra.mxu0 %v2990_v18 }
  0xc6   :  { %2891 = vmatpush3.bf16.msra.mxu1 %v2991_v19  ;;  %2896 = vmatprep.subr.bf16.mxu0 %v3470_v5 }
 0x12d   :  { %v3726_v21 = vpop.permute.xlu0 %179 }
 0x12e   :  { %v193_v22 = vmul.f32 %v2616_v20, %v3726_v21 }
 0x130   :  { %v3729_v23 = vmul.f32 6.2831855, %v193_v22 }
 0x131   :  { %v3731_v24 = vpop.permute.xlu0 %184 }
 0x132   :  { %v206_v25 = vand.u32 2147483647, %v3729_v23  ;;  %v209_v26 = vand.u32 2139095040, %v3729_v23  ;;  %v194_v27 = vmul.f32 %v2616_v20, %v3731_v24  ;;  %vm208_vm15 = vcmp.lt.s32.totalorder %v3729_v23, 0 }
 0x134   :  { %v210_v28 = vshrl.u32 %v209_v26, 23  ;;  %v213_v29 = vand.u32 8388607, %v206_v25  ;;  %v3738_v30 = vmul.f32 6.2831855, %v194_v27 }
 0x136   :  { %v2618_v31 = vadd.s32 4294967169, %v210_v28  ;;  %v313_v32 = vand.u32 2139095040, %v3738_v30  ;;  %v214_v34 = vor.u32 8388608, %v213_v29  ;;  %v310_v36 = vand.u32 2147483647, %v3738_v30 }
 0x138   :  { %v216_v33 = vadd.s32 1, %v2618_v31  ;;  %v314_v35 = vshrl.u32 %v313_v32, 23  ;;  %v3742_v41 = vshll.u32 %v214_v34, 8  ;;  %v317_v45 = vand.u32 8388607, %v310_v36 }
 0x13a   :  { %vm217_vm1 = vcmp.gt.s32.totalorder %v216_v33, 0  ;;  %v2622_v38 = vadd.s32 4294967169, %v314_v35  ;;  %v318_v13 = vor.u32 8388608, %v317_v45 }
 0x13b   :  { %v218_v37 = vsel %vm217_vm1, %v216_v33, 0  ;;  %vm3790_vm1 = vcmp.le.f32.partialorder %v206_v25, 0.7853982 }
 0x13c   :  { %v219_v39 = vshrl.u32 %v218_v37, 5  ;;  %v220_v40 = vand.u32 31, %v218_v37  ;;  %v320_v46 = vadd.s32 1, %v2622_v38  ;;  %v358_v31 = vshll.u32 %v318_v13, 8 }
 0x13e   :  { %v221_v42 = vsub.s32 32, %v220_v40  ;;  %v223_v44 = vshll.u32 %v3472_v43, %v220_v40  ;;  %v226_v48 = vshll.u32 %v3473_v47, %v220_v40  ;;  %v229_v50 = vshll.u32 %v3474_v49, %v220_v40 }
 0x13f   :  { %v232_v52 = vshll.u32 %v3475_v51, %v220_v40  ;;  %v235_v54 = vshll.u32 %v3476_v53, %v220_v40  ;;  %vm238_vm2 = vcmp.lt.s32.totalorder %v219_v39, 1  ;;  %vm240_vm3 = vcmp.lt.s32.totalorder %v219_v39, 3 }
 0x140   :  { %v224_v55 = vshrl.u32 %v3473_v47, %v221_v42  ;;  %v227_v56 = vshrl.u32 %v3474_v49, %v221_v42  ;;  %v230_v57 = vshrl.u32 %v3475_v51, %v221_v42  ;;  %v222_v58 = vshrl.u32 %v3472_v43, %v221_v42 }
 0x141   :  { %v233_v59 = vshrl.u32 %v3476_v53, %v221_v42  ;;  %v236_v61 = vshrl.u32 %v3477_v60, %v221_v42  ;;  %vm321_vm4 = vcmp.gt.s32.totalorder %v320_v46, 0  ;;  %vm241_vm5 = vcmp.lt.s32.totalorder %v219_v39, 4 }
 0x142   :  { %v225_v62 = vor.u32 %v224_v55, %v223_v44  ;;  %v228_v63 = vor.u32 %v227_v56, %v226_v48  ;;  %v231_v1 = vor.u32 %v230_v57, %v229_v50  ;;  %v322_v4 = vsel %vm321_vm4, %v320_v46, 0 }
 0x143   :  { %v234_v2 = vor.u32 %v233_v59, %v232_v52  ;;  %v237_v3 = vor.u32 %v236_v61, %v235_v54  ;;  %vm239_vm6 = vcmp.lt.s32.totalorder %v219_v39, 2  ;;  %v324_v16 = vand.u32 31, %v322_v4 }
 0x144   :  { %v242_v6 = vsel %vm238_vm2, %v222_v58, %v225_v62  ;;  %v243_v7 = vsel %vm241_vm5, %v231_v1, 2102212464  ;;  %v246_v8 = vsel %vm238_vm2, %v225_v62, %v228_v63  ;;  %v250_v9 = vsel %vm238_vm2, %v228_v63, %v231_v1 }
 0x145   :  { %v244_v10 = vsel %vm240_vm3, %v228_v63, %v243_v7  ;;  %v247_v11 = vsel %vm241_vm5, %v234_v2, 920167782  ;;  %v251_v12 = vsel %vm241_vm5, %v237_v3, 1326507024  ;;  %v323_v28 = vshrl.u32 %v322_v4, 5 }
 0x146   :  { %v248_v14 = vsel %vm240_vm3, %v231_v1, %v247_v11  ;;  %v252_v15 = vsel %vm240_vm3, %v234_v2, %v251_v12  ;;  %v245_v17 = vsel %vm239_vm6, %v242_v6, %v244_v10  ;;  %v325_v29 = vsub.s32 32, %v324_v16 }
 0x147   :  { %v249_v18 = vsel %vm239_vm6, %v246_v8, %v248_v14  ;;  %v253_v19 = vsel %vm239_vm6, %v250_v9, %v252_v15  ;;  %v261_v32 = vmul.u32 %v3742_v41, %v245_v17  ;;  %v327_v33 = vshll.u32 %v3472_v43, %v324_v16 }
 0x148   :  { %v3755_v20 = vmul.u32.u64.low %v3742_v41, %v253_v19  ;;  %v3756_v22 = vmul.u32.u64.high %v3742_v41, %v253_v19, %v3755_v20  ;;  %v3759_v26 = vmul.u32.u64.low %v3742_v41, %v249_v18  ;;  %v3760_v27 = vmul.u32.u64.high %v3742_v41, %v249_v18, %v3759_v26 }
 0x149   :  { %v330_v34 = vshll.u32 %v3473_v47, %v324_v16  ;;  %v333_v35 = vshll.u32 %v3474_v49, %v324_v16  ;;  %v328_v37 = vshrl.u32 %v3473_v47, %v325_v29  ;;  %v331_v38 = vshrl.u32 %v3474_v49, %v325_v29 }
 0x14a   :  { %v334_v39 = vshrl.u32 %v3475_v51, %v325_v29  ;;  %v336_v40 = vshll.u32 %v3475_v51, %v324_v16  ;;  %vm263_vm7 = vc.u32 %v3756_v22, %v3759_v26  ;;  %v264_v42 = vadd.s32 1, %v3760_v27 }
 0x14b   :  { %v337_v44 = vshrl.u32 %v3476_v53, %v325_v29  ;;  %v339_v45 = vshll.u32 %v3476_v53, %v324_v16  ;;  %v329_v46 = vor.u32 %v328_v37, %v327_v33  ;;  %v332_v48 = vor.u32 %v331_v38, %v330_v34 }
 0x14c   :  { %v335_v50 = vor.u32 %v334_v39, %v333_v35  ;;  %v340_v52 = vshrl.u32 %v3477_v60, %v325_v29  ;;  %v265_v41 = vsel %vm263_vm7, %v264_v42, %v3760_v27  ;;  %vm342_vm8 = vcmp.lt.s32.totalorder %v323_v28, 1 }
 0x14d   :  { %v338_v54 = vor.u32 %v337_v44, %v336_v40  ;;  %vm345_vm9 = vcmp.lt.s32.totalorder %v323_v28, 4  ;;  %v266_v47 = vadd.s32 %v265_v41, %v261_v32  ;;  %vm344_vm10 = vcmp.lt.s32.totalorder %v323_v28, 3 }
 0x14e   :  { %v341_v49 = vor.u32 %v340_v52, %v339_v45  ;;  %v347_v51 = vsel %vm345_vm9, %v335_v50, 2102212464  ;;  %v326_v55 = vshrl.u32 %v3472_v43, %v325_v29  ;;  %v350_v56 = vsel %vm342_vm8, %v329_v46, %v332_v48 }
 0x14f   :  { %v351_v57 = vsel %vm345_vm9, %v338_v54, 920167782  ;;  %v354_v58 = vsel %vm342_vm8, %v332_v48, %v335_v50  ;;  %v267_v59 = vadd.s32 536870912, %v266_v47  ;;  %vm343_vm11 = vcmp.lt.s32.totalorder %v323_v28, 2 }
 0x150   :  { %v352_v53 = vsel %vm344_vm10, %v335_v50, %v351_v57  ;;  %v355_v61 = vsel %vm345_vm9, %v341_v49, 1326507024  ;;  %v346_v62 = vsel %vm342_vm8, %v326_v55, %v329_v46  ;;  %v348_v60 = vsel %vm344_vm10, %v332_v48, %v347_v51  ;;  %v3016_v57 = vld [vmem:[#allocation14 + $0x24] ss:$8 sps:$4 sm:$0xff]  }
 0x151   :  { %v353_v63 = vsel %vm343_vm11, %v350_v56, %v352_v53  ;;  %v356_v1 = vsel %vm344_vm10, %v338_v54, %v355_v61  ;;  %v3770_v2 = vshrl.u32 %v267_v59, 30  ;;  %v349_v9 = vsel %vm343_vm11, %v346_v62, %v348_v60 }
 0x152   :  { %v357_v3 = vsel %vm343_vm11, %v354_v58, %v356_v1  ;;  %v3772_v4 = vmul.u32.u64.low %v358_v31, %v353_v63  ;;  %v3773_v6 = vmul.u32.u64.high %v358_v31, %v353_v63, %v3772_v4  ;;  %v365_v12 = vmul.u32 %v358_v31, %v349_v9 }
 0x153   :  { %v3775_v7 = vmul.u32.u64.low %v358_v31, %v357_v3  ;;  %v3776_v8 = vmul.u32.u64.high %v358_v31, %v357_v3, %v3775_v7  ;;  %v269_v43 = vshll.u32 %v3770_v2, 30  ;;  %v262_v32 = vadd.s32 %v3759_v26, %v3756_v22 }
 0x154   :  { %v368_v11 = vadd.s32 1, %v3773_v6  ;;  %v292_v62 = vsub.s32 4, %v3770_v2  ;;  %vm312_vm2 = vcmp.lt.s32.totalorder %v3738_v30, 0  ;;  %vm311_vm3 = vcmp.le.f32.partialorder %v310_v36, 0.7853982 }
 0x155   :  { %v270_v10 = vsub.s32 %v266_v47, %v269_v43  ;;  %vm367_vm12 = vc.u32 %v3776_v8, %v3772_v4  ;;  %v366_v54 = vadd.s32 %v3772_v4, %v3776_v8 }
 0x156   :  { %v369_v14 = vsel %vm367_vm12, %v368_v11, %v3773_v6  ;;  %v293_v25 = vsel %vm208_vm15, %v292_v62, %v3770_v2  ;;  %v3020_v62 = vld [vmem:[#allocation14 + $0x40] ss:$8 sps:$4 sm:$0xff]  }
 0x157   :  { %v272_v13 = vsub.s32 0, %v270_v10  ;;  %v370_v15 = vadd.s32 %v369_v14, %v365_v12  ;;  %v295_v7 = vsel %vm3790_vm1, 0, %v293_v25  ;;  %v2617_v25 = vld [vmem:[#allocation3] ss:$0 sm:$0xff] }
 0x158   :  { %v299_v9 = vadd.s32 3, %v295_v7  ;;  %v615_v14 = vand.u32 3, %v295_v7 }
 0x159   :  { %v2619_v16 = vmin.u32 %v272_v13, %v270_v10  ;;  %v371_v17 = vadd.s32 536870912, %v370_v15 }
 0x15a   :  { %v300_v13 = vand.u32 3, %v299_v9  ;;  %vm617_vm6 = vcmp.eq.s32.totalorder %v615_v14, 0  ;;  %vm620_vm7 = vcmp.eq.s32.totalorder %v615_v14, 2  ;;  %vm616_vm9 = vcmp.lt.s32.totalorder %v615_v14, 2 }
 0x15b   :  { %v274_v18 = vclz %v2619_v16  ;;  %v372_v19 = vshrl.u32 %v371_v17, 30 }
 0x15c   :  { %vm302_vm4 = vcmp.eq.s32.totalorder %v300_v13, 0  ;;  %vm305_vm5 = vcmp.eq.s32.totalorder %v300_v13, 2  ;;  %vm301_vm8 = vcmp.lt.s32.totalorder %v300_v13, 2 }
 0x15d   :  { %v2620_v20 = vadd.s32 4294967294, %v274_v18  ;;  %v373_v27 = vshll.u32 %v372_v19, 30  ;;  %v396_v3 = vsub.s32 4, %v372_v19 }
 0x15f   :  { %vm2621_vm13 = vcmp.lt.s32.totalorder %v2620_v20, 0  ;;  %v374_v29 = vsub.s32 %v370_v15, %v373_v27  ;;  %v397_v8 = vsel %vm312_vm2, %v396_v3, %v372_v19  ;;  %v3026_v3 = vld [vmem:[#allocation14 + $0x60] ss:$8 sps:$4 sm:$0xff]  }
 0x160   :  { %v277_v28 = vsel %vm2621_vm13, 0, %v2620_v20 }
 0x161   :  { %v278_v33 = vsub.s32 32, %v277_v28  ;;  %v282_v31 = vsub.s32 4294967266, %v277_v28  ;;  %v376_v34 = vsub.s32 0, %v374_v29  ;;  %v279_v35 = vshll.u32 %v270_v10, %v277_v28 }
 0x162   :  { %v399_v10 = vsel %vm311_vm3, 0, %v397_v8  ;;  %v205_v8 = vmul.f32 %v2617_v25, %v3731_v24 }
 0x163   :  { %v280_v37 = vshrl.u32 %v262_v32, %v278_v33  ;;  %v283_v38 = vadd.s32 127, %v282_v31  ;;  %v2623_v39 = vmin.u32 %v376_v34, %v374_v29  ;;  %v403_v2 = vadd.s32 3, %v399_v10 }
 0x164   :  { %v718_v17 = vand.u32 3, %v399_v10 }
 0x165   :  { %v281_v40 = vor.u32 %v280_v37, %v279_v35  ;;  %v284_v42 = vshll.u32 %v283_v38, 23  ;;  %v378_v44 = vclz %v2623_v39  ;;  %v404_v36 = vand.u32 3, %v403_v2 }
 0x166   :  { %vm720_vm10 = vcmp.eq.s32.totalorder %v718_v17, 0  ;;  %vm723_vm13 = vcmp.eq.s32.totalorder %v718_v17, 2 }
 0x167   :  { %v285_v45 = vor.u32 4788187, %v284_v42  ;;  %v2624_v46 = vadd.s32 4294967294, %v378_v44  ;;  %v288_v50 = vcvt.s32.f32 %v281_v40  ;;  %vm406_vm11 = vcmp.eq.s32.totalorder %v404_v36, 0 }
 0x168   :  { %vm409_vm12 = vcmp.eq.s32.totalorder %v404_v36, 2 }
 0x169   :  { %v286_v48 = vand.u32 2147483647, %v285_v45  ;;  %vm2625_vm14 = vcmp.lt.s32.totalorder %v2624_v46, 0 }
 0x16a   :  { %v381_v41 = vsel %vm2625_vm14, 0, %v2624_v46  ;;  %vm405_vm14 = vcmp.lt.s32.totalorder %v404_v36, 2 }
 0x16b   :  { %v289_v52 = vmul.f32 %v288_v50, %v286_v48  ;;  %v382_v22 = vsub.s32 32, %v381_v41  ;;  %v386_v26 = vsub.s32 4294967266, %v381_v41  ;;  %v383_v49 = vshll.u32 %v374_v29, %v381_v41  ;;  %v2992_v41 = vld [vmem:[#allocation9] sm:$0xff]  }
 0x16d   :  { %v290_v47 = vxor.u32 2147483648, %v289_v52  ;;  %v384_v51 = vshrl.u32 %v366_v54, %v382_v22  ;;  %v387_v55 = vadd.s32 127, %v386_v26  ;;  %v2995_v54 = vld [vmem:[#allocation9 + $0x18] sm:$0xff]   ;;  %v2996_v22 = vld [vmem:[#allocation9 + $0x20] sm:$0xff]   ;;  %v2998_v26 = vld [vmem:[#allocation9 + $0x30] sm:$0xff]  }
 0x16f   :  { %v291_v56 = vsel %vm208_vm15, %v290_v47, %v289_v52  ;;  %v385_v58 = vor.u32 %v384_v51, %v383_v49  ;;  %v388_v59 = vshll.u32 %v387_v55, 23  ;;  %vm719_vm15 = vcmp.lt.s32.totalorder %v718_v17, 2  ;;  %v2999_v47 = vld [vmem:[#allocation9 + $0x38] sm:$0xff]   ;;  %v3008_v49 = vld [vmem:[#allocation14] ss:$8 sps:$4 sm:$0xff]  }
 0x170   :  { %v294_v53 = vsel %vm3790_vm1, %v3729_v23, %v291_v56  ;;  %vm298_vm1 = vweird.f32 %v3729_v23  ;;  %v2993_v23 = vld [vmem:[#allocation9 + $0x8] sm:$0xff]   ;;  %v3013_v55 = vld [vmem:[#allocation14 + $0x14] ss:$8 sps:$4 sm:$0xff]   ;;  %v3011_v56 = vld [vmem:[#allocation14 + $0x10] ss:$8 sps:$4 sm:$0xff]  }
 0x171   :  { %v389_v61 = vor.u32 4788187, %v388_v59  ;;  %3192 = vcosq.f32 %v294_v53  ;;  %v392_v63 = vcvt.s32.f32 %v385_v58  ;;  %v3010_v51 = vld [vmem:[#allocation14 + $0x4] ss:$8 sps:$4 sm:$0xff]   ;;  %v3014_v58 = vld [vmem:[#allocation14 + $0x20] ss:$8 sps:$4 sm:$0xff]  }
 0x172   :  { %3194 = vsinq.f32 %v294_v53  ;;  %1197 = vmatprep.subr.bf16.mxu1 %v3010_v51  ;;  %v3019_v59 = vld [vmem:[#allocation14 + $0x34] ss:$8 sps:$4 sm:$0xff]   ;;  %v3017_v53 = vld [vmem:[#allocation14 + $0x30] ss:$8 sps:$4 sm:$0xff]  }
 0x173   :  { %v390_v60 = vand.u32 2147483647, %v389_v61  ;;  %v3022_v61 = vld [vmem:[#allocation14 + $0x44] ss:$8 sps:$4 sm:$0xff]  }
 0x175   :  { %v393_v1 = vmul.f32 %v392_v63, %v390_v60  ;;  %v3025_v60 = vld [vmem:[#allocation14 + $0x54] ss:$8 sps:$4 sm:$0xff]   ;;  %v3023_v63 = vld [vmem:[#allocation14 + $0x50] ss:$8 sps:$4 sm:$0xff]  }
 0x177   :  { %v394_v4 = vxor.u32 2147483648, %v393_v1 }
 0x179   :  { %v395_v6 = vsel %vm312_vm2, %v394_v4, %v393_v1  ;;  %vm402_vm2 = vweird.f32 %v3738_v30  ;;  %v3028_v1 = vld [vmem:[#allocation14 + $0x64] ss:$8 sps:$4 sm:$0xff]   ;;  %v204_v4 = vmul.f32 %v2617_v25, %v3726_v21 }
 0x17a   :  { %v398_v43 = vsel %vm311_vm3, %v3738_v30, %v395_v6  ;;  %v2994_v30 = vld [vmem:[#allocation9 + $0x10] sm:$0xff]  }
 0x17b   :  { %3196 = vcosq.f32 %v398_v43  ;;  %v3193_v11 = vpop.eup %3192 }
 0x17c   :  { %3198 = vsinq.f32 %v398_v43  ;;  %v3195_v12 = vpop.eup %3194  ;;  %v306_v16 = vxor.u32 2147483648, %v3193_v11 }
 0x17d   :  { %v303_v15 = vxor.u32 2147483648, %v3195_v12 }
 0x17e   :  { %v307_v20 = vsel %vm305_vm5, %v306_v16, %v3195_v12  ;;  %v622_v28 = vsel %vm620_vm7, %v306_v16, %v3195_v12 }
 0x17f   :  { %v304_v19 = vsel %vm302_vm4, %v3193_v11, %v303_v15  ;;  %v619_v27 = vsel %vm617_vm6, %v3193_v11, %v303_v15  ;;  %v2650_v11 = vld [vmem:[#allocation8] ss:$0 sm:$0xff] }
 0x180   :  { %v308_v31 = vsel %vm301_vm8, %v304_v19, %v307_v20  ;;  %v623_v35 = vsel %vm616_vm9, %v619_v27, %v622_v28 }
 0x181   :  { %v309_v44 = vsel %vm298_vm1, nan, %v308_v31  ;;  %v624_v46 = vsel %vm298_vm1, nan, %v623_v35 }
 0x185   :  { %v3197_v18 = vpop.eup %3196 }
 0x186   :  { %v3199_v29 = vpop.eup %3198  ;;  %v410_v32 = vxor.u32 2147483648, %v3197_v18 }
 0x187   :  { %v407_v33 = vxor.u32 2147483648, %v3199_v29 }
 0x188   :  { %v411_v34 = vsel %vm409_vm12, %v410_v32, %v3199_v29  ;;  %v725_v37 = vsel %vm723_vm13, %v410_v32, %v3199_v29 }
 0x189   :  { %v408_v38 = vsel %vm406_vm11, %v3197_v18, %v407_v33  ;;  %v722_v39 = vsel %vm720_vm10, %v3197_v18, %v407_v33 }
 0x18a   :  { %v412_v40 = vsel %vm405_vm14, %v408_v38, %v411_v34  ;;  %v726_v42 = vsel %vm719_vm15, %v722_v39, %v725_v37  ;;  %v3000_v37 = vld [vmem:[#allocation12] sm:$0xff]   ;;  %v3001_v39 = vld [vmem:[#allocation12 + $0x8] sm:$0xff]  }
 0x18b   :  { %v413_v45 = vsel %vm402_vm2, nan, %v412_v40  ;;  %v727_v48 = vsel %vm402_vm2, nan, %v726_v42  ;;  %v3002_v40 = vld [vmem:[#allocation12 + $0x10] sm:$0xff]   ;;  %v3003_v42 = vld [vmem:[#allocation12 + $0x18] sm:$0xff]  }
 0x18c   :  { %v414_v50 = vpack.c.bf16 %v413_v45, %v309_v44  ;;  %v728_v52 = vpack.c.bf16 %v727_v48, %v624_v46  ;;  %v3004_v44 = vld [vmem:[#allocation12 + $0x20] sm:$0xff]   ;;  %v3005_v45 = vld [vmem:[#allocation12 + $0x28] sm:$0xff]   ;;  %v3006_v46 = vld [vmem:[#allocation12 + $0x30] sm:$0xff]  }
 0x18d   :  { %v3007_v48 = vld [vmem:[#allocation12 + $0x38] sm:$0xff]  }
 0x18e   :  { %2873 = vmatmul.mubr.bf16.vlgmr.msra.gmra.mrb[0].mxu0 %v414_v50  ;;  %2893 = vmatmul.mubr.bf16.vlgmr.msra.gmra.mrb[0].mxu1 %v728_v52  ;;  %v971_v50 = vld [vmem:[%s4106_s30] sm:$0xff]  ;;  %v972_v52 = vld [vmem:[%s4106_s30 + $0x8] sm:$0xff] }
 0x18f   :  { %2912 = vmatprep.mubr.msk.bf16.mxu0 %vm3471_vm0, %v3470_v5  ;;  %1229 = vmatprep.mubr.bf16.mxu1 %v3469_v0  ;;  %v2997_v0 = vld [vmem:[#allocation9 + $0x28] sm:$0xff]  }
 0x190   :  { %2897 = vmatpush3.bf16.msra.mxu0 %v2992_v41  ;;  %1198 = vmatpush1.bf16.msra.mxu1 %v3008_v49  ;;  %v973_v41 = vpack.c.bf16 %v972_v52, %v971_v50  ;;  %v3061_v50 = vld [vmem:[#allocation15 + $0x94] ss:$8 sps:$4 sm:$0xff]   ;;  %v3059_v52 = vld [vmem:[#allocation15 + $0x90] ss:$8 sps:$4 sm:$0xff]  }
 0x191   :  { %2898 = vmatprep.subr.bf16.mxu0 %v3470_v5  ;;  %1199 = vmatprep.subr.bf16.mxu1 %v3013_v55 }
 0x194   :  { %2899 = vmatpush3.bf16.msra.mxu0 %v2993_v23  ;;  %1200 = vmatpush1.bf16.msra.mxu1 %v3011_v56  ;;  %v3031_v23 = vld [vmem:[#allocation14 + $0x74] ss:$8 sps:$4 sm:$0xff]  }
 0x195   :  { %2900 = vmatprep.subr.bf16.mxu0 %v3470_v5  ;;  %1201 = vmatprep.subr.bf16.mxu1 %v3016_v57  ;;  %v1107_v57 = vlaneseq }
 0x198   :  { %2901 = vmatpush3.bf16.msra.mxu0 %v2994_v30  ;;  %1202 = vmatpush1.bf16.msra.mxu1 %v3014_v58  ;;  %v3029_v30 = vld [vmem:[#allocation14 + $0x70] ss:$8 sps:$4 sm:$0xff]   ;;  %v3840_v58 = vshrl.u32 %v1107_v57, 7 }
 0x199   :  { %2902 = vmatprep.subr.bf16.mxu0 %v3470_v5  ;;  %1203 = vmatprep.subr.bf16.mxu1 %v3019_v59 }
 0x19a   :  { %v3843_v59 = vsub.s32 0, %v3840_v58 }
 0x19c   :  { %2903 = vmatpush3.bf16.msra.mxu0 %v2995_v54  ;;  %1204 = vmatpush1.bf16.msra.mxu1 %v3017_v53  ;;  %v2651_v54 = vld [vmem:[#allocation11] ss:$0 sm:$0xff]  ;;  %v1105_v53 = vld [vmem:[%s4090_s11] sm:$0x3] }
 0x19d   :  { %2904 = vmatprep.subr.bf16.mxu0 %v3470_v5  ;;  %1205 = vmatprep.subr.bf16.mxu1 %v3022_v61  ;;  %v3849_v61 = vsub.s32 1, %v3840_v58 }
 0x1a0   :  { %2905 = vmatpush3.bf16.msra.mxu0 %v2996_v22  ;;  %1206 = vmatpush1.bf16.msra.mxu1 %v3020_v62  ;;  %v2660_v22 = vld [vmem:[%s4088_s9] ss:$0 sm:$0xff]  ;;  %v1110_v62 = vrot.slane %v1105_v53, %v3843_v59 }
 0x1a1   :  { %2906 = vmatprep.subr.bf16.mxu0 %v3470_v5  ;;  %1207 = vmatprep.subr.bf16.mxu1 %v3025_v60  ;;  %v1114_v60 = vrot.slane %v1105_v53, %v3849_v61 }
 0x1a4   :  { %2907 = vmatpush3.bf16.msra.mxu0 %v2997_v0  ;;  %1208 = vmatpush1.bf16.msra.mxu1 %v3023_v63  ;;  %v2936_v0 = vadd.f32 %v2660_v22, %v2651_v54  ;;  %v3065_v54 = vld [vmem:[#allocation15 + $0xb0] ss:$8 sps:$4 sm:$0xff]   ;;  %v3070_v22 = vld [vmem:[#allocation15 + $0xc4] ss:$8 sps:$4 sm:$0xff]  }
 0x1a5   :  { %2908 = vmatprep.subr.bf16.mxu0 %v3470_v5  ;;  %1209 = vmatprep.subr.bf16.mxu1 %v3028_v1 }
 0x1a8   :  { %2909 = vmatpush3.bf16.msra.mxu0 %v2998_v26  ;;  %1210 = vmatpush1.bf16.msra.mxu1 %v3026_v3 }
 0x1a9   :  { %2910 = vmatprep.subr.bf16.mxu0 %v3470_v5  ;;  %1211 = vmatprep.subr.bf16.mxu1 %v3031_v23  ;;  %v3062_v23 = vld [vmem:[#allocation15 + $0xa0] ss:$8 sps:$4 sm:$0xff]  }
 0x1ac   :  { %2911 = vmatpush3.bf16.msra.mxu0 %v2999_v47  ;;  %1212 = vmatpush1.bf16.msra.mxu1 %v3029_v30  ;;  %v3067_v30 = vld [vmem:[#allocation15 + $0xb4] ss:$8 sps:$4 sm:$0xff]  }
 0x1ad   :  { %2916 = vmatprep.subr.bf16.mxu0 %v3470_v5 }
 0x261   :  { %v513_v6 = vpop.f32.mrb[0].mxu0  ;;  %v828_v7 = vpop.f32.mrb[0].mxu1 }
 0x262   :  { %v520_v43 = vadd.f32 %v513_v6, %v204_v4  ;;  %v2874_v9 = vpop.f32.mrb[1].mxu0  ;;  %v2894_v10 = vpop.f32.mrb[1].mxu1 }
 0x263   :  { %v516_v12 = vpop.f32.mrb[2].mxu0  ;;  %v831_v2 = vpop.f32.mrb[2].mxu1  ;;  %v3032_v10 = vld [vmem:[#allocation15] ss:$8 sps:$4 sm:$0xff]  }
 0x264   :  { %v835_v13 = vadd.f32 %v828_v7, %v520_v43  ;;  %v521_v14 = vadd.f32 %v516_v12, %v205_v8  ;;  %v2875_v15 = vpop.f32.mrb[3].mxu0  ;;  %v2895_v16 = vpop.f32.mrb[3].mxu1  ;;  %v3037_v12 = vld [vmem:[#allocation15 + $0x14] ss:$8 sps:$4 sm:$0xff]  }
 0x265   :  { %v3043_v15 = vld [vmem:[#allocation15 + $0x34] ss:$8 sps:$4 sm:$0xff]   ;;  %v3041_v16 = vld [vmem:[#allocation15 + $0x30] ss:$8 sps:$4 sm:$0xff]  }
 0x266   :  { %v844_v17 = vadd.f32 %v2650_v11, %v835_v13  ;;  %v836_v36 = vadd.f32 %v831_v2, %v521_v14  ;;  %v3035_v2 = vld [vmem:[#allocation15 + $0x10] ss:$8 sps:$4 sm:$0xff]   ;;  %v3040_v13 = vld [vmem:[#allocation15 + $0x24] ss:$8 sps:$4 sm:$0xff]   ;;  %v3038_v14 = vld [vmem:[#allocation15 + $0x20] ss:$8 sps:$4 sm:$0xff]  }
 0x268   :  { %v846_v18 = vsub.f32 0.0, %v844_v17  ;;  %v845_v19 = vadd.f32 %v2650_v11, %v836_v36  ;;  %v3034_v11 = vld [vmem:[#allocation15 + $0x4] ss:$8 sps:$4 sm:$0xff]   ;;  %v3044_v36 = vld [vmem:[#allocation15 + $0x40] ss:$8 sps:$4 sm:$0xff]  }
 0x269   :  { %1532 = vmatprep.subr.bf16.mxu1 %v3034_v11 }
 0x26a   :  { %v848_v20 = vmul.f32 1.442695, %v846_v18  ;;  %v847_v21 = vsub.f32 0.0, %v845_v19  ;;  %v3049_v18 = vld [vmem:[#allocation15 + $0x54] ss:$8 sps:$4 sm:$0xff]  }
 0x26c   :  { %3200 = vpow2.f32 %v848_v20  ;;  %v850_v27 = vmul.f32 1.442695, %v847_v21  ;;  %v3052_v20 = vld [vmem:[#allocation15 + $0x64] ss:$8 sps:$4 sm:$0xff]   ;;  %v3050_v21 = vld [vmem:[#allocation15 + $0x60] ss:$8 sps:$4 sm:$0xff]  }
 0x26e   :  { %3202 = vpow2.f32 %v850_v27  ;;  %v3055_v27 = vld [vmem:[#allocation15 + $0x74] ss:$8 sps:$4 sm:$0xff]  }
 0x276   :  { %v3201_v24 = vpop.eup %3200 }
 0x277   :  { %v852_v28 = vadd.f32 1.0, %v3201_v24  ;;  %v3053_v24 = vld [vmem:[#allocation15 + $0x70] ss:$8 sps:$4 sm:$0xff]  }
 0x278   :  { %v3203_v29 = vpop.eup %3202 }
 0x279   :  { %3204 = vrcp.f32 %v852_v28  ;;  %v853_v32 = vadd.f32 1.0, %v3203_v29 }
 0x27b   :  { %3206 = vrcp.f32 %v853_v32 }
 0x283   :  { %v3205_v33 = vpop.eup %3204 }
 0x284   :  { %v856_v34 = vmul.f32 %v3205_v33, %v844_v17  ;;  %v3046_v17 = vld [vmem:[#allocation15 + $0x44] ss:$8 sps:$4 sm:$0xff]  }
 0x285   :  { %v3207_v31 = vpop.eup %3206 }
 0x286   :  { %v857_v35 = vmul.f32 %v3207_v31, %v845_v19  ;;  %v3047_v19 = vld [vmem:[#allocation15 + $0x50] ss:$8 sps:$4 sm:$0xff]  }
 0x288   :  { %v858_v38 = vpack.c.bf16 %v857_v35, %v856_v34 }
 0x28a   :  { %2913 = vmatmul.mubr.bf16.vlgmr.msra.gmra.mrb[4].mxu0 %v858_v38 }
 0x28b   :  { %2917 = vmatpush3.bf16.msra.mxu0 %v3000_v37  ;;  %2932 = vmatprep.mubr.msk.bf16.mxu0 %vm3471_vm0, %v3470_v5 }
 0x28c   :  { %2918 = vmatprep.subr.bf16.mxu0 %v3470_v5 }
 0x28f   :  { %2919 = vmatpush3.bf16.msra.mxu0 %v3001_v39 }
 0x290   :  { %2920 = vmatprep.subr.bf16.mxu0 %v3470_v5 }
 0x293   :  { %2921 = vmatpush3.bf16.msra.mxu0 %v3002_v40 }
 0x294   :  { %2922 = vmatprep.subr.bf16.mxu0 %v3470_v5 }
 0x297   :  { %2923 = vmatpush3.bf16.msra.mxu0 %v3003_v42 }
 0x298   :  { %2924 = vmatprep.subr.bf16.mxu0 %v3470_v5 }
 0x29b   :  { %2925 = vmatpush3.bf16.msra.mxu0 %v3004_v44 }
 0x29c   :  { %2926 = vmatprep.subr.bf16.mxu0 %v3470_v5 }
 0x29f   :  { %2927 = vmatpush3.bf16.msra.mxu0 %v3005_v45 }
 0x2a0   :  { %2928 = vmatprep.subr.bf16.mxu0 %v3470_v5 }
 0x2a3   :  { %2929 = vmatpush3.bf16.msra.mxu0 %v3006_v46  ;;  %v3058_v46 = vld [vmem:[#allocation15 + $0x84] ss:$8 sps:$4 sm:$0xff]  }
 0x2a4   :  { %2930 = vmatprep.subr.bf16.mxu0 %v3470_v5 }
 0x2a7   :  { %2931 = vmatpush3.bf16.msra.mxu0 %v3007_v48  ;;  %v3056_v48 = vld [vmem:[#allocation15 + $0x80] ss:$8 sps:$4 sm:$0xff]  }
 0x2aa   :  { %2933 = vmatmul.mubr.bf16.vlgmr.msra.gmra.mrb[4].mxu0 %v973_v41  ;;  %v3064_v41 = vld [vmem:[#allocation15 + $0xa4] ss:$8 sps:$4 sm:$0xff]  }
 0x37d   :  { %v1079_v26 = vpop.f32.mrb[4].mxu0 }
 0x37e   :  { %v2934_v47 = vpop.f32.mrb[5].mxu0  ;;  %v2937_v51 = vadd.f32 %v2936_v0, %v1079_v26  ;;  %v3073_v26 = vld [vmem:[#allocation15 + $0xd4] ss:$8 sps:$4 sm:$0xff]  }
 0x37f   :  { %v1082_v49 = vpop.f32.mrb[6].mxu0  ;;  %v3071_v47 = vld [vmem:[#allocation15 + $0xd0] ss:$8 sps:$4 sm:$0xff]  }
 0x380   :  { %v2939_v55 = vadd.f32 %v2936_v0, %v1082_v49  ;;  %v2935_v56 = vpop.f32.mrb[7].mxu0  ;;  %v3068_v0 = vld [vmem:[#allocation15 + $0xc0] ss:$8 sps:$4 sm:$0xff]   ;;  %v3076_v49 = vld [vmem:[#allocation15 + $0xe4] ss:$8 sps:$4 sm:$0xff]  }
 0x381   :  { %v3077_v56 = vld [vmem:[#allocation15 + $0xf0] ss:$8 sps:$4 sm:$0xff]  }
 0x382   :  { %v1088_v5 = vpack.c.bf16 %v2939_v55, %v2937_v51  ;;  %v3074_v51 = vld [vmem:[#allocation15 + $0xe0] ss:$8 sps:$4 sm:$0xff]   ;;  %v3079_v55 = vld [vmem:[#allocation15 + $0xf4] ss:$8 sps:$4 sm:$0xff]  }
 0x384   :  { %1230 = vmatmul.mubr.bf16.vlgmr.msra.gmra.mrb[4].mxu1 %v1088_v5 }
 0x385   :  { %1533 = vmatpush1.bf16.msra.mxu1 %v3032_v10  ;;  %v3886_v10 = vsub.s32 4, %v3840_v58 }
 0x386   :  { %1534 = vmatprep.subr.bf16.mxu1 %v3037_v12  ;;  %v1244_v12 = vld [vmem:[%s4092_s13] sm:$0x77] }
 0x389   :  { %1535 = vmatpush1.bf16.msra.mxu1 %v3035_v2  ;;  %v1297_v2 = vrot.slane %v1244_v12, %v3886_v10 }
 0x38a   :  { %1536 = vmatprep.subr.bf16.mxu1 %v3040_v13  ;;  %v3893_v13 = vsub.s32 5, %v3840_v58 }
 0x38d   :  { %1537 = vmatpush1.bf16.msra.mxu1 %v3038_v14  ;;  %v1293_v14 = vrot.slane %v1244_v12, %v3843_v59 }
 0x38e   :  { %1538 = vmatprep.subr.bf16.mxu1 %v3043_v15  ;;  %v1307_v15 = vrot.slane %v1297_v2, %v3843_v59  ;;  %v3095_v2 = vld [vmem:[#allocation15 + $0x150] ss:$8 sps:$4 sm:$0xff]  }
 0x391   :  { %1539 = vmatpush1.bf16.msra.mxu1 %v3041_v16  ;;  %v1319_v16 = vrot.slane %v1244_v12, %v3893_v13 }
 0x392   :  { %1540 = vmatprep.subr.bf16.mxu1 %v3046_v17  ;;  %v1303_v17 = vrot.slane %v1293_v14, %v3843_v59  ;;  %v3100_v14 = vld [vmem:[#allocation15 + $0x164] ss:$8 sps:$4 sm:$0xff]  }
 0x395   :  { %1541 = vmatpush1.bf16.msra.mxu1 %v3044_v36  ;;  %v1315_v36 = vrot.slane %v1244_v12, %v3849_v61 }
 0x396   :  { %1542 = vmatprep.subr.bf16.mxu1 %v3049_v18 }
 0x399   :  { %1543 = vmatpush1.bf16.msra.mxu1 %v3047_v19 }
 0x39a   :  { %1544 = vmatprep.subr.bf16.mxu1 %v3052_v20 }
 0x39d   :  { %1545 = vmatpush1.bf16.msra.mxu1 %v3050_v21 }
 0x39e   :  { %1546 = vmatprep.subr.bf16.mxu1 %v3055_v27  ;;  %v1329_v27 = vrot.slane %v1319_v16, %v3849_v61  ;;  %v3103_v16 = vld [vmem:[#allocation15 + $0x174] ss:$8 sps:$4 sm:$0xff]  }
 0x3a1   :  { %1547 = vmatpush1.bf16.msra.mxu1 %v3053_v24 }
 0x3a2   :  { %1548 = vmatprep.subr.bf16.mxu1 %v3058_v46 }
 0x3a5   :  { %1549 = vmatpush1.bf16.msra.mxu1 %v3056_v48 }
 0x3a6   :  { %1550 = vmatprep.subr.bf16.mxu1 %v3061_v50 }
 0x3a9   :  { %1551 = vmatpush1.bf16.msra.mxu1 %v3059_v52 }
 0x3aa   :  { %1552 = vmatprep.subr.bf16.mxu1 %v3064_v41  ;;  %v3907_v41 = vsub.s32 2, %v3840_v58 }
 0x3ad   :  { %1553 = vmatpush1.bf16.msra.mxu1 %v3062_v23 }
 0x3ae   :  { %1554 = vmatprep.subr.bf16.mxu1 %v3067_v30 }
 0x3b1   :  { %1555 = vmatpush1.bf16.msra.mxu1 %v3065_v54 }
 0x3b2   :  { %1556 = vmatprep.subr.bf16.mxu1 %v3070_v22 }
 0x3b5   :  { %1557 = vmatpush1.bf16.msra.mxu1 %v3068_v0 }
 0x3b6   :  { %1558 = vmatprep.subr.bf16.mxu1 %v3073_v26 }
 0x3b9   :  { %1559 = vmatpush1.bf16.msra.mxu1 %v3071_v47 }
 0x3ba   :  { %1560 = vmatprep.subr.bf16.mxu1 %v3076_v49 }
 0x3bd   :  { %1561 = vmatpush1.bf16.msra.mxu1 %v3074_v51 }
 0x3be   :  { %1562 = vmatprep.subr.bf16.mxu1 %v3079_v55 }
 0x3c1   :  { %1563 = vmatpush1.bf16.msra.mxu1 %v3077_v56 }
 0x457   :  { %v1231_v63 = vpop.f32.mrb[4].mxu1 }
 0x458   :  { %v3853_v1 = vadd.f32 %v1231_v63, %v1110_v62  ;;  %v1233_v3 = vpop.f32.mrb[5].mxu1 }
 0x459   :  { %v3855_v25 = vadd.f32 %v1233_v3, %v1114_v60  ;;  %v1235_v4 = vpop.f32.mrb[6].mxu1 }
 0x45a   :  { %v1237_v6 = vpop.f32.mrb[7].mxu1  ;;  %v3857_v7 = vadd.f32 %v1235_v4, %v1110_v62 }
 0x45b   :  { %v3859_v8 = vadd.f32 %v1237_v6, %v1114_v60  ;;  %v1251_v43 = vadd.f32 %v3855_v25, %v3853_v1 }
 0x45d   :  { %1252 = vadd.xlane.f32.xlu1 %v1251_v43  ;;  %v1254_v9 = vadd.f32 %v3859_v8, %v3857_v7 }
 0x461   :  { %1255 = vadd.xlane.f32.xlu1 %v1254_v9 }
 0x4ea   :  { %v1253_v28 = vpop.xlane.xlu1 %1252 }
 0x4eb   :  { %v1257_v29 = vmul.f32 0.00390625, %v1253_v28  ;;  %v1325_v28 = vrot.slane %v1315_v36, %v3849_v61 }
 0x4ed   :  { %v3866_v32 = vsub.f32 %v3853_v1, %v1257_v29  ;;  %v3869_v33 = vsub.f32 %v3855_v25, %v1257_v29  ;;  %v1273_v5 = vmul.f32 %v1257_v29, %v1257_v29 }
 0x4ee   :  { %v1256_v31 = vpop.xlane.xlu1 %1255 }
 0x4ef   :  { %v1258_v34 = vmul.f32 0.00390625, %v1256_v31  ;;  %v1263_v35 = vmul.f32 %v3866_v32, %v3866_v32  ;;  %v1264_v37 = vmul.f32 %v3869_v33, %v3869_v33  ;;  %v1275_v57 = vmul.f32 0.0, %v1273_v5 }
 0x4f1   :  { %v3876_v38 = vsub.f32 %v3857_v7, %v1258_v34  ;;  %v3879_v39 = vsub.f32 %v3859_v8, %v1258_v34  ;;  %v1267_v40 = vadd.f32 %v1264_v37, %v1263_v35  ;;  %v1274_v53 = vmul.f32 %v1258_v34, %v1258_v34 }
 0x4f3   :  { %1268 = vadd.xlane.f32.xlu0 %v1267_v40  ;;  %v1265_v42 = vmul.f32 %v3876_v38, %v3876_v38  ;;  %v1266_v44 = vmul.f32 %v3879_v39, %v3879_v39  ;;  %v1276_v3 = vmul.f32 0.0, %v1274_v53 }
 0x4f5   :  { %v1270_v45 = vadd.f32 %v1266_v44, %v1265_v42 }
 0x4f7   :  { %1271 = vadd.xlane.f32.xlu1 %v1270_v45 }
 0x580   :  { %v1269_v62 = vpop.xlane.xlu0 %1268 }
 0x581   :  { %v1277_v60 = vsub.f32 %v1269_v62, %v1275_v57 }
 0x583   :  { %v1279_v63 = vmul.f32 0.00390625, %v1277_v60  ;;  %v3080_v60 = vld [vmem:[#allocation15 + $0x100] ss:$8 sps:$4 sm:$0xff]  }
 0x584   :  { %v1272_v4 = vpop.xlane.xlu1 %1271 }
 0x585   :  { %v1281_v6 = vadd.f32 1e-05, %v1279_v63  ;;  %v1278_v43 = vsub.f32 %v1272_v4, %v1276_v3  ;;  %v3082_v63 = vld [vmem:[#allocation15 + $0x104] ss:$8 sps:$4 sm:$0xff]   ;;  %v3083_v3 = vld [vmem:[#allocation15 + $0x110] ss:$8 sps:$4 sm:$0xff]  }
 0x586   :  { %1891 = vmatprep.subr.bf16.mxu0 %v3082_v63  ;;  %v3086_v4 = vld [vmem:[#allocation15 + $0x120] ss:$8 sps:$4 sm:$0xff]  }
 0x587   :  { %3208 = vrsqrt.f32 %v1281_v6  ;;  %v1280_v9 = vmul.f32 0.00390625, %v1278_v43  ;;  %1892 = vmatpush1.bf16.msra.mxu0 %v3080_v60  ;;  %v3091_v6 = vld [vmem:[#allocation15 + $0x134] ss:$8 sps:$4 sm:$0xff]   ;;  %v3089_v43 = vld [vmem:[#allocation15 + $0x130] ss:$8 sps:$4 sm:$0xff]  }
 0x589   :  { %v1282_v11 = vadd.f32 1e-05, %v1280_v9  ;;  %v3094_v9 = vld [vmem:[#allocation15 + $0x144] ss:$8 sps:$4 sm:$0xff]  }
 0x58b   :  { %3210 = vrsqrt.f32 %v1282_v11  ;;  %v3092_v11 = vld [vmem:[#allocation15 + $0x140] ss:$8 sps:$4 sm:$0xff]  }
 0x591   :  { %v3209_v18 = vpop.eup %3208 }
 0x592   :  { %v1285_v19 = vmul.f32 %v3209_v18, %v3866_v32  ;;  %v1286_v20 = vmul.f32 %v3209_v18, %v3869_v33 }
 0x594   :  { %v1309_v21 = vmul.f32 %v1307_v15, %v1286_v20  ;;  %v1308_v24 = vmul.f32 %v1303_v17, %v1285_v19 }
 0x595   :  { %v3211_v29 = vpop.eup %3210 }
 0x596   :  { %v1287_v31 = vmul.f32 %v3211_v29, %v3876_v38  ;;  %v1288_v34 = vmul.f32 %v3211_v29, %v3879_v39  ;;  %v1331_v37 = vadd.f32 %v1329_v27, %v1309_v21  ;;  %v1330_v42 = vadd.f32 %v1325_v28, %v1308_v24 }
 0x597   :  { %v3910_v38 = vsub.s32 6, %v3840_v58  ;;  %v1582_v39 = vrot.slane %v1244_v12, %v3907_v41 }
 0x598   :  { %v1311_v35 = vmul.f32 %v1307_v15, %v1288_v34  ;;  %v1310_v40 = vmul.f32 %v1303_v17, %v1287_v31  ;;  %v1335_v32 = vmax.f32 %v1331_v37, 0.0  ;;  %v1334_v33 = vmax.f32 %v1330_v42, 0.0  ;;  %v3098_v15 = vld [vmem:[#allocation15 + $0x160] ss:$8 sps:$4 sm:$0xff]   ;;  %v3101_v17 = vld [vmem:[#allocation15 + $0x170] ss:$8 sps:$4 sm:$0xff]  }
 0x599   :  { %v1586_v23 = vrot.slane %v1244_v12, %v3910_v38  ;;  %v1592_v30 = vrot.slane %v1582_v39, %v3907_v41  ;;  %v3097_v12 = vld [vmem:[#allocation15 + $0x154] ss:$8 sps:$4 sm:$0xff]   ;;  %v3106_v42 = vld [vmem:[#allocation15 + $0x184] ss:$8 sps:$4 sm:$0xff]   ;;  %v3116_v39 = vld [vmem:[#allocation15 + $0x1c0] ss:$8 sps:$4 sm:$0xff]  }
 0x59a   :  { %v1333_v44 = vadd.f32 %v1329_v27, %v1311_v35  ;;  %v1332_v45 = vadd.f32 %v1325_v28, %v1310_v40 }
 0x59b   :  { %v1596_v22 = vrot.slane %v1586_v23, %v3907_v41  ;;  %v3121_v23 = vld [vmem:[#allocation15 + $0x1d4] ss:$8 sps:$4 sm:$0xff]  }
 0x59c   :  { %v1337_v46 = vmax.f32 %v1333_v44, 0.0  ;;  %v1336_v48 = vmax.f32 %v1332_v45, 0.0  ;;  %v3104_v44 = vld [vmem:[#allocation15 + $0x180] ss:$8 sps:$4 sm:$0xff]   ;;  %v3109_v45 = vld [vmem:[#allocation15 + $0x194] ss:$8 sps:$4 sm:$0xff]  }
 0x59e   :  { %v1339_v50 = vpack.c.bf16 %v1337_v46, %v1335_v32  ;;  %v1338_v52 = vpack.c.bf16 %v1336_v48, %v1334_v33  ;;  %v3107_v32 = vld [vmem:[#allocation15 + $0x190] ss:$8 sps:$4 sm:$0xff]   ;;  %v3112_v46 = vld [vmem:[#allocation15 + $0x1a4] ss:$8 sps:$4 sm:$0xff]   ;;  %v3110_v33 = vld [vmem:[#allocation15 + $0x1a0] ss:$8 sps:$4 sm:$0xff]  }
 0x59f   :  { %v3115_v48 = vld [vmem:[#allocation15 + $0x1b4] ss:$8 sps:$4 sm:$0xff]  }
 0x5a0   :  { %1564 = vmatprep.mubr.bf16.mxu1 %v1339_v50  ;;  %v3113_v50 = vld [vmem:[#allocation15 + $0x1b0] ss:$8 sps:$4 sm:$0xff]  }
 0x5a1   :  { %1565 = vmatmul.mubr.bf16.vlgmr.msra.gmra.mrb[8].mxu1 %v1338_v52  ;;  %v3118_v52 = vld [vmem:[#allocation15 + $0x1c4] ss:$8 sps:$4 sm:$0xff]  }
 0x674   :  { %v1566_v54 = vpop.f32.mrb[8].mxu1 }
 0x675   :  { %v1575_v0 = vadd.f32 %v1566_v54, %v3853_v1  ;;  %v1568_v26 = vpop.f32.mrb[9].mxu1  ;;  %v3124_v54 = vld [vmem:[#allocation15 + $0x1e4] ss:$8 sps:$4 sm:$0xff]  }
 0x676   :  { %v1576_v47 = vadd.f32 %v1568_v26, %v3855_v25  ;;  %v1570_v49 = vpop.f32.mrb[10].mxu1  ;;  %v3125_v26 = vld [vmem:[#allocation15 + $0x1f0] ss:$8 sps:$4 sm:$0xff]  }
 0x677   :  { %v3918_v51 = vadd.f32 %v1592_v30, %v1575_v0  ;;  %v1577_v55 = vadd.f32 %v1570_v49, %v3857_v7  ;;  %v1572_v56 = vpop.f32.mrb[11].mxu1  ;;  %v3085_v7 = vld [vmem:[#allocation15 + $0x114] ss:$8 sps:$4 sm:$0xff]  }
 0x678   :  { %v3921_v5 = vadd.f32 %v1596_v22, %v1576_v47  ;;  %v1578_v57 = vadd.f32 %v1572_v56, %v3859_v8  ;;  %1893 = vmatprep.subr.bf16.mxu0 %v3085_v7  ;;  %v3088_v8 = vld [vmem:[#allocation15 + $0x124] ss:$8 sps:$4 sm:$0xff]   ;;  %v3127_v0 = vld [vmem:[#allocation15 + $0x1f4] ss:$8 sps:$4 sm:$0xff]  }
 0x679   :  { %v3924_v53 = vadd.f32 %v1592_v30, %v1577_v55  ;;  %1894 = vmatpush1.bf16.msra.mxu0 %v3083_v3  ;;  %v3119_v30 = vld [vmem:[#allocation15 + $0x1d0] ss:$8 sps:$4 sm:$0xff]  }
 0x67a   :  { %v3926_v62 = vadd.f32 %v1596_v22, %v1578_v57  ;;  %v1609_v1 = vadd.f32 %v3921_v5, %v3918_v51  ;;  %1895 = vmatprep.subr.bf16.mxu0 %v3088_v8  ;;  %v3122_v22 = vld [vmem:[#allocation15 + $0x1e0] ss:$8 sps:$4 sm:$0xff]  }
 0x67c   :  { %1610 = vadd.xlane.f32.xlu1 %v1609_v1  ;;  %v1612_v25 = vadd.f32 %v3926_v62, %v3924_v53 }
 0x67d   :  { %1896 = vmatpush1.bf16.msra.mxu0 %v3086_v4  ;;  %v1245_v4 = vld [vmem:[%s4092_s13 + $0x8] sm:$0x77] }
 0x67e   :  { %1897 = vmatprep.subr.bf16.mxu0 %v3091_v6  ;;  %v1655_v6 = vrot.slane %v1245_v4, %v3886_v10 }
 0x680   :  { %1613 = vadd.xlane.f32.xlu1 %v1612_v25 }
 0x681   :  { %1898 = vmatpush1.bf16.msra.mxu0 %v3089_v43  ;;  %v1651_v43 = vrot.slane %v1245_v4, %v3843_v59 }
 0x682   :  { %1899 = vmatprep.subr.bf16.mxu0 %v3094_v9  ;;  %v1665_v9 = vrot.slane %v1655_v6, %v3843_v59  ;;  %v3143_v6 = vld [vmem:[#allocation15 + $0x250] ss:$8 sps:$4 sm:$0xff]  }
 0x685   :  { %1900 = vmatpush1.bf16.msra.mxu0 %v3092_v11  ;;  %v1677_v11 = vrot.slane %v1245_v4, %v3893_v13 }
 0x686   :  { %1901 = vmatprep.subr.bf16.mxu0 %v3097_v12  ;;  %v1661_v12 = vrot.slane %v1651_v43, %v3843_v59  ;;  %v3148_v43 = vld [vmem:[#allocation15 + $0x264] ss:$8 sps:$4 sm:$0xff]  }
 0x689   :  { %1902 = vmatpush1.bf16.msra.mxu0 %v3095_v2  ;;  %v1673_v2 = vrot.slane %v1245_v4, %v3849_v61 }
 0x68a   :  { %1903 = vmatprep.subr.bf16.mxu0 %v3100_v14 }
 0x68d   :  { %1904 = vmatpush1.bf16.msra.mxu0 %v3098_v15 }
 0x68e   :  { %1905 = vmatprep.subr.bf16.mxu0 %v3103_v16 }
 0x691   :  { %1906 = vmatpush1.bf16.msra.mxu0 %v3101_v17 }
 0x692   :  { %1907 = vmatprep.subr.bf16.mxu0 %v3106_v42 }
 0x695   :  { %1908 = vmatpush1.bf16.msra.mxu0 %v3104_v44 }
 0x696   :  { %1909 = vmatprep.subr.bf16.mxu0 %v3109_v45 }
 0x699   :  { %1910 = vmatpush1.bf16.msra.mxu0 %v3107_v32 }
 0x69a   :  { %1911 = vmatprep.subr.bf16.mxu0 %v3112_v46 }
 0x69d   :  { %1912 = vmatpush1.bf16.msra.mxu0 %v3110_v33 }
 0x69e   :  { %1913 = vmatprep.subr.bf16.mxu0 %v3115_v48  ;;  %v1941_v48 = vrot.slane %v1245_v4, %v3907_v41 }
 0x6a1   :  { %1914 = vmatpush1.bf16.msra.mxu0 %v3113_v50 }
 0x6a2   :  { %1915 = vmatprep.subr.bf16.mxu0 %v3118_v52 }
 0x6a5   :  { %1916 = vmatpush1.bf16.msra.mxu0 %v3116_v39 }
 0x6a6   :  { %1917 = vmatprep.subr.bf16.mxu0 %v3121_v23 }
 0x6a9   :  { %1918 = vmatpush1.bf16.msra.mxu0 %v3119_v30 }
 0x6aa   :  { %1919 = vmatprep.subr.bf16.mxu0 %v3124_v54 }
 0x6ad   :  { %1920 = vmatpush1.bf16.msra.mxu0 %v3122_v22 }
 0x6ae   :  { %1921 = vmatprep.subr.bf16.mxu0 %v3127_v0 }
 0x6b1   :  { %1922 = vmatpush1.bf16.msra.mxu0 %v3125_v26 }
 0x709   :  { %v1611_v36 = vpop.xlane.xlu1 %1610 }
 0x70a   :  { %v1615_v18 = vmul.f32 0.00390625, %v1611_v36  ;;  %v1687_v36 = vrot.slane %v1677_v11, %v3849_v61  ;;  %v3151_v11 = vld [vmem:[#allocation15 + $0x274] ss:$8 sps:$4 sm:$0xff]  }
 0x70c   :  { %v3933_v19 = vsub.f32 %v3918_v51, %v1615_v18  ;;  %v3936_v20 = vsub.f32 %v3921_v5, %v1615_v18  ;;  %v1631_v47 = vmul.f32 %v1615_v18, %v1615_v18 }
 0x70d   :  { %v1614_v21 = vpop.xlane.xlu1 %1613 }
 0x70e   :  { %v1616_v27 = vmul.f32 0.00390625, %v1614_v21  ;;  %v1621_v24 = vmul.f32 %v3933_v19, %v3933_v19  ;;  %v1622_v28 = vmul.f32 %v3936_v20, %v3936_v20  ;;  %v1633_v49 = vmul.f32 0.0, %v1631_v47 }
 0x70f   :  { %v1683_v21 = vrot.slane %v1673_v2, %v3849_v61 }
 0x710   :  { %v3943_v29 = vsub.f32 %v3924_v53, %v1616_v27  ;;  %v3946_v31 = vsub.f32 %v3926_v62, %v1616_v27  ;;  %v1625_v34 = vadd.f32 %v1622_v28, %v1621_v24  ;;  %v1632_v55 = vmul.f32 %v1616_v27, %v1616_v27 }
 0x712   :  { %1626 = vadd.xlane.f32.xlu1 %v1625_v34  ;;  %v1623_v35 = vmul.f32 %v3943_v29, %v3943_v29  ;;  %v1624_v37 = vmul.f32 %v3946_v31, %v3946_v31  ;;  %v1634_v25 = vmul.f32 0.0, %v1632_v55 }
 0x714   :  { %v1628_v40 = vadd.f32 %v1624_v37, %v1623_v35 }
 0x716   :  { %1629 = vadd.xlane.f32.xlu1 %v1628_v40 }
 0x79f   :  { %v1627_v56 = vpop.xlane.xlu1 %1626 }
 0x7a0   :  { %v1635_v57 = vsub.f32 %v1627_v56, %v1633_v49 }
 0x7a2   :  { %v1637_v1 = vmul.f32 0.00390625, %v1635_v57  ;;  %v3128_v57 = vld [vmem:[#allocation15 + $0x200] ss:$8 sps:$4 sm:$0xff]  }
 0x7a3   :  { %v1630_v60 = vpop.xlane.xlu1 %1629 }
 0x7a4   :  { %v1639_v63 = vadd.f32 1e-05, %v1637_v1  ;;  %v1636_v7 = vsub.f32 %v1630_v60, %v1634_v25  ;;  %v3130_v1 = vld [vmem:[#allocation15 + $0x204] ss:$8 sps:$4 sm:$0xff]   ;;  %v3131_v25 = vld [vmem:[#allocation15 + $0x210] ss:$8 sps:$4 sm:$0xff]  }
 0x7a5   :  { %2250 = vmatprep.subr.bf16.mxu1 %v3130_v1  ;;  %v3134_v60 = vld [vmem:[#allocation15 + $0x220] ss:$8 sps:$4 sm:$0xff]  }
 0x7a6   :  { %3212 = vrsqrt.f32 %v1639_v63  ;;  %v1638_v3 = vmul.f32 0.00390625, %v1636_v7  ;;  %2251 = vmatpush1.bf16.msra.mxu1 %v3128_v57  ;;  %v3139_v63 = vld [vmem:[#allocation15 + $0x234] ss:$8 sps:$4 sm:$0xff]   ;;  %v3137_v7 = vld [vmem:[#allocation15 + $0x230] ss:$8 sps:$4 sm:$0xff]  }
 0x7a8   :  { %v1640_v8 = vadd.f32 1e-05, %v1638_v3  ;;  %v3142_v3 = vld [vmem:[#allocation15 + $0x244] ss:$8 sps:$4 sm:$0xff]  }
 0x7aa   :  { %3214 = vrsqrt.f32 %v1640_v8  ;;  %v3140_v8 = vld [vmem:[#allocation15 + $0x240] ss:$8 sps:$4 sm:$0xff]  }
 0x7b0   :  { %v3213_v14 = vpop.eup %3212 }
 0x7b1   :  { %v1643_v15 = vmul.f32 %v3213_v14, %v3933_v19  ;;  %v1644_v16 = vmul.f32 %v3213_v14, %v3936_v20 }
 0x7b3   :  { %v1667_v17 = vmul.f32 %v1665_v9, %v1644_v16  ;;  %v1666_v18 = vmul.f32 %v1661_v12, %v1643_v15 }
 0x7b4   :  { %v3215_v27 = vpop.eup %3214 }
 0x7b5   :  { %v1645_v24 = vmul.f32 %v3215_v27, %v3943_v29  ;;  %v1646_v28 = vmul.f32 %v3215_v27, %v3946_v31  ;;  %v1689_v35 = vadd.f32 %v1687_v36, %v1667_v17  ;;  %v1688_v40 = vadd.f32 %v1683_v21, %v1666_v18 }
 0x7b6   :  { %v1945_v29 = vrot.slane %v1245_v4, %v3910_v38  ;;  %v1951_v31 = vrot.slane %v1941_v48, %v3907_v41  ;;  %v3145_v4 = vld [vmem:[#allocation15 + $0x254] ss:$8 sps:$4 sm:$0xff]   ;;  %v3164_v48 = vld [vmem:[#allocation15 + $0x2c0] ss:$8 sps:$4 sm:$0xff]  }
 0x7b7   :  { %v1669_v34 = vmul.f32 %v1665_v9, %v1646_v28  ;;  %v1668_v37 = vmul.f32 %v1661_v12, %v1645_v24  ;;  %v1693_v19 = vmax.f32 %v1689_v35, 0.0  ;;  %v1692_v20 = vmax.f32 %v1688_v40, 0.0  ;;  %v3146_v9 = vld [vmem:[#allocation15 + $0x260] ss:$8 sps:$4 sm:$0xff]   ;;  %v3149_v12 = vld [vmem:[#allocation15 + $0x270] ss:$8 sps:$4 sm:$0xff]  }
 0x7b8   :  { %v1955_v52 = vrot.slane %v1945_v29, %v3907_v41  ;;  %v3154_v40 = vld [vmem:[#allocation15 + $0x284] ss:$8 sps:$4 sm:$0xff]   ;;  %v3169_v29 = vld [vmem:[#allocation15 + $0x2d4] ss:$8 sps:$4 sm:$0xff]  }
 0x7b9   :  { %v1691_v42 = vadd.f32 %v1687_v36, %v1669_v34  ;;  %v1690_v44 = vadd.f32 %v1683_v21, %v1668_v37 }
 0x7bb   :  { %v1695_v45 = vmax.f32 %v1691_v42, 0.0  ;;  %v1694_v32 = vmax.f32 %v1690_v44, 0.0  ;;  %v3152_v42 = vld [vmem:[#allocation15 + $0x280] ss:$8 sps:$4 sm:$0xff]   ;;  %v3157_v44 = vld [vmem:[#allocation15 + $0x294] ss:$8 sps:$4 sm:$0xff]  }
 0x7bd   :  { %v1697_v46 = vpack.c.bf16 %v1695_v45, %v1693_v19  ;;  %v1696_v33 = vpack.c.bf16 %v1694_v32, %v1692_v20  ;;  %v3155_v19 = vld [vmem:[#allocation15 + $0x290] ss:$8 sps:$4 sm:$0xff]   ;;  %v3160_v45 = vld [vmem:[#allocation15 + $0x2a4] ss:$8 sps:$4 sm:$0xff]   ;;  %v3158_v20 = vld [vmem:[#allocation15 + $0x2a0] ss:$8 sps:$4 sm:$0xff]  }
 0x7be   :  { %v3163_v32 = vld [vmem:[#allocation15 + $0x2b4] ss:$8 sps:$4 sm:$0xff]  }
 0x7bf   :  { %1923 = vmatprep.mubr.bf16.mxu0 %v1697_v46  ;;  %v3161_v46 = vld [vmem:[#allocation15 + $0x2b0] ss:$8 sps:$4 sm:$0xff]  }
 0x7c0   :  { %1924 = vmatmul.mubr.bf16.vlgmr.msra.gmra.mrb[8].mxu0 %v1696_v33  ;;  %v3166_v33 = vld [vmem:[#allocation15 + $0x2c4] ss:$8 sps:$4 sm:$0xff]  }
 0x893   :  { %v1925_v50 = vpop.f32.mrb[8].mxu0 }
 0x894   :  { %v1934_v39 = vadd.f32 %v1925_v50, %v3918_v51  ;;  %v1927_v23 = vpop.f32.mrb[9].mxu0  ;;  %v3172_v50 = vld [vmem:[#allocation15 + $0x2e4] ss:$8 sps:$4 sm:$0xff]  }
 0x895   :  { %v1935_v30 = vadd.f32 %v1927_v23, %v3921_v5  ;;  %v1929_v54 = vpop.f32.mrb[10].mxu0  ;;  %v3173_v23 = vld [vmem:[#allocation15 + $0x2f0] ss:$8 sps:$4 sm:$0xff]  }
 0x896   :  { %v3973_v22 = vadd.f32 %v1951_v31, %v1934_v39  ;;  %v1936_v0 = vadd.f32 %v1929_v54, %v3924_v53  ;;  %v1931_v26 = vpop.f32.mrb[11].mxu0  ;;  %v3133_v53 = vld [vmem:[#allocation15 + $0x214] ss:$8 sps:$4 sm:$0xff]  }
 0x897   :  { %v3976_v47 = vadd.f32 %v1955_v52, %v1935_v30  ;;  %v1937_v49 = vadd.f32 %v1931_v26, %v3926_v62  ;;  %2252 = vmatprep.subr.bf16.mxu1 %v3133_v53  ;;  %v3136_v62 = vld [vmem:[#allocation15 + $0x224] ss:$8 sps:$4 sm:$0xff]   ;;  %v3175_v39 = vld [vmem:[#allocation15 + $0x2f4] ss:$8 sps:$4 sm:$0xff]  }
 0x898   :  { %v3979_v55 = vadd.f32 %v1951_v31, %v1936_v0  ;;  %2253 = vmatpush1.bf16.msra.mxu1 %v3131_v25  ;;  %v3167_v31 = vld [vmem:[#allocation15 + $0x2d0] ss:$8 sps:$4 sm:$0xff]  }
 0x899   :  { %v3981_v56 = vadd.f32 %v1955_v52, %v1937_v49  ;;  %v1968_v51 = vadd.f32 %v3976_v47, %v3973_v22  ;;  %2254 = vmatprep.subr.bf16.mxu1 %v3136_v62  ;;  %v3170_v52 = vld [vmem:[#allocation15 + $0x2e0] ss:$8 sps:$4 sm:$0xff]  }
 0x89b   :  { %1969 = vadd.xlane.f32.xlu1 %v1968_v51  ;;  %v1971_v5 = vadd.f32 %v3981_v56, %v3979_v55 }
 0x89c   :  { %2255 = vmatpush1.bf16.msra.mxu1 %v3134_v60  ;;  %v1246_v60 = vld [vmem:[%s4092_s13 + $0x10] sm:$0x77] }
 0x89d   :  { %2256 = vmatprep.subr.bf16.mxu1 %v3139_v63  ;;  %v2014_v63 = vrot.slane %v1246_v60, %v3886_v10 }
 0x89f   :  { %1972 = vadd.xlane.f32.xlu1 %v1971_v5 }
 0x8a0   :  { %2257 = vmatpush1.bf16.msra.mxu1 %v3137_v7  ;;  %v2010_v7 = vrot.slane %v1246_v60, %v3843_v59 }
 0x8a1   :  { %2258 = vmatprep.subr.bf16.mxu1 %v3142_v3  ;;  %v2024_v3 = vrot.slane %v2014_v63, %v3843_v59 }
 0x8a4   :  { %2259 = vmatpush1.bf16.msra.mxu1 %v3140_v8  ;;  %v2036_v8 = vrot.slane %v1246_v60, %v3893_v13 }
 0x8a5   :  { %2260 = vmatprep.subr.bf16.mxu1 %v3145_v4  ;;  %v2020_v4 = vrot.slane %v2010_v7, %v3843_v59 }
 0x8a8   :  { %2261 = vmatpush1.bf16.msra.mxu1 %v3143_v6  ;;  %v2032_v6 = vrot.slane %v1246_v60, %v3849_v61 }
 0x8a9   :  { %2262 = vmatprep.subr.bf16.mxu1 %v3148_v43 }
 0x8aa   :  { %v2042_v10 = vrot.slane %v2032_v6, %v3849_v61  ;;  %v3181_v6 = vld [vmem:[#allocation17 + $0x10] sm:$0xff]  }
 0x8ac   :  { %2263 = vmatpush1.bf16.msra.mxu1 %v3146_v9 }
 0x8ad   :  { %2264 = vmatprep.subr.bf16.mxu1 %v3151_v11 }
 0x8b0   :  { %2265 = vmatpush1.bf16.msra.mxu1 %v3149_v12 }
 0x8b1   :  { %2266 = vmatprep.subr.bf16.mxu1 %v3154_v40 }
 0x8b4   :  { %2267 = vmatpush1.bf16.msra.mxu1 %v3152_v42 }
 0x8b5   :  { %2268 = vmatprep.subr.bf16.mxu1 %v3157_v44 }
 0x8b8   :  { %2269 = vmatpush1.bf16.msra.mxu1 %v3155_v19 }
 0x8b9   :  { %2270 = vmatprep.subr.bf16.mxu1 %v3160_v45  ;;  %v2300_v45 = vrot.slane %v1246_v60, %v3907_v41 }
 0x8bc   :  { %2271 = vmatpush1.bf16.msra.mxu1 %v3158_v20 }
 0x8bd   :  { %2272 = vmatprep.subr.bf16.mxu1 %v3163_v32 }
 0x8c0   :  { %2273 = vmatpush1.bf16.msra.mxu1 %v3161_v46 }
 0x8c1   :  { %2274 = vmatprep.subr.bf16.mxu1 %v3166_v33 }
 0x8c4   :  { %2275 = vmatpush1.bf16.msra.mxu1 %v3164_v48 }
 0x8c5   :  { %2276 = vmatprep.subr.bf16.mxu1 %v3169_v29 }
 0x8c8   :  { %2277 = vmatpush1.bf16.msra.mxu1 %v3167_v31 }
 0x8c9   :  { %2278 = vmatprep.subr.bf16.mxu1 %v3172_v50 }
 0x8cc   :  { %2279 = vmatpush1.bf16.msra.mxu1 %v3170_v52 }
 0x8cd   :  { %2280 = vmatprep.subr.bf16.mxu1 %v3175_v39 }
 0x8d0   :  { %2281 = vmatpush1.bf16.msra.mxu1 %v3173_v23 }
 0x928   :  { %v1970_v2 = vpop.xlane.xlu1 %1969 }
 0x929   :  { %v1974_v14 = vmul.f32 0.00390625, %v1970_v2  ;;  %v2046_v2 = vrot.slane %v2036_v8, %v3849_v61  ;;  %v3179_v8 = vld [vmem:[#allocation17 + $0x8] sm:$0xff]  }
 0x92b   :  { %v3988_v15 = vsub.f32 %v3973_v22, %v1974_v14  ;;  %v3991_v16 = vsub.f32 %v3976_v47, %v1974_v14  ;;  %v1990_v30 = vmul.f32 %v1974_v14, %v1974_v14 }
 0x92c   :  { %v1973_v17 = vpop.xlane.xlu1 %1972 }
 0x92d   :  { %v1975_v36 = vmul.f32 0.00390625, %v1973_v17  ;;  %v1980_v18 = vmul.f32 %v3988_v15, %v3988_v15  ;;  %v1981_v21 = vmul.f32 %v3991_v16, %v3991_v16  ;;  %v1992_v54 = vmul.f32 0.0, %v1990_v30 }
 0x92f   :  { %v3998_v27 = vsub.f32 %v3979_v55, %v1975_v36  ;;  %v4001_v24 = vsub.f32 %v3981_v56, %v1975_v36  ;;  %v1984_v28 = vadd.f32 %v1981_v21, %v1980_v18  ;;  %v1991_v0 = vmul.f32 %v1975_v36, %v1975_v36 }
 0x931   :  { %1985 = vadd.xlane.f32.xlu1 %v1984_v28  ;;  %v1982_v34 = vmul.f32 %v3998_v27, %v3998_v27  ;;  %v1983_v35 = vmul.f32 %v4001_v24, %v4001_v24  ;;  %v1993_v5 = vmul.f32 0.0, %v1991_v0 }
 0x933   :  { %v1987_v37 = vadd.f32 %v1983_v35, %v1982_v34 }
 0x935   :  { %1988 = vadd.xlane.f32.xlu0 %v1987_v37 }
 0x9be   :  { %v1986_v26 = vpop.xlane.xlu1 %1985 }
 0x9bf   :  { %v1994_v49 = vsub.f32 %v1986_v26, %v1992_v54  ;;  %v3176_v26 = vld [vmem:[#allocation17 + $0x40] sm:$0xff]  }
 0x9c0   :  { %2834 = vmatprep.subr.bf16.mxu0 %v3176_v26 }
 0x9c1   :  { %v1996_v51 = vmul.f32 0.00390625, %v1994_v49  ;;  %v3177_v49 = vld [vmem:[#allocation17] sm:$0xff]  }
 0x9c2   :  { %v1989_v57 = vpop.xlane.xlu0 %1988  ;;  %2835 = vmatpush3.bf16.msra.mxu0 %v3177_v49 }
 0x9c3   :  { %v1998_v1 = vadd.f32 1e-05, %v1996_v51  ;;  %v1995_v53 = vsub.f32 %v1989_v57, %v1993_v5 }
 0x9c5   :  { %3216 = vrsqrt.f32 %v1998_v1  ;;  %v1997_v25 = vmul.f32 0.00390625, %v1995_v53 }
 0x9c7   :  { %v1999_v62 = vadd.f32 1e-05, %v1997_v25 }
 0x9c9   :  { %3218 = vrsqrt.f32 %v1999_v62 }
 0x9cf   :  { %v3217_v43 = vpop.eup %3216 }
 0x9d0   :  { %v2002_v9 = vmul.f32 %v3217_v43, %v3988_v15  ;;  %v2003_v11 = vmul.f32 %v3217_v43, %v3991_v16  ;;  %v3182_v43 = vld [vmem:[#allocation17 + $0x58] sm:$0xff]  }
 0x9d2   :  { %v2026_v12 = vmul.f32 %v2024_v3, %v2003_v11  ;;  %v2025_v14 = vmul.f32 %v2020_v4, %v2002_v9  ;;  %v3183_v9 = vld [vmem:[#allocation17 + $0x18] sm:$0xff]   ;;  %v3184_v11 = vld [vmem:[#allocation17 + $0x60] sm:$0xff]  }
 0x9d3   :  { %v3219_v17 = vpop.eup %3218 }
 0x9d4   :  { %v2004_v36 = vmul.f32 %v3219_v17, %v3998_v27  ;;  %v2005_v13 = vmul.f32 %v3219_v17, %v4001_v24  ;;  %v2048_v21 = vadd.f32 %v2046_v2, %v2026_v12  ;;  %v2047_v34 = vadd.f32 %v2042_v10, %v2025_v14  ;;  %v3185_v12 = vld [vmem:[#allocation17 + $0x20] sm:$0xff]   ;;  %v3187_v14 = vld [vmem:[#allocation17 + $0x28] sm:$0xff]   ;;  %v3189_v17 = vld [vmem:[#allocation17 + $0x30] sm:$0xff]  }
 0x9d5   :  { %v2304_v27 = vrot.slane %v1246_v60, %v3910_v38  ;;  %v2310_v24 = vrot.slane %v2300_v45, %v3907_v41  ;;  %v2323_v45 = vld [vmem:[%s4093_s14] sm:$0xf] }
 0x9d6   :  { %v2028_v18 = vmul.f32 %v2024_v3, %v2005_v13  ;;  %v2027_v28 = vmul.f32 %v2020_v4, %v2004_v36  ;;  %v2052_v15 = vmax.f32 %v2048_v21, 0.0  ;;  %v2051_v16 = vmax.f32 %v2047_v34, 0.0  ;;  %v3178_v3 = vld [vmem:[#allocation17 + $0x48] sm:$0xff]   ;;  %v3180_v4 = vld [vmem:[#allocation17 + $0x50] sm:$0xff]   ;;  %v3190_v36 = vld [vmem:[#allocation17 + $0x78] sm:$0xff]  }
 0x9d7   :  { %v2314_v32 = vrot.slane %v2304_v27, %v3907_v41  ;;  %2836 = vmatprep.subr.bf16.mxu0 %v3178_v3  ;;  %v3191_v13 = vld [vmem:[#allocation17 + $0x38] sm:$0xff]   ;;  %v2395_v27 = vsub.s32 3, %v3840_v58 }
 0x9d8   :  { %v2050_v35 = vadd.f32 %v2046_v2, %v2028_v18  ;;  %v2049_v37 = vadd.f32 %v2042_v10, %v2027_v28  ;;  %2837 = vmatpush3.bf16.msra.mxu0 %v3179_v8  ;;  %v3186_v2 = vld [vmem:[#allocation17 + $0x68] sm:$0xff]   ;;  %v3188_v10 = vld [vmem:[#allocation17 + $0x70] sm:$0xff]  }
 0x9d9   :  { %2838 = vmatprep.subr.bf16.mxu0 %v3180_v4 }
 0x9da   :  { %v2054_v40 = vmax.f32 %v2050_v35, 0.0  ;;  %v2053_v42 = vmax.f32 %v2049_v37, 0.0 }
 0x9dc   :  { %v2056_v44 = vpack.c.bf16 %v2054_v40, %v2052_v15  ;;  %v2055_v19 = vpack.c.bf16 %v2053_v42, %v2051_v16  ;;  %2839 = vmatpush3.bf16.msra.mxu0 %v3181_v6 }
 0x9dd   :  { %2840 = vmatprep.subr.bf16.mxu0 %v3182_v43 }
 0x9de   :  { %2282 = vmatprep.mubr.bf16.mxu1 %v2056_v44 }
 0x9df   :  { %2283 = vmatmul.mubr.bf16.vlgmr.msra.gmra.mrb[12].mxu1 %v2055_v19 }
 0x9e0   :  { %2841 = vmatpush3.bf16.msra.mxu0 %v3183_v9 }
 0x9e1   :  { %2842 = vmatprep.subr.bf16.mxu0 %v3184_v11 }
 0x9e4   :  { %2843 = vmatpush3.bf16.msra.mxu0 %v3185_v12 }
 0x9e5   :  { %2844 = vmatprep.subr.bf16.mxu0 %v3186_v2 }
 0x9e8   :  { %2845 = vmatpush3.bf16.msra.mxu0 %v3187_v14 }
 0x9e9   :  { %2846 = vmatprep.subr.bf16.mxu0 %v3188_v10 }
 0x9ec   :  { %2847 = vmatpush3.bf16.msra.mxu0 %v3189_v17 }
 0x9ed   :  { %2848 = vmatprep.subr.bf16.mxu0 %v3190_v36 }
 0x9f0   :  { %2849 = vmatpush3.bf16.msra.mxu0 %v3191_v13 }
 0xab2   :  { %v2284_v20 = vpop.f32.mrb[12].mxu1 }
 0xab3   :  { %v2293_v46 = vadd.f32 %v2284_v20, %v3973_v22  ;;  %v2286_v33 = vpop.f32.mrb[13].mxu1  ;;  %v2370_v20 = vrot.slane %v2323_v45, %v3843_v59 }
 0xab4   :  { %v2294_v48 = vadd.f32 %v2286_v33, %v3976_v47  ;;  %v2288_v29 = vpop.f32.mrb[14].mxu1 }
 0xab5   :  { %v2315_v31 = vadd.f32 %v2310_v24, %v2293_v46  ;;  %v2295_v50 = vadd.f32 %v2288_v29, %v3979_v55  ;;  %v2290_v52 = vpop.f32.mrb[15].mxu1  ;;  %v2392_v46 = vrot.slane %v2323_v45, %v3849_v61 }
 0xab6   :  { %v2316_v39 = vadd.f32 %v2314_v32, %v2294_v48  ;;  %v2296_v23 = vadd.f32 %v2290_v52, %v3981_v56  ;;  %v2380_v48 = vrot.slane %v2370_v20, %v3843_v59 }
 0xab7   :  { %v2317_v30 = vadd.f32 %v2310_v24, %v2295_v50  ;;  %v2374_v24 = vrot.slane %v2323_v45, %v3907_v41  ;;  %v2402_v58 = vrot.slane %v2392_v46, %v3849_v61 }
 0xab8   :  { %v2318_v38 = vadd.f32 %v2314_v32, %v2296_v23  ;;  %v2328_v54 = vadd.f32 %v2316_v39, %v2315_v31  ;;  %v2396_v32 = vrot.slane %v2323_v45, %v2395_v27 }
 0xab9   :  { %v2384_v33 = vrot.slane %v2374_v24, %v3843_v59 }
 0xaba   :  { %2329 = vadd.xlane.f32.xlu1 %v2328_v54  ;;  %v2331_v0 = vadd.f32 %v2318_v38, %v2317_v30  ;;  %v2406_v52 = vrot.slane %v2396_v32, %v3849_v61 }
 0xabc   :  { %2332 = vadd.xlane.f32.xlu0 %v2331_v0 }
 0xb47   :  { %v2330_v22 = vpop.xlane.xlu1 %2329 }
 0xb48   :  { %v2334_v47 = vmul.f32 0.00390625, %v2330_v22 }
 0xb49   :  { %v2333_v51 = vpop.xlane.xlu0 %2332 }
 0xb4a   :  { %v4030_v5 = vsub.f32 %v2315_v31, %v2334_v47  ;;  %v4032_v55 = vsub.f32 %v2316_v39, %v2334_v47  ;;  %v2335_v57 = vmul.f32 0.00390625, %v2333_v51  ;;  %v2350_v18 = vmul.f32 %v2334_v47, %v2334_v47 }
 0xb4c   :  { %v4034_v1 = vsub.f32 %v2317_v30, %v2335_v57  ;;  %v4036_v56 = vsub.f32 %v2318_v38, %v2335_v57  ;;  %v2340_v53 = vmul.f32 %v4030_v5, %v4030_v5  ;;  %v2341_v25 = vmul.f32 %v4032_v55, %v4032_v55 }
 0xb4d   :  { %v2351_v21 = vmul.f32 %v2335_v57, %v2335_v57  ;;  %v2352_v28 = vmul.f32 0.0, %v2350_v18 }
 0xb4e   :  { %v2344_v62 = vadd.f32 %v2341_v25, %v2340_v53  ;;  %v2342_v60 = vmul.f32 %v4034_v1, %v4034_v1  ;;  %v2343_v63 = vmul.f32 %v4036_v56, %v4036_v56 }
 0xb4f   :  { %v2353_v37 = vmul.f32 0.0, %v2351_v21 }
 0xb50   :  { %2345 = vadd.xlane.f32.xlu1 %v2344_v62  ;;  %v2347_v7 = vadd.f32 %v2343_v63, %v2342_v60 }
 0xb52   :  { %2348 = vadd.xlane.f32.xlu0 %v2347_v7 }
 0xbdd   :  { %v2346_v34 = vpop.xlane.xlu1 %2345 }
 0xbde   :  { %v2354_v35 = vsub.f32 %v2346_v34, %v2352_v28 }
 0xbdf   :  { %v2349_v15 = vpop.xlane.xlu0 %2348 }
 0xbe0   :  { %v2356_v40 = vmul.f32 0.00390625, %v2354_v35  ;;  %v2355_v16 = vsub.f32 %v2349_v15, %v2353_v37 }
 0xbe2   :  { %v2358_v42 = vadd.f32 1e-05, %v2356_v40  ;;  %v2357_v44 = vmul.f32 0.00390625, %v2355_v16 }
 0xbe4   :  { %3220 = vrsqrt.f32 %v2358_v42  ;;  %v2359_v19 = vadd.f32 1e-05, %v2357_v44 }
 0xbe6   :  { %3222 = vrsqrt.f32 %v2359_v19 }
 0xbee   :  { %v3221_v29 = vpop.eup %3220 }
 0xbef   :  { %v2362_v31 = vmul.f32 %v3221_v29, %v4030_v5  ;;  %v2363_v50 = vmul.f32 %v3221_v29, %v4032_v55 }
 0xbf0   :  { %v3223_v39 = vpop.eup %3222 }
 0xbf1   :  { %v2364_v41 = vmul.f32 %v3223_v39, %v4034_v1  ;;  %v2365_v23 = vmul.f32 %v3223_v39, %v4036_v56  ;;  %v2386_v30 = vmul.f32 %v2384_v33, %v2363_v50  ;;  %v2385_v38 = vmul.f32 %v2380_v48, %v2362_v31  ;;  %v2781_v1 = vld [vmem:[%s4095_s16] ss:$0 sm:$0xff] }
 0xbf3   :  { %v2388_v54 = vmul.f32 %v2384_v33, %v2365_v23  ;;  %v2408_v0 = vadd.f32 %v2406_v52, %v2386_v30  ;;  %v2387_v26 = vmul.f32 %v2380_v48, %v2364_v41  ;;  %v2407_v59 = vadd.f32 %v2402_v58, %v2385_v38 }
 0xbf5   :  { %v2410_v49 = vadd.f32 %v2406_v52, %v2388_v54  ;;  %v2409_v22 = vadd.f32 %v2402_v58, %v2387_v26  ;;  %v2412_v47 = vmax.f32 %v2408_v0, 0.0  ;;  %v2411_v5 = vmax.f32 %v2407_v59, 0.0 }
 0xbf7   :  { %v2414_v51 = vmax.f32 %v2410_v49, 0.0  ;;  %v2413_v55 = vmax.f32 %v2409_v22, 0.0 }
 0xbf9   :  { %v2416_v57 = vpack.c.bf16 %v2414_v51, %v2412_v47  ;;  %v2415_v53 = vpack.c.bf16 %v2413_v55, %v2411_v5 }
 0xbfb   :  { %2584 = vmatprep.mubr.bf16.mxu0 %v2416_v57 }
 0xbfc   :  { %2585 = vmatmul.mubr.bf16.vlgmr.msra.gmra.mrb[12].mxu0 %v2415_v53 }
 0xccf   :  { %v2850_v61 = vpop.f32.mrb[12].mxu0 }
 0xcd0   :  { %v2851_v56 = vpop.f32.mrb[13].mxu0 }
 0xcd1   :  { %v2852_v25 = vadd.f32 %v2851_v56, %v2850_v61  ;;  %v2853_v62 = vpop.f32.mrb[14].mxu0 }
 0xcd2   :  { %v2854_v60 = vpop.f32.mrb[15].mxu0 }
 0xcd3   :  { %v2587_v63 = vadd.f32 %v2852_v25, %v2781_v1  ;;  %v2855_v7 = vadd.f32 %v2854_v60, %v2853_v62 }
 0xcd5   :  { %2593 = vst [vmem:[#allocation18] sm:$0xff] %v2587_v63  ;;  %v2590_v3 = vadd.f32 %v2855_v7, %v2781_v1 }
 0xcd7   :  { %2594 = vst [vmem:[#allocation18 + $0x8] sm:$0xff] %v2590_v3 }
 0xcd8   :  { %3433 = shalt.err (!%p3430_p6)
}
 0xcd9   :  { %s4107_s19 = sld [smem:[#allocation27_spill]] }
 0xcdf   :  { %s3434_s29 = scalar_lea.hbm %s4107_s19, 256 }
 0xce0   :  { %p3435_p7 = scmp.ne.s32.totalorder %s4107_s19, %s3434_s29  ;;  %p3438_p8 = scmp.lt.u32.totalorder %s3434_s29, %s4107_s19 }
 0xce2   :  { %p3440_p9 = pnand %p3438_p8, %p3435_p7 }
 0xce4   :  { %3443 = shalt.err (!%p3440_p9)
}
 0xce5   :  { %2606 = dma.vmem_to_hbm [thread:$0]  %s2601_s23, 256, %s4107_s19, [#allocation5], %s3463_s27, %s3463_s27, %s3464_s0  }
 0xce6   :  { %3454 = dma.done.wait [#allocation5], 256  }
 0xce7   :  { %3455 = vsyncadd [#allocation5], 4294967040 }
 0xce8   :  { %2610 = vsyncpa [#allocation4], 1 }
 0xce9   :  { %2611 = vsyncpa [#allocation7], 1 }
 0xcea   :  { %2612 = vsyncpa [#allocation10], 1 }
 0xceb   :  { %2613 = vsyncpa [#allocation13], 1 }
 0xcec   :  { %2614 = vsyncpa [#allocation16], 1 }
 0xced   :  { %2615 = vsyncpa [#allocation5], 1 }

</bundles_post_ra>
